<compile_context>
chip_gen: v7x
topology: tpu7x:2x2x1
jax: 0.10.0
libtpu: 0.0.40
codegen_flags: <defaults>
</compile_context>

<pallas_src>
import jax
import jax.numpy as jnp
from jax import lax
from jax.experimental import pallas as pl
from jax.experimental.pallas import tpu as pltpu

# ----- module hyper-parameters (from the PyTorch source) -----
BLOCK_SIZE = 32                     # block_size
N_EMBD = 384                        # n_embd
NUM_HEADS = 6
HEAD_SIZE = N_EMBD // NUM_HEADS     # 64  (num_heads * head_size == n_embd)

COMPUTE_DTYPE = jnp.bfloat16        # MXU input dtype; accumulation stays float32


# --------------------------------------------------------------------------
# Fused kernel: Bblk batch elements per grid step.
#   x_ref     : (Bblk, T, C)      float32
#   wqkv_ref  : (C, 3*H*hs)       bfloat16  [ Q heads (pre-scaled) | K heads | V heads ]
#   wproj_ref : (C, C)            bfloat16
#   bproj_ref : (1, C)            float32
#   o_ref     : (Bblk, T, C)      float32   (lane-dense output slab)
# --------------------------------------------------------------------------
def _mha_fused_kernel(x_ref, wqkv_ref, wproj_ref, bproj_ref, o_ref):
    Bblk, T, C = x_ref.shape
    H, hs = NUM_HEADS, HEAD_SIZE
    M = Bblk * T

    # Packed QKV projection: M = Bblk*T rows fill the MXU far better than T=32.
    x = x_ref[...].astype(COMPUTE_DTYPE).reshape(M, C)                 # (M, C) bf16
    qkv = jnp.dot(x, wqkv_ref[...], preferred_element_type=jnp.float32)  # (M, 3*H*hs) f32
    # Cast to bf16 once (ends the f32 live range before the head loop).
    qkv = qkv.astype(COMPUTE_DTYPE).reshape(Bblk, T, 3 * H * hs)

    # Causal mask, hoisted out of the head loop (broadcast over local batch).
    row = lax.broadcasted_iota(jnp.int32, (T, T), 0)
    col = lax.broadcasted_iota(jnp.int32, (T, T), 1)
    causal = (col <= row)[None, :, :]                                  # (1, T, T)

    head_outs = []
    for h in range(H):                                                 # statically unrolled, H = 6
        q = qkv[:, :, h * hs:(h + 1) * hs]                             # (Bblk, T, hs) bf16 (scale folded in)
        k = qkv[:, :, (H + h) * hs:(H + h + 1) * hs]                   # (Bblk, T, hs) bf16
        v = qkv[:, :, (2 * H + h) * hs:(2 * H + h + 1) * hs]           # (Bblk, T, hs) bf16

        # q @ k^T, batched over the local batch; contraction on the last dims.
        wei = jnp.einsum('bqd,bkd->bqk', q, k,
                         preferred_element_type=jnp.float32)           # (Bblk, T, T) f32
        wei = jnp.where(causal, wei, -jnp.inf)

        # Numerically-stable softmax; reciprocal goes to the EUP slot.
        wei = wei - jnp.max(wei, axis=-1, keepdims=True)
        p = jnp.exp(wei)
        inv = pl.reciprocal(jnp.sum(p, axis=-1, keepdims=True), approx=True)
        p = (p * inv).astype(COMPUTE_DTYPE)

        # Head output kept in bf16 so the concat shuffles half the vregs.
        head_outs.append(
            jnp.einsum('bqk,bkd->bqd', p, v,
                       preferred_element_type=jnp.float32).astype(COMPUTE_DTYPE))

    out_cat = jnp.concatenate(head_outs, axis=-1).reshape(M, C)        # (M, C) bf16, lane-dense

    # Output projection + bias (bias added after f32 accumulation).
    proj = jnp.dot(out_cat, wproj_ref[...],
                   preferred_element_type=jnp.float32) + bproj_ref[...]
    o_ref[...] = proj.reshape(Bblk, T, C).astype(o_ref.dtype)


# --------------------------------------------------------------------------
# One-time weight preparation (outside the jitted forward): fuse per-head
# Q/K/V weights into (C, 3*H*hs) bf16 with the C**-0.5 scale folded into the
# Q columns, and cast the projection weight to bf16.
# --------------------------------------------------------------------------
def _fuse_params(params):
    wq, wk, wv = params["wq"], params["wk"], params["wv"]      # (H, C, hs)
    H, C, hs = wq.shape
    scale = float(C) ** -0.5                                    # C = n_embd (reference semantics)

    def flat(w):  # (H, C, hs) -> (C, H*hs), head h at columns h*hs:(h+1)*hs
        return jnp.transpose(w, (1, 0, 2)).reshape(C, H * hs)

    w_qkv = jnp.concatenate(
        [flat(wq) * scale, flat(wk), flat(wv)], axis=-1).astype(COMPUTE_DTYPE)
    return dict(
        w_qkv=w_qkv,                                            # (C, 3*H*hs) bf16
        w_proj=params["w_proj"].astype(COMPUTE_DTYPE),          # (C, C) bf16
        b_proj=params["b_proj"].astype(jnp.float32),            # (1, C) f32
    )


def _pick_bblk(B, T, target_m=256):
    """Largest Bblk dividing B with Bblk*T <= target_m, keeping >= 2 grid steps
    when B >= 2 (so dimension_semantics=('parallel',) feeds both v7x TCs)."""
    best = 1
    for cand in range(1, B + 1):
        if B % cand:
            continue
        if cand * T > target_m:
            continue
        if B >= 2 and B // cand < 2:
            continue
        best = cand
    return best


# --------------------------------------------------------------------------
# Wrapper: single pallas_call, grid over packed batch blocks.
# --------------------------------------------------------------------------
@jax.jit
def multi_head_attention(x, fused):
    w_qkv, w_proj, b_proj = fused["w_qkv"], fused["w_proj"], fused["b_proj"]
    B, T, C = x.shape
    bblk = _pick_bblk(B, T)

    return pl.pallas_call(
        _mha_fused_kernel,
        out_shape=jax.ShapeDtypeStruct((B, T, C), jnp.float32),
        grid_spec=pltpu.PrefetchScalarGridSpec(
            num_scalar_prefetch=0,
            grid=(B // bblk,),
            in_specs=[
                # packed batch block -> kernel sees (Bblk, T, C)
                pl.BlockSpec((bblk, T, C), lambda b: (b, 0, 0)),
                # weights: constant index_map -> fetched once, VMEM resident
                pl.BlockSpec(w_qkv.shape, lambda b: (0, 0)),
                pl.BlockSpec(w_proj.shape, lambda b: (0, 0)),
                pl.BlockSpec(b_proj.shape, lambda b: (0, 0)),
            ],
            out_specs=pl.BlockSpec((bblk, T, C), lambda b: (b, 0, 0)),
        ),
        compiler_params=pltpu.CompilerParams(
            dimension_semantics=("parallel",)),   # >= 2 steps keeps both v7x TCs busy
    )(x, w_qkv, w_proj, b_proj)


# --------------------------------------------------------------------------
# Pure-JAX float32 reference for correctness checking.
# --------------------------------------------------------------------------
def multi_head_attention_ref(x, params):
    wq, wk, wv = params["wq"], params["wk"], params["wv"]
    w_proj, b_proj = params["w_proj"], params["b_proj"]
    B, T, C = x.shape
    outs = []
    for h in range(wq.shape[0]):
        q = x @ wq[h]
        k = x @ wk[h]
        v = x @ wv[h]
        wei = (q @ jnp.swapaxes(k, -2, -1)) * (C ** -0.5)
        mask = jnp.tril(jnp.ones((T, T), dtype=bool))
        wei = jnp.where(mask, wei, -jnp.inf)
        wei = jax.nn.softmax(wei, axis=-1)
        outs.append(wei @ v)
    out = jnp.concatenate(outs, axis=-1)
    return out @ w_proj + b_proj


# --------------------------------------------------------------------------
def _init_params(key):
    kq, kk, kv, kp, kb = jax.random.split(key, 5)
    scale = 1.0 / jnp.sqrt(jnp.float32(N_EMBD))
    wq = jax.random.normal(kq, (NUM_HEADS, N_EMBD, HEAD_SIZE), jnp.float32) * scale
    wk = jax.random.normal(kk, (NUM_HEADS, N_EMBD, HEAD_SIZE), jnp.float32) * scale
    wv = jax.random.normal(kv, (NUM_HEADS, N_EMBD, HEAD_SIZE), jnp.float32) * scale
    w_proj = jax.random.normal(kp, (N_EMBD, N_EMBD), jnp.float32) * scale
    b_proj = jax.random.normal(kb, (1, N_EMBD), jnp.float32) * 0.01
    return dict(wq=wq, wk=wk, wv=wv, w_proj=w_proj, b_proj=b_proj)


if __name__ == "__main__":
    key = jax.random.PRNGKey(0)
    kx, kp = jax.random.split(key)

    B, T = 4, BLOCK_SIZE                      # (4, 32, 384) input -> Bblk=2, grid=(2,)
    x = jax.random.normal(kx, (B, T, N_EMBD), jnp.float32)
    params = _init_params(kp)

    # One-time weight fusion (would be done at model init in a real pipeline).
    fused = _fuse_params(params)

    out = jax.block_until_ready(multi_head_attention(x, fused))
    ref = multi_head_attention_ref(x, params)

    assert out.shape == (B, T, N_EMBD)
    # bf16 MXU inputs (f32 accumulation) across three chained matmuls on O(1)-magnitude
    # activations give ~1e-2-scale absolute error; a real bug would be O(0.5+).
    max_err = float(jnp.max(jnp.abs(out - ref)))
    assert max_err < 7.5e-2, max_err
    print("KERNEL_OK")
</pallas_src>

<mosaic_0001>
module attributes {stable_mosaic.version = 11 : i64} {
  func.func @_mha_fused_kernel(%arg0: i32, %arg1: memref<2x32x384xf32, #tpu.memory_space<vmem>>, %arg2: memref<384x1152xbf16, #tpu.memory_space<vmem>>, %arg3: memref<384x384xbf16, #tpu.memory_space<vmem>>, %arg4: memref<1x384xf32, #tpu.memory_space<vmem>>, %arg5: memref<2x32x384xf32, #tpu.memory_space<vmem>>) attributes {dimension_semantics = [#tpu.dimension_semantics<parallel>], iteration_bounds = array<i64: 2>, scalar_prefetch = 0 : i64, scratch_operands = 0 : i64, tpu.core_type = #tpu.core_type<tc>, window_params = [{transform_indices = @transform_0, window_bounds = array<i64: 2, 32, 384>}, {pipeline_mode = #tpu.pipeline_mode<synchronous>, transform_indices = @transform_1, window_bounds = array<i64: 384, 1152>}, {pipeline_mode = #tpu.pipeline_mode<synchronous>, transform_indices = @transform_2, window_bounds = array<i64: 384, 384>}, {pipeline_mode = #tpu.pipeline_mode<synchronous>, transform_indices = @transform_3, window_bounds = array<i64: 1, 384>}, {transform_indices = @transform_4, window_bounds = array<i64: 2, 32, 384>}]} {
    %c0 = arith.constant 0 : index
    %c0_0 = arith.constant 0 : index
    %c0_1 = arith.constant 0 : index
    %0 = vector.load %arg1[%c0, %c0_0, %c0_1] : memref<2x32x384xf32, #tpu.memory_space<vmem>>, vector<2x32x384xf32>
    %1 = arith.truncf %0 : vector<2x32x384xf32> to vector<2x32x384xbf16>
    %2 = vector.shape_cast %1 : vector<2x32x384xbf16> to vector<64x384xbf16>
    %c0_2 = arith.constant 0 : index
    %c0_3 = arith.constant 0 : index
    %3 = vector.load %arg2[%c0_2, %c0_3] : memref<384x1152xbf16, #tpu.memory_space<vmem>>, vector<384x1152xbf16>
    %cst = arith.constant dense<0.000000e+00> : vector<64x1152xf32>
    %4 = tpu.matmul %2, %3, %cst {dimension_numbers = #tpu.dot_dimension_numbers<[1], [0], [0], [1], [0, 0, 1, 1], [], []>} : vector<64x384xbf16>, vector<384x1152xbf16>, vector<64x1152xf32> -> vector<64x1152xf32>
    %5 = arith.truncf %4 : vector<64x1152xf32> to vector<64x1152xbf16>
    %6 = vector.shape_cast %5 : vector<64x1152xbf16> to vector<2x32x1152xbf16>
    %7 = tpu.iota {dimensions = array<i32: 0>} : vector<32x32xi32>
    %8 = tpu.iota {dimensions = array<i32: 1>} : vector<32x32xi32>
    %9 = arith.cmpi sle, %8, %7 : vector<32x32xi32>
    %10 = vector.shape_cast %9 : vector<32x32xi1> to vector<1x32x32xi1>
    %11 = vector.extract_strided_slice %6 {offsets = [0, 0, 0], sizes = [2, 32, 64], strides = [1, 1, 1]} : vector<2x32x1152xbf16> to vector<2x32x64xbf16>
    %12 = vector.extract_strided_slice %6 {offsets = [0, 0, 384], sizes = [2, 32, 64], strides = [1, 1, 1]} : vector<2x32x1152xbf16> to vector<2x32x64xbf16>
    %13 = vector.extract_strided_slice %6 {offsets = [0, 0, 768], sizes = [2, 32, 64], strides = [1, 1, 1]} : vector<2x32x1152xbf16> to vector<2x32x64xbf16>
    "tpu.trace_start"() <{level = 10 : i32, message = "bqd,bkd->bqk"}> : () -> ()
    %cst_4 = arith.constant dense<0.000000e+00> : vector<2x32x32xf32>
    %14 = tpu.matmul %11, %12, %cst_4 {dimension_numbers = #tpu.dot_dimension_numbers<[2], [2], [1], [1], [0, 0, 0, 1, 1, 1], [0], [0]>} : vector<2x32x64xbf16>, vector<2x32x64xbf16>, vector<2x32x32xf32> -> vector<2x32x32xf32>
    %cst_5 = arith.constant 0xFF800000 : f32
    "tpu.trace_stop"() : () -> ()
    %15 = vector.shape_cast %10 : vector<1x32x32xi1> to vector<1x32x32xi1>
    %16 = vector.broadcast %15 : vector<1x32x32xi1> to vector<2x32x32xi1>
    %17 = vector.broadcast %cst_5 : f32 to vector<2x32x32xf32>
    %18 = arith.select %16, %14, %17 : vector<2x32x32xi1>, vector<2x32x32xf32>
    %cst_6 = arith.constant dense<0xFF800000> : vector<2x32xf32>
    %19 = vector.multi_reduction <maximumf>, %18, %cst_6 [2] : vector<2x32x32xf32> to vector<2x32xf32>
    %20 = vector.shape_cast %19 : vector<2x32xf32> to vector<2x32x1xf32>
    %21 = vector.broadcast %20 : vector<2x32x1xf32> to vector<2x32x32xf32>
    %22 = arith.subf %18, %21 : vector<2x32x32xf32>
    %23 = math.exp %22 : vector<2x32x32xf32>
    %cst_7 = arith.constant dense<0.000000e+00> : vector<2x32xf32>
    %24 = vector.multi_reduction <add>, %23, %cst_7 [2] : vector<2x32x32xf32> to vector<2x32xf32>
    %25 = vector.shape_cast %24 : vector<2x32xf32> to vector<2x32x1xf32>
    %26 = tpu.reciprocal %25 {approx = true} : vector<2x32x1xf32> -> vector<2x32x1xf32>
    %27 = vector.broadcast %26 : vector<2x32x1xf32> to vector<2x32x32xf32>
    %28 = arith.mulf %23, %27 : vector<2x32x32xf32>
    %29 = arith.truncf %28 : vector<2x32x32xf32> to vector<2x32x32xbf16>
    "tpu.trace_start"() <{level = 10 : i32, message = "bqk,bkd->bqd"}> : () -> ()
    %cst_8 = arith.constant dense<0.000000e+00> : vector<2x32x64xf32>
    %30 = tpu.matmul %29, %13, %cst_8 {dimension_numbers = #tpu.dot_dimension_numbers<[2], [1], [1], [2], [0, 0, 0, 1, 1, 2], [0], [0]>} : vector<2x32x32xbf16>, vector<2x32x64xbf16>, vector<2x32x64xf32> -> vector<2x32x64xf32>
    "tpu.trace_stop"() : () -> ()
    %31 = arith.truncf %30 : vector<2x32x64xf32> to vector<2x32x64xbf16>
    %32 = vector.extract_strided_slice %6 {offsets = [0, 0, 64], sizes = [2, 32, 64], strides = [1, 1, 1]} : vector<2x32x1152xbf16> to vector<2x32x64xbf16>
    %33 = vector.extract_strided_slice %6 {offsets = [0, 0, 448], sizes = [2, 32, 64], strides = [1, 1, 1]} : vector<2x32x1152xbf16> to vector<2x32x64xbf16>
    %34 = vector.extract_strided_slice %6 {offsets = [0, 0, 832], sizes = [2, 32, 64], strides = [1, 1, 1]} : vector<2x32x1152xbf16> to vector<2x32x64xbf16>
    "tpu.trace_start"() <{level = 10 : i32, message = "bqd,bkd->bqk"}> : () -> ()
    %cst_9 = arith.constant dense<0.000000e+00> : vector<2x32x32xf32>
    %35 = tpu.matmul %32, %33, %cst_9 {dimension_numbers = #tpu.dot_dimension_numbers<[2], [2], [1], [1], [0, 0, 0, 1, 1, 1], [0], [0]>} : vector<2x32x64xbf16>, vector<2x32x64xbf16>, vector<2x32x32xf32> -> vector<2x32x32xf32>
    %cst_10 = arith.constant 0xFF800000 : f32
    "tpu.trace_stop"() : () -> ()
    %36 = vector.shape_cast %10 : vector<1x32x32xi1> to vector<1x32x32xi1>
    %37 = vector.broadcast %36 : vector<1x32x32xi1> to vector<2x32x32xi1>
    %38 = vector.broadcast %cst_10 : f32 to vector<2x32x32xf32>
    %39 = arith.select %37, %35, %38 : vector<2x32x32xi1>, vector<2x32x32xf32>
    %cst_11 = arith.constant dense<0xFF800000> : vector<2x32xf32>
    %40 = vector.multi_reduction <maximumf>, %39, %cst_11 [2] : vector<2x32x32xf32> to vector<2x32xf32>
    %41 = vector.shape_cast %40 : vector<2x32xf32> to vector<2x32x1xf32>
    %42 = vector.broadcast %41 : vector<2x32x1xf32> to vector<2x32x32xf32>
    %43 = arith.subf %39, %42 : vector<2x32x32xf32>
    %44 = math.exp %43 : vector<2x32x32xf32>
    %cst_12 = arith.constant dense<0.000000e+00> : vector<2x32xf32>
    %45 = vector.multi_reduction <add>, %44, %cst_12 [2] : vector<2x32x32xf32> to vector<2x32xf32>
    %46 = vector.shape_cast %45 : vector<2x32xf32> to vector<2x32x1xf32>
    %47 = tpu.reciprocal %46 {approx = true} : vector<2x32x1xf32> -> vector<2x32x1xf32>
    %48 = vector.broadcast %47 : vector<2x32x1xf32> to vector<2x32x32xf32>
    %49 = arith.mulf %44, %48 : vector<2x32x32xf32>
    %50 = arith.truncf %49 : vector<2x32x32xf32> to vector<2x32x32xbf16>
    "tpu.trace_start"() <{level = 10 : i32, message = "bqk,bkd->bqd"}> : () -> ()
    %cst_13 = arith.constant dense<0.000000e+00> : vector<2x32x64xf32>
    %51 = tpu.matmul %50, %34, %cst_13 {dimension_numbers = #tpu.dot_dimension_numbers<[2], [1], [1], [2], [0, 0, 0, 1, 1, 2], [0], [0]>} : vector<2x32x32xbf16>, vector<2x32x64xbf16>, vector<2x32x64xf32> -> vector<2x32x64xf32>
    "tpu.trace_stop"() : () -> ()
    %52 = arith.truncf %51 : vector<2x32x64xf32> to vector<2x32x64xbf16>
    %53 = vector.extract_strided_slice %6 {offsets = [0, 0, 128], sizes = [2, 32, 64], strides = [1, 1, 1]} : vector<2x32x1152xbf16> to vector<2x32x64xbf16>
    %54 = vector.extract_strided_slice %6 {offsets = [0, 0, 512], sizes = [2, 32, 64], strides = [1, 1, 1]} : vector<2x32x1152xbf16> to vector<2x32x64xbf16>
    %55 = vector.extract_strided_slice %6 {offsets = [0, 0, 896], sizes = [2, 32, 64], strides = [1, 1, 1]} : vector<2x32x1152xbf16> to vector<2x32x64xbf16>
    "tpu.trace_start"() <{level = 10 : i32, message = "bqd,bkd->bqk"}> : () -> ()
    %cst_14 = arith.constant dense<0.000000e+00> : vector<2x32x32xf32>
    %56 = tpu.matmul %53, %54, %cst_14 {dimension_numbers = #tpu.dot_dimension_numbers<[2], [2], [1], [1], [0, 0, 0, 1, 1, 1], [0], [0]>} : vector<2x32x64xbf16>, vector<2x32x64xbf16>, vector<2x32x32xf32> -> vector<2x32x32xf32>
    %cst_15 = arith.constant 0xFF800000 : f32
    "tpu.trace_stop"() : () -> ()
    %57 = vector.shape_cast %10 : vector<1x32x32xi1> to vector<1x32x32xi1>
    %58 = vector.broadcast %57 : vector<1x32x32xi1> to vector<2x32x32xi1>
    %59 = vector.broadcast %cst_15 : f32 to vector<2x32x32xf32>
    %60 = arith.select %58, %56, %59 : vector<2x32x32xi1>, vector<2x32x32xf32>
    %cst_16 = arith.constant dense<0xFF800000> : vector<2x32xf32>
    %61 = vector.multi_reduction <maximumf>, %60, %cst_16 [2] : vector<2x32x32xf32> to vector<2x32xf32>
    %62 = vector.shape_cast %61 : vector<2x32xf32> to vector<2x32x1xf32>
    %63 = vector.broadcast %62 : vector<2x32x1xf32> to vector<2x32x32xf32>
    %64 = arith.subf %60, %63 : vector<2x32x32xf32>
    %65 = math.exp %64 : vector<2x32x32xf32>
    %cst_17 = arith.constant dense<0.000000e+00> : vector<2x32xf32>
    %66 = vector.multi_reduction <add>, %65, %cst_17 [2] : vector<2x32x32xf32> to vector<2x32xf32>
    %67 = vector.shape_cast %66 : vector<2x32xf32> to vector<2x32x1xf32>
    %68 = tpu.reciprocal %67 {approx = true} : vector<2x32x1xf32> -> vector<2x32x1xf32>
    %69 = vector.broadcast %68 : vector<2x32x1xf32> to vector<2x32x32xf32>
    %70 = arith.mulf %65, %69 : vector<2x32x32xf32>
    %71 = arith.truncf %70 : vector<2x32x32xf32> to vector<2x32x32xbf16>
    "tpu.trace_start"() <{level = 10 : i32, message = "bqk,bkd->bqd"}> : () -> ()
    %cst_18 = arith.constant dense<0.000000e+00> : vector<2x32x64xf32>
    %72 = tpu.matmul %71, %55, %cst_18 {dimension_numbers = #tpu.dot_dimension_numbers<[2], [1], [1], [2], [0, 0, 0, 1, 1, 2], [0], [0]>} : vector<2x32x32xbf16>, vector<2x32x64xbf16>, vector<2x32x64xf32> -> vector<2x32x64xf32>
    "tpu.trace_stop"() : () -> ()
    %73 = arith.truncf %72 : vector<2x32x64xf32> to vector<2x32x64xbf16>
    %74 = vector.extract_strided_slice %6 {offsets = [0, 0, 192], sizes = [2, 32, 64], strides = [1, 1, 1]} : vector<2x32x1152xbf16> to vector<2x32x64xbf16>
    %75 = vector.extract_strided_slice %6 {offsets = [0, 0, 576], sizes = [2, 32, 64], strides = [1, 1, 1]} : vector<2x32x1152xbf16> to vector<2x32x64xbf16>
    %76 = vector.extract_strided_slice %6 {offsets = [0, 0, 960], sizes = [2, 32, 64], strides = [1, 1, 1]} : vector<2x32x1152xbf16> to vector<2x32x64xbf16>
    "tpu.trace_start"() <{level = 10 : i32, message = "bqd,bkd->bqk"}> : () -> ()
    %cst_19 = arith.constant dense<0.000000e+00> : vector<2x32x32xf32>
    %77 = tpu.matmul %74, %75, %cst_19 {dimension_numbers = #tpu.dot_dimension_numbers<[2], [2], [1], [1], [0, 0, 0, 1, 1, 1], [0], [0]>} : vector<2x32x64xbf16>, vector<2x32x64xbf16>, vector<2x32x32xf32> -> vector<2x32x32xf32>
    %cst_20 = arith.constant 0xFF800000 : f32
    "tpu.trace_stop"() : () -> ()
    %78 = vector.shape_cast %10 : vector<1x32x32xi1> to vector<1x32x32xi1>
    %79 = vector.broadcast %78 : vector<1x32x32xi1> to vector<2x32x32xi1>
    %80 = vector.broadcast %cst_20 : f32 to vector<2x32x32xf32>
    %81 = arith.select %79, %77, %80 : vector<2x32x32xi1>, vector<2x32x32xf32>
    %cst_21 = arith.constant dense<0xFF800000> : vector<2x32xf32>
    %82 = vector.multi_reduction <maximumf>, %81, %cst_21 [2] : vector<2x32x32xf32> to vector<2x32xf32>
    %83 = vector.shape_cast %82 : vector<2x32xf32> to vector<2x32x1xf32>
    %84 = vector.broadcast %83 : vector<2x32x1xf32> to vector<2x32x32xf32>
    %85 = arith.subf %81, %84 : vector<2x32x32xf32>
    %86 = math.exp %85 : vector<2x32x32xf32>
    %cst_22 = arith.constant dense<0.000000e+00> : vector<2x32xf32>
    %87 = vector.multi_reduction <add>, %86, %cst_22 [2] : vector<2x32x32xf32> to vector<2x32xf32>
    %88 = vector.shape_cast %87 : vector<2x32xf32> to vector<2x32x1xf32>
    %89 = tpu.reciprocal %88 {approx = true} : vector<2x32x1xf32> -> vector<2x32x1xf32>
    %90 = vector.broadcast %89 : vector<2x32x1xf32> to vector<2x32x32xf32>
    %91 = arith.mulf %86, %90 : vector<2x32x32xf32>
    %92 = arith.truncf %91 : vector<2x32x32xf32> to vector<2x32x32xbf16>
    "tpu.trace_start"() <{level = 10 : i32, message = "bqk,bkd->bqd"}> : () -> ()
    %cst_23 = arith.constant dense<0.000000e+00> : vector<2x32x64xf32>
    %93 = tpu.matmul %92, %76, %cst_23 {dimension_numbers = #tpu.dot_dimension_numbers<[2], [1], [1], [2], [0, 0, 0, 1, 1, 2], [0], [0]>} : vector<2x32x32xbf16>, vector<2x32x64xbf16>, vector<2x32x64xf32> -> vector<2x32x64xf32>
    "tpu.trace_stop"() : () -> ()
    %94 = arith.truncf %93 : vector<2x32x64xf32> to vector<2x32x64xbf16>
    %95 = vector.extract_strided_slice %6 {offsets = [0, 0, 256], sizes = [2, 32, 64], strides = [1, 1, 1]} : vector<2x32x1152xbf16> to vector<2x32x64xbf16>
    %96 = vector.extract_strided_slice %6 {offsets = [0, 0, 640], sizes = [2, 32, 64], strides = [1, 1, 1]} : vector<2x32x1152xbf16> to vector<2x32x64xbf16>
    %97 = vector.extract_strided_slice %6 {offsets = [0, 0, 1024], sizes = [2, 32, 64], strides = [1, 1, 1]} : vector<2x32x1152xbf16> to vector<2x32x64xbf16>
    "tpu.trace_start"() <{level = 10 : i32, message = "bqd,bkd->bqk"}> : () -> ()
    %cst_24 = arith.constant dense<0.000000e+00> : vector<2x32x32xf32>
    %98 = tpu.matmul %95, %96, %cst_24 {dimension_numbers = #tpu.dot_dimension_numbers<[2], [2], [1], [1], [0, 0, 0, 1, 1, 1], [0], [0]>} : vector<2x32x64xbf16>, vector<2x32x64xbf16>, vector<2x32x32xf32> -> vector<2x32x32xf32>
    %cst_25 = arith.constant 0xFF800000 : f32
    "tpu.trace_stop"() : () -> ()
    %99 = vector.shape_cast %10 : vector<1x32x32xi1> to vector<1x32x32xi1>
    %100 = vector.broadcast %99 : vector<1x32x32xi1> to vector<2x32x32xi1>
    %101 = vector.broadcast %cst_25 : f32 to vector<2x32x32xf32>
    %102 = arith.select %100, %98, %101 : vector<2x32x32xi1>, vector<2x32x32xf32>
    %cst_26 = arith.constant dense<0xFF800000> : vector<2x32xf32>
    %103 = vector.multi_reduction <maximumf>, %102, %cst_26 [2] : vector<2x32x32xf32> to vector<2x32xf32>
    %104 = vector.shape_cast %103 : vector<2x32xf32> to vector<2x32x1xf32>
    %105 = vector.broadcast %104 : vector<2x32x1xf32> to vector<2x32x32xf32>
    %106 = arith.subf %102, %105 : vector<2x32x32xf32>
    %107 = math.exp %106 : vector<2x32x32xf32>
    %cst_27 = arith.constant dense<0.000000e+00> : vector<2x32xf32>
    %108 = vector.multi_reduction <add>, %107, %cst_27 [2] : vector<2x32x32xf32> to vector<2x32xf32>
    %109 = vector.shape_cast %108 : vector<2x32xf32> to vector<2x32x1xf32>
    %110 = tpu.reciprocal %109 {approx = true} : vector<2x32x1xf32> -> vector<2x32x1xf32>
    %111 = vector.broadcast %110 : vector<2x32x1xf32> to vector<2x32x32xf32>
    %112 = arith.mulf %107, %111 : vector<2x32x32xf32>
    %113 = arith.truncf %112 : vector<2x32x32xf32> to vector<2x32x32xbf16>
    "tpu.trace_start"() <{level = 10 : i32, message = "bqk,bkd->bqd"}> : () -> ()
    %cst_28 = arith.constant dense<0.000000e+00> : vector<2x32x64xf32>
    %114 = tpu.matmul %113, %97, %cst_28 {dimension_numbers = #tpu.dot_dimension_numbers<[2], [1], [1], [2], [0, 0, 0, 1, 1, 2], [0], [0]>} : vector<2x32x32xbf16>, vector<2x32x64xbf16>, vector<2x32x64xf32> -> vector<2x32x64xf32>
    "tpu.trace_stop"() : () -> ()
    %115 = arith.truncf %114 : vector<2x32x64xf32> to vector<2x32x64xbf16>
    %116 = vector.extract_strided_slice %6 {offsets = [0, 0, 320], sizes = [2, 32, 64], strides = [1, 1, 1]} : vector<2x32x1152xbf16> to vector<2x32x64xbf16>
    %117 = vector.extract_strided_slice %6 {offsets = [0, 0, 704], sizes = [2, 32, 64], strides = [1, 1, 1]} : vector<2x32x1152xbf16> to vector<2x32x64xbf16>
    %118 = vector.extract_strided_slice %6 {offsets = [0, 0, 1088], sizes = [2, 32, 64], strides = [1, 1, 1]} : vector<2x32x1152xbf16> to vector<2x32x64xbf16>
    "tpu.trace_start"() <{level = 10 : i32, message = "bqd,bkd->bqk"}> : () -> ()
    %cst_29 = arith.constant dense<0.000000e+00> : vector<2x32x32xf32>
    %119 = tpu.matmul %116, %117, %cst_29 {dimension_numbers = #tpu.dot_dimension_numbers<[2], [2], [1], [1], [0, 0, 0, 1, 1, 1], [0], [0]>} : vector<2x32x64xbf16>, vector<2x32x64xbf16>, vector<2x32x32xf32> -> vector<2x32x32xf32>
    %cst_30 = arith.constant 0xFF800000 : f32
    "tpu.trace_stop"() : () -> ()
    %120 = vector.shape_cast %10 : vector<1x32x32xi1> to vector<1x32x32xi1>
    %121 = vector.broadcast %120 : vector<1x32x32xi1> to vector<2x32x32xi1>
    %122 = vector.broadcast %cst_30 : f32 to vector<2x32x32xf32>
    %123 = arith.select %121, %119, %122 : vector<2x32x32xi1>, vector<2x32x32xf32>
    %cst_31 = arith.constant dense<0xFF800000> : vector<2x32xf32>
    %124 = vector.multi_reduction <maximumf>, %123, %cst_31 [2] : vector<2x32x32xf32> to vector<2x32xf32>
    %125 = vector.shape_cast %124 : vector<2x32xf32> to vector<2x32x1xf32>
    %126 = vector.broadcast %125 : vector<2x32x1xf32> to vector<2x32x32xf32>
    %127 = arith.subf %123, %126 : vector<2x32x32xf32>
    %128 = math.exp %127 : vector<2x32x32xf32>
    %cst_32 = arith.constant dense<0.000000e+00> : vector<2x32xf32>
    %129 = vector.multi_reduction <add>, %128, %cst_32 [2] : vector<2x32x32xf32> to vector<2x32xf32>
    %130 = vector.shape_cast %129 : vector<2x32xf32> to vector<2x32x1xf32>
    %131 = tpu.reciprocal %130 {approx = true} : vector<2x32x1xf32> -> vector<2x32x1xf32>
    %132 = vector.broadcast %131 : vector<2x32x1xf32> to vector<2x32x32xf32>
    %133 = arith.mulf %128, %132 : vector<2x32x32xf32>
    %134 = arith.truncf %133 : vector<2x32x32xf32> to vector<2x32x32xbf16>
    "tpu.trace_start"() <{level = 10 : i32, message = "bqk,bkd->bqd"}> : () -> ()
    %cst_33 = arith.constant dense<0.000000e+00> : vector<2x32x64xf32>
    %135 = tpu.matmul %134, %118, %cst_33 {dimension_numbers = #tpu.dot_dimension_numbers<[2], [1], [1], [2], [0, 0, 0, 1, 1, 2], [0], [0]>} : vector<2x32x32xbf16>, vector<2x32x64xbf16>, vector<2x32x64xf32> -> vector<2x32x64xf32>
    "tpu.trace_stop"() : () -> ()
    %136 = arith.truncf %135 : vector<2x32x64xf32> to vector<2x32x64xbf16>
    %137 = tpu.concatenate %31, %52, %73, %94, %115, %136 in 2 : vector<2x32x64xbf16>, vector<2x32x64xbf16>, vector<2x32x64xbf16>, vector<2x32x64xbf16>, vector<2x32x64xbf16>, vector<2x32x64xbf16> -> vector<2x32x384xbf16>
    %138 = vector.shape_cast %137 : vector<2x32x384xbf16> to vector<64x384xbf16>
    %c0_34 = arith.constant 0 : index
    %c0_35 = arith.constant 0 : index
    %139 = vector.load %arg3[%c0_34, %c0_35] : memref<384x384xbf16, #tpu.memory_space<vmem>>, vector<384x384xbf16>
    %cst_36 = arith.constant dense<0.000000e+00> : vector<64x384xf32>
    %140 = tpu.matmul %138, %139, %cst_36 {dimension_numbers = #tpu.dot_dimension_numbers<[1], [0], [0], [1], [0, 0, 1, 1], [], []>} : vector<64x384xbf16>, vector<384x384xbf16>, vector<64x384xf32> -> vector<64x384xf32>
    %c0_37 = arith.constant 0 : index
    %c0_38 = arith.constant 0 : index
    %141 = vector.load %arg4[%c0_37, %c0_38] : memref<1x384xf32, #tpu.memory_space<vmem>>, vector<1x384xf32>
    %142 = vector.broadcast %141 : vector<1x384xf32> to vector<64x384xf32>
    %143 = arith.addf %140, %142 : vector<64x384xf32>
    %144 = vector.shape_cast %143 : vector<64x384xf32> to vector<2x32x384xf32>
    %c0_39 = arith.constant 0 : index
    %c0_40 = arith.constant 0 : index
    %c0_41 = arith.constant 0 : index
    %145 = vector.load %arg5[%c0_39, %c0_40, %c0_41] : memref<2x32x384xf32, #tpu.memory_space<vmem>>, vector<2x32x384xf32>
    tpu.vector_store %arg5[%c0_39, %c0_40, %c0_41], %144 {strides = array<i32>} : memref<2x32x384xf32, #tpu.memory_space<vmem>>, vector<2x32x384xf32>,
    return
  }
  func.func @transform_0(%arg0: i32) -> (i32, i32, i32) {
    %c0_i32 = arith.constant 0 : i32
    %c0_i32_0 = arith.constant 0 : i32
    %c0_i32_1 = arith.constant 0 : i32
    return %arg0, %c0_i32, %c0_i32_0 : i32, i32, i32
  }
  func.func @transform_1(%arg0: i32) -> (i32, i32) {
    %c0_i32 = arith.constant 0 : i32
    %c0_i32_0 = arith.constant 0 : i32
    %c0_i32_1 = arith.constant 0 : i32
    return %c0_i32, %c0_i32_0 : i32, i32
  }
  func.func @transform_2(%arg0: i32) -> (i32, i32) {
    %c0_i32 = arith.constant 0 : i32
    %c0_i32_0 = arith.constant 0 : i32
    %c0_i32_1 = arith.constant 0 : i32
    return %c0_i32, %c0_i32_0 : i32, i32
  }
  func.func @transform_3(%arg0: i32) -> (i32, i32) {
    %c0_i32 = arith.constant 0 : i32
    %c0_i32_0 = arith.constant 0 : i32
    %c0_i32_1 = arith.constant 0 : i32
    return %c0_i32, %c0_i32_0 : i32, i32
  }
  func.func @transform_4(%arg0: i32) -> (i32, i32, i32) {
    %c0_i32 = arith.constant 0 : i32
    %c0_i32_0 = arith.constant 0 : i32
    %c0_i32_1 = arith.constant 0 : i32
    return %arg0, %c0_i32, %c0_i32_0 : i32, i32, i32
  }
}

</mosaic_0001>

<bundles_post_ra>
// kernel: multi_head_attention.1
= control target key start
LH: loop header
LB: loop body
LE: loop exit
PB: predicated region body
PF: predicated region fallthrough
CT: control target
= control target key end

     0   :  { %9 = vsyncpa [#allocation3], 0  ;;  %s8545_s0 = inlined_call_operand.hbm [shape: f32[4,32,384], index: 0, kind: input, shape index: {}]   ;;  %s8546_s1 = inlined_call_operand.hbm [shape: bf16[384,1152], index: 1, kind: input, shape index: {}]   ;;  %s8547_s2 = inlined_call_operand.hbm [shape: bf16[384,384], index: 2, kind: input, shape index: {}]   ;;  %s8548_s3 = inlined_call_operand.vmem [shape: f32[1,384], index: 3, kind: input, shape index: {}]   ;;  %s8549_s4 = inlined_call_operand.hbm [shape: f32[4,32,384], index: 4, kind: output, shape index: {}]  }
   0x1   :  { %11 = vsyncpa [#allocation3 + $0x1], 0 }
   0x2   :  { %12 = vsyncpa [#allocation6], 0 }
   0x3   :  { %13 = vsyncpa [#allocation4], 0 }
   0x4   :  { %15 = vsyncpa [#allocation4 + $0x1], 0  ;;  %s7314_s15 = smov 0   ;;  %s7316_s16 = smov 0  }
   0x5   :  { %s7318_s17 = smov 0   ;;  %s7320_s18 = smov 0  }
   0x6 LB: > { %s7335_s19 = sadd.s32 4294967295, %s7273_s18   ;;  %s5524_s20 = sadd.s32 4294967294, %s7273_s18   ;;  %s7273_s18 = sphi %s7320_s18, %s8619_s18   ;;  %s7269_s17 = sphi %s7318_s17, %s8618_s17   ;;  %s7265_s16 = sphi %s7316_s16, %s8617_s16   ;;  %s7261_s15 = sphi %s7314_s15, %s8616_s15  }
   0x7   : > { %p41_p0 = scmp.ne.s32.totalorder %s7265_s16, %s7261_s15  ;;  %p8550_p1 = scmp.eq.s32.totalorder %s7335_s19, 0 }
   0x8   : > { %p134_p3 = scmp.eq.s32.totalorder %s5524_s20, 1  ;;  %p5525_p5 = scmp.ge.s32.totalorder %s7273_s18, 1 }
   0x9   : > { %p7344_p4 = por %p8550_p1, %p41_p0  ;;  %p141_p7 = scmp.lt.s32.totalorder %s7273_s18, 3 }
   0xa   : > { %p7349_p6 = por %p134_p3, %p41_p0  ;;  %s7275_s24 = smov [#allocation5]  }
   0xb   : > { %s8563_s21 = scalar_select %p7344_p4, 1, 0 }
   0xc   : > { %s8564_s22 = scalar_select %p7349_p6, 1, 0 }
   0xd   : > { %p7354_p8 = pnand %p5525_p5, %p141_p7  ;;  %s153_s25 = sshll.u32 %s7275_s24, 4  ;;  %s7358_s25 = int_to_ptr.vmem [resolvable:$true] %s153_s25 }
   0xe   : > { %s7276_s27 = smov [#allocation7]   ;;  %s7117_s5 = scalar_lea.hbm %s8546_s1, 27648 }
   0xf   : > { %p6452_p9 = pneg %p7354_p8  ;;  %s166_s28 = sshll.u32 %s7276_s27, 4  ;;  %s7369_s28 = int_to_ptr.vmem [resolvable:$true] %s166_s28 }
  0x10   : > { %p7118_p12 = scmp.ne.s32.totalorder %s8546_s1, %s7117_s5  ;;  %p7124_p5 = scmp.lt.u32.totalorder %s7117_s5, %s8546_s1 }
  0x11   : > { %p7365_p11 = pnand %p6452_p9, %p8550_p1 }
  0x13   : > { %p7119_p13 = pneg %p7365_p11 }
  0x15   : > { %p7120_p0 = pnand %p7119_p13, %p7118_p12 }
  0x17   : > { %p7121_p3 = pneg %p7120_p0 }
  0x19   : > { %p7126_p7 = pnand %p7124_p5, %p7121_p3 }
  0x1b   : > { %7129 = shalt.err (!%p7126_p7)
}
  0x1c   : > { %s7130_s10 = scalar_lea.vmem %s7358_s25, 27648  ;;  %p7138_p2 = scmp.lt.s32.totalorder %s7358_s25, %s7358_s25 }
  0x1d   : > { %p7131_p9 = scmp.ne.s32.totalorder %s7358_s25, %s7130_s10  ;;  %p7139_p12 = scmp.lt.s32.totalorder %s7130_s10, %s7130_s10 }
  0x1f   : > { %p7133_p10 = pnand %p7131_p9, %p7119_p13  ;;  %p7140_p0 = por %p7139_p12, %p7138_p2 }
  0x21   : > { %p7134_p1 = pneg %p7133_p10 }
  0x23   : > { %p7141_p6 = pnand %p7140_p0, %p7134_p1 }
  0x25   : > { %7144 = shalt.err (!%p7141_p6)
}
  0x26   : > { %s7277_s11 = smov 576   ;;  %s7278_s12 = smov 36  }
  0x27   : > { %6455 = dma.hbm_to_vmem [thread:$0]  (!%p7365_p11), %s8546_s1, 27648, %s7358_s25, [#allocation6], %s7277_s11, %s7277_s11, %s7278_s12  }
  0x28   : > { %s7145_s27 = scalar_lea.hbm %s8547_s2, 9216 }
  0x29   : > { %p7146_p2 = scmp.ne.s32.totalorder %s8547_s2, %s7145_s27  ;;  %p7152_p10 = scmp.lt.u32.totalorder %s7145_s27, %s8547_s2 }
  0x2b   : > { %p7148_p1 = pnand %p7146_p2, %p7119_p13 }
  0x2d   : > { %p7149_p6 = pneg %p7148_p1 }
  0x2f   : > { %p7154_p3 = pnand %p7152_p10, %p7149_p6 }
  0x31   : > { %7157 = shalt.err (!%p7154_p3)
}
  0x32   : > { %s7158_s25 = scalar_lea.vmem %s7369_s28, 9216  ;;  %p7166_p12 = scmp.lt.s32.totalorder %s7369_s28, %s7369_s28 }
  0x33   : > { %p7159_p5 = scmp.ne.s32.totalorder %s7369_s28, %s7158_s25  ;;  %p7167_p0 = scmp.lt.s32.totalorder %s7158_s25, %s7158_s25 }
  0x35   : > { %p7161_p7 = pnand %p7159_p5, %p7119_p13  ;;  %p7168_p2 = por %p7167_p0, %p7166_p12 }
  0x37   : > { %p7162_p9 = pneg %p7161_p7 }
  0x39   : > { %p7169_p1 = pnand %p7168_p2, %p7162_p9 }
  0x3b   : > { %7172 = shalt.err (!%p7169_p1)
}
  0x3c   : > { %s7279_s7 = smov 192   ;;  %s7280_s8 = smov 12  }
  0x3d   : > { %6458 = dma.hbm_to_vmem [thread:$0]  (!%p7365_p11), %s8547_s2, 9216, %s7369_s28, [#allocation6], %s7279_s7, %s7279_s7, %s7280_s8  }
  0x3e   : > { %s7424_s11 = sadd.s32 1, %s7273_s18   ;;  %s28_s13 = sadd.s32 1, %s7269_s17 }
  0x3f   : > { %s25_s12 = ssub.s32 %s7273_s18, %s7424_s11  ;;  %p35_p6 = scmp.ne.s32.totalorder %s7269_s17, %s7265_s16 }
  0x40   : > { %p26_p13 = scmp.eq.s32.totalorder %s25_s12, 0  ;;  %p36_p10 = scmp.eq.s32.totalorder %s7273_s18, 0 }
  0x41   : > { %p8567_p5 = scmp.eq.s32.totalorder %s7335_s19, 1  ;;  %p6469_p9 = scmp.lt.s32.totalorder %s7273_s18, 2 }
  0x42   : > { %s7433_s14 = scalar_select %p26_p13, %s7269_s17, %s28_s13  }
  0x43   : > { %p37_p3 = por %p36_p10, %p35_p6  ;;  %p7437_p7 = por %p8567_p5, %p35_p6 }
  0x44   : > { %s183_s26 = sand.u32 1, %s7269_s17   ;;  %s6437_s28 = smul.u32 3072, %s7273_s18 }
  0x45   : > { %s8568_s20 = scalar_select %p7437_p7, 1, 0 }
  0x46   : > { %s6436_s24 = smul.u32 192, %s183_s26  ;;  %p7444_p11 = pnand %p6469_p9, %p37_p3 }
  0x47   : > { %s7451_s5 = scalar_lea.hbm %s8545_s0, %s6437_s28  ;;  %s7455_s7 = scalar_lea.sflag [#allocation3], %s183_s26 }
  0x48   : > { %s187_s6 = scalar_lea.vmem [#allocation2], %s6436_s24  ;;  %s7173_s8 = scalar_lea.hbm %s7451_s5, 3072 }
  0x49   : > { %s195_s25 = sshll.u32 %s187_s6, 4  ;;  %p7174_p12 = scmp.ne.s32.totalorder %s7451_s5, %s7173_s8  ;;  %s7453_s25 = int_to_ptr.vmem [resolvable:$true] %s195_s25 }
  0x4a   : > { %p7175_p0 = pneg %p7444_p11  ;;  %s7178_s12 = scalar_lea.hbm %s8545_s0, 6144 }
  0x4b   : > { %p7179_p13 = scmp.lt.u32.totalorder %s7451_s5, %s8545_s0  ;;  %p7180_p6 = scmp.lt.u32.totalorder %s7178_s12, %s7173_s8 }
  0x4c   : > { %p7176_p2 = pnand %p7175_p0, %p7174_p12  ;;  %p7182_p3 = scmp.lt.u32.totalorder %s7173_s8, %s7451_s5 }
  0x4d   : > { %p7181_p10 = por %p7180_p6, %p7179_p13 }
  0x4e   : > { %p7177_p1 = pneg %p7176_p2 }
  0x4f   : > { %p7183_p5 = por %p7182_p3, %p7181_p10 }
  0x51   : > { %p7184_p9 = pnand %p7183_p5, %p7177_p1 }
  0x53   : > { %7187 = shalt.err (!%p7184_p9)
}
  0x54   : > { %s7188_s26 = scalar_lea.vmem %s7453_s25, 3072  ;;  %s7281_s24 = smov [#allocation2]  }
  0x55   : > { %p7189_p12 = scmp.ne.s32.totalorder %s7453_s25, %s7188_s26  ;;  %s7193_s29 = sshll.u32 %s7281_s24, 4  ;;  %s7194_s29 = int_to_ptr.vmem [resolvable:$false] %s7193_s29 }
  0x56   : > { %s7195_s30 = scalar_lea.vmem %s7194_s29, 6144  ;;  %p7196_p4 = scmp.lt.s32.totalorder %s7453_s25, %s7194_s29 }
  0x57   : > { %p7191_p2 = pnand %p7189_p12, %p7175_p0  ;;  %p7197_p13 = scmp.lt.s32.totalorder %s7195_s30, %s7188_s26 }
  0x59   : > { %p7192_p7 = pneg %p7191_p2  ;;  %p7198_p6 = por %p7197_p13, %p7196_p4 }
  0x5b   : > { %p7199_p10 = pnand %p7198_p6, %p7192_p7 }
  0x5d   : > { %7202 = shalt.err (!%p7199_p10)
}
  0x5e   : > { %s7282_s6 = smov 384   ;;  %s7283_s8 = smov 24  }
  0x5f   : > { %6462 = dma.hbm_to_vmem [thread:$0]  (!%p7444_p11), %s7451_s5, 3072, %s7453_s25, %s7455_s7, %s7282_s6, %s7282_s6, %s7283_s8  }
  0x60   : > { %207 = sbr.rel (%p7354_p8) target bundleno = 4527 (0x11af), region = 36 }
  0x67   : > { %s7486_s9 = sand.u32 1, %s7265_s16   ;;  %p8570_p4 = scmp.ne.s32.totalorder %s8563_s21, 0 }
  0x68   : > { %s6438_s10 = smul.u32 192, %s7486_s9  ;;  %s210_s12 = scalar_lea.sflag [#allocation3], %s7486_s9 }
  0x6a   : > { %s7492_s13 = scalar_lea.vmem [#allocation2], %s6438_s10 }
  0x6b   : > { %7248 = dma.done.wait (%p8570_p4), %s210_s12, 3072  }
  0x6c   : > { %7250 = vsyncadd (%p8570_p4), %s210_s12, 4294964224  ;;  %p8571_p7 = scmp.eq.s32.totalorder %s7335_s19, 0 }
  0x6e   : > { %7252 = dma.done.wait (%p8571_p7), [#allocation6], 36864   ;;  %p8572_p8 = pmov %p8571_p7 }
  0x6f   : > { %v8553_v0 = vmov 0   ;;  %v6517_v1 = vld [vmem:[#allocation5 + $0x4] ss:$36 sps:$4 sm:$0xff]   ;;  %v6523_v5 = vld [vmem:[#allocation5 + $0x4c] ss:$36 sps:$4 sm:$0xff]   ;;  %v260_v58 = vld [vmem:[%s7492_s13 + $0x58] sm:$0xff] }
  0x70   : > { %7254 = vsyncadd (%p8572_p8), [#allocation6], 4294930432  ;;  %1734 = vmatprep.mubr.bf16.mxu1 %v8553_v0  ;;  %v6519_v2 = vld [vmem:[#allocation5 + $0x484] ss:$36 sps:$4 sm:$0xff]   ;;  %1629 = vmatprep.subr.bf16.mxu0 %v6517_v1  ;;  %v6525_v6 = vld [vmem:[#allocation5 + $0x4cc] ss:$36 sps:$4 sm:$0xff]  }
  0x71   : > { %v6521_v3 = vld [vmem:[#allocation5] ss:$36 sps:$4 sm:$0xff]   ;;  %1702 = vmatprep.subr.bf16.mxu1 %v6519_v2  ;;  %v6527_v7 = vld [vmem:[#allocation5 + $0x48] ss:$36 sps:$4 sm:$0xff]   ;;  %v6529_v9 = vld [vmem:[#allocation5 + $0x94] ss:$36 sps:$4 sm:$0xff]  }
  0x72   : > { %v6522_v4 = vld [vmem:[#allocation5 + $0x480] ss:$36 sps:$4 sm:$0xff]   ;;  %1630 = vmatpush1.bf16.msra.mxu0 %v6521_v3  ;;  %v6528_v8 = vld [vmem:[#allocation5 + $0x4c8] ss:$36 sps:$4 sm:$0xff]   ;;  %v6531_v10 = vld [vmem:[#allocation5 + $0x514] ss:$36 sps:$4 sm:$0xff]  }
  0x73   : > { %1703 = vmatpush1.bf16.msra.mxu1 %v6522_v4  ;;  %1631 = vmatprep.subr.bf16.mxu0 %v6523_v5  ;;  %v6533_v11 = vld [vmem:[#allocation5 + $0x90] ss:$36 sps:$4 sm:$0xff]   ;;  %v6535_v13 = vld [vmem:[#allocation5 + $0xdc] ss:$36 sps:$4 sm:$0xff]   ;;  %v6541_v17 = vld [vmem:[#allocation5 + $0x124] ss:$36 sps:$4 sm:$0xff]  }
  0x74   : > { %1704 = vmatprep.subr.bf16.mxu1 %v6525_v6  ;;  %v6534_v12 = vld [vmem:[#allocation5 + $0x510] ss:$36 sps:$4 sm:$0xff]   ;;  %v6537_v14 = vld [vmem:[#allocation5 + $0x55c] ss:$36 sps:$4 sm:$0xff]   ;;  %v6543_v18 = vld [vmem:[#allocation5 + $0x5a4] ss:$36 sps:$4 sm:$0xff]  }
  0x75   : > { %v6539_v15 = vld [vmem:[#allocation5 + $0xd8] ss:$36 sps:$4 sm:$0xff]   ;;  %v6545_v19 = vld [vmem:[#allocation5 + $0x120] ss:$36 sps:$4 sm:$0xff]   ;;  %v6547_v21 = vld [vmem:[#allocation5 + $0x16c] ss:$36 sps:$4 sm:$0xff]  }
  0x76   : > { %1632 = vmatpush1.bf16.msra.mxu0 %v6527_v7  ;;  %v6540_v16 = vld [vmem:[#allocation5 + $0x558] ss:$36 sps:$4 sm:$0xff]   ;;  %v6546_v20 = vld [vmem:[#allocation5 + $0x5a0] ss:$36 sps:$4 sm:$0xff]   ;;  %v6549_v22 = vld [vmem:[#allocation5 + $0x5ec] ss:$36 sps:$4 sm:$0xff]  }
  0x77   : > { %1705 = vmatpush1.bf16.msra.mxu1 %v6528_v8  ;;  %1633 = vmatprep.subr.bf16.mxu0 %v6529_v9  ;;  %v6551_v23 = vld [vmem:[#allocation5 + $0x168] ss:$36 sps:$4 sm:$0xff]   ;;  %v6553_v25 = vld [vmem:[#allocation5 + $0x1b4] ss:$36 sps:$4 sm:$0xff]   ;;  %v6559_v29 = vld [vmem:[#allocation5 + $0x1fc] ss:$36 sps:$4 sm:$0xff]  }
  0x78   : > { %1706 = vmatprep.subr.bf16.mxu1 %v6531_v10  ;;  %v6552_v24 = vld [vmem:[#allocation5 + $0x5e8] ss:$36 sps:$4 sm:$0xff]   ;;  %v6555_v26 = vld [vmem:[#allocation5 + $0x634] ss:$36 sps:$4 sm:$0xff]   ;;  %v6561_v30 = vld [vmem:[#allocation5 + $0x67c] ss:$36 sps:$4 sm:$0xff]  }
  0x79   : > { %v6557_v27 = vld [vmem:[#allocation5 + $0x1b0] ss:$36 sps:$4 sm:$0xff]   ;;  %v6563_v31 = vld [vmem:[#allocation5 + $0x1f8] ss:$36 sps:$4 sm:$0xff]   ;;  %v254_v34 = vld [vmem:[%s7492_s13 + $0x28] sm:$0xff]  ;;  %vm2390_vm0 = vcmask 523264  }
  0x7a   : > { %1634 = vmatpush1.bf16.msra.mxu0 %v6533_v11  ;;  %v6558_v28 = vld [vmem:[#allocation5 + $0x630] ss:$36 sps:$4 sm:$0xff]   ;;  %v6564_v32 = vld [vmem:[#allocation5 + $0x678] ss:$36 sps:$4 sm:$0xff]   ;;  %v6565_v35 = vld [vmem:[#allocation5 + $0x244] ss:$36 sps:$4 sm:$0xff]  }
  0x7b   : > { %1707 = vmatpush1.bf16.msra.mxu1 %v6534_v12  ;;  %1635 = vmatprep.subr.bf16.mxu0 %v6535_v13  ;;  %v251_v33 = vld [vmem:[%s7492_s13 + $0x10] sm:$0xff]  ;;  %v6567_v38 = vld [vmem:[#allocation5 + $0x8] ss:$36 sps:$4 sm:$0xff]   ;;  %v6570_v39 = vld [vmem:[#allocation5 + $0x240] ss:$36 sps:$4 sm:$0xff]   ;;  %vm2529_vm3 = vcmask 261120  }
  0x7c   : > { %1708 = vmatprep.subr.bf16.mxu1 %v6537_v14  ;;  %v6569_v36 = vld [vmem:[#allocation5 + $0xc] ss:$36 sps:$4 sm:$0xff]   ;;  %v7505_v37 = vpack.c.bf16 %v254_v34, %v251_v33  ;;  %v6575_v41 = vld [vmem:[#allocation5 + $0x54] ss:$36 sps:$4 sm:$0xff]   ;;  %v6581_v45 = vld [vmem:[#allocation5 + $0x9c] ss:$36 sps:$4 sm:$0xff]  }
  0x7d   : > { %v6571_v40 = vld [vmem:[#allocation5 + $0x28c] ss:$36 sps:$4 sm:$0xff]   ;;  %v6577_v44 = vld [vmem:[#allocation5 + $0x2d4] ss:$36 sps:$4 sm:$0xff]   ;;  %v6583_v48 = vld [vmem:[#allocation5 + $0x31c] ss:$36 sps:$4 sm:$0xff]  }
  0x7e   : > { %1636 = vmatpush1.bf16.msra.mxu0 %v6539_v15  ;;  %v6573_v42 = vld [vmem:[#allocation5 + $0x50] ss:$36 sps:$4 sm:$0xff]   ;;  %v6576_v43 = vld [vmem:[#allocation5 + $0x288] ss:$36 sps:$4 sm:$0xff]   ;;  %v6579_v46 = vld [vmem:[#allocation5 + $0x98] ss:$36 sps:$4 sm:$0xff]  }
  0x7f   : > { %1709 = vmatpush1.bf16.msra.mxu1 %v6540_v16  ;;  %1637 = vmatprep.subr.bf16.mxu0 %v6541_v17  ;;  %v6582_v47 = vld [vmem:[#allocation5 + $0x2d0] ss:$36 sps:$4 sm:$0xff]   ;;  %v6587_v49 = vld [vmem:[#allocation5 + $0xe4] ss:$36 sps:$4 sm:$0xff]   ;;  %v6588_v53 = vld [vmem:[#allocation5 + $0x318] ss:$36 sps:$4 sm:$0xff]  }
  0x80   : > { %1710 = vmatprep.subr.bf16.mxu1 %v6543_v18  ;;  %v250_v50 = vld [vmem:[%s7492_s13 + $0x8] sm:$0xff]  ;;  %v253_v51 = vld [vmem:[%s7492_s13 + $0x20] sm:$0xff]  ;;  %v6599_v63 = vld [vmem:[#allocation5 + $0x174] ss:$36 sps:$4 sm:$0xff]   ;;  %s7285_s21 = smov 64   ;;  %s8450_s5 = scalar_lea.vmem [#allocation8], %s6438_s10 }
  0x81   : > { %v6585_v52 = vld [vmem:[#allocation5 + $0xe0] ss:$36 sps:$4 sm:$0xff]   ;;  %v7511_v54 = vpack.c.bf16 %v253_v51, %v250_v50  ;;  %v6593_v56 = vld [vmem:[#allocation5 + $0x12c] ss:$36 sps:$4 sm:$0xff]   ;;  %v6601_v5 = vld [vmem:[#allocation5 + $0x3f4] ss:$36 sps:$4 sm:$0xff]  }
  0x82   : > { %1638 = vmatpush1.bf16.msra.mxu0 %v6545_v19  ;;  %v6589_v55 = vld [vmem:[#allocation5 + $0x364] ss:$36 sps:$4 sm:$0xff]   ;;  %v6595_v61 = vld [vmem:[#allocation5 + $0x3ac] ss:$36 sps:$4 sm:$0xff]   ;;  %v6605_v6 = vld [vmem:[#allocation5 + $0x1bc] ss:$36 sps:$4 sm:$0xff]  }
  0x83   : > { %1711 = vmatpush1.bf16.msra.mxu1 %v6546_v20  ;;  %1639 = vmatprep.subr.bf16.mxu0 %v6547_v21  ;;  %v257_v57 = vld [vmem:[%s7492_s13 + $0x40] sm:$0xff]  ;;  %v6591_v59 = vld [vmem:[#allocation5 + $0x128] ss:$36 sps:$4 sm:$0xff]   ;;  %v6597_v1 = vld [vmem:[#allocation5 + $0x170] ss:$36 sps:$4 sm:$0xff]   ;;  %s6439_s25 = smul.u32 3072, %s7335_s19 }
  0x84   : > { %1712 = vmatprep.subr.bf16.mxu1 %v6549_v22  ;;  %1661 = vmatprep.mubr.bf16.mxu0 %v7511_v54  ;;  %v6594_v60 = vld [vmem:[#allocation5 + $0x360] ss:$36 sps:$4 sm:$0xff]   ;;  %v7516_v62 = vpack.c.bf16 %v260_v58, %v257_v57  ;;  %v6600_v2 = vld [vmem:[#allocation5 + $0x3a8] ss:$36 sps:$4 sm:$0xff]   ;;  %v263_v3 = vld [vmem:[%s7492_s13 + $0x70] sm:$0xff]  ;;  %s5432_s7 = sshll.u32 %s8450_s5, 4  ;;  %s8497_s7 = int_to_ptr.vmem [resolvable:$true] %s5432_s7 }
  0x85   : > { %v266_v4 = vld [vmem:[%s7492_s13 + $0x88] sm:$0xff]  ;;  %v6603_v8 = vld [vmem:[#allocation5 + $0x1b8] ss:$36 sps:$4 sm:$0xff]   ;;  %v6606_v9 = vld [vmem:[#allocation5 + $0x3f0] ss:$36 sps:$4 sm:$0xff]   ;;  %s8495_s24 = scalar_lea.hbm %s8549_s4, %s6439_s25  ;;  %s5418_s19 = scalar_lea.sflag [#allocation4], %s7486_s9 }
  0x86   : > { %1640 = vmatpush1.bf16.msra.mxu0 %v6551_v23  ;;  %v7522_v7 = vpack.c.bf16 %v266_v4, %v263_v3  ;;  %v6607_v10 = vld [vmem:[#allocation5 + $0x43c] ss:$36 sps:$4 sm:$0xff]   ;;  %v6611_v11 = vld [vmem:[#allocation5 + $0x204] ss:$36 sps:$4 sm:$0xff]   ;;  %v6615_v16 = vld [vmem:[#allocation5 + $0x24c] ss:$36 sps:$4 sm:$0xff]  }
  0x87   : > { %1713 = vmatpush1.bf16.msra.mxu1 %v6552_v24  ;;  %1641 = vmatprep.subr.bf16.mxu0 %v6553_v25  ;;  %v6609_v12 = vld [vmem:[#allocation5 + $0x200] ss:$36 sps:$4 sm:$0xff]   ;;  %v6612_v13 = vld [vmem:[#allocation5 + $0x438] ss:$36 sps:$4 sm:$0xff]   ;;  %v259_v20 = vld [vmem:[%s7492_s13 + $0x50] sm:$0xff]  ;;  %s7203_s29 = scalar_lea.vmem %s8497_s7, 3072 }
  0x88   : > { %1714 = vmatprep.subr.bf16.mxu1 %v6555_v26  ;;  %v249_v14 = vld [vmem:[%s7492_s13] sm:$0xff]  ;;  %v252_v15 = vld [vmem:[%s7492_s13 + $0x18] sm:$0xff]  ;;  %v6613_v23 = vld [vmem:[#allocation5 + $0x248] ss:$36 sps:$4 sm:$0xff]   ;;  %p7204_p11 = scmp.ne.s32.totalorder %s8497_s7, %s7203_s29  ;;  %p8613_p0 = scmp.ne.s32.totalorder %s8568_s20, 0 }
  0x89   : > { %v269_v17 = vld [vmem:[%s7492_s13 + $0xa0] sm:$0xff]  ;;  %v272_v18 = vld [vmem:[%s7492_s13 + $0xb8] sm:$0xff]  ;;  %v7534_v22 = vpack.c.bf16 %v252_v15, %v249_v14  ;;  %v6616_v26 = vld [vmem:[#allocation5 + $0x290] ss:$36 sps:$4 sm:$0xff]   ;;  %s7286_s30 = smov [#allocation8]  }
  0x8a   : > { %1642 = vmatpush1.bf16.msra.mxu0 %v6557_v27  ;;  %v256_v19 = vld [vmem:[%s7492_s13 + $0x38] sm:$0xff]  ;;  %v7532_v21 = vpack.c.bf16 %v272_v18, %v269_v17  ;;  %v255_v27 = vld [vmem:[%s7492_s13 + $0x30] sm:$0xff]  ;;  %v6624_v34 = vld [vmem:[#allocation5 + $0x324] ss:$36 sps:$4 sm:$0xff]   ;;  %p7205_p1 = pnand %p7204_p11, %p8613_p0  ;;  %s7207_s6 = sshll.u32 %s7286_s30, 4  ;;  %s7208_s6 = int_to_ptr.vmem [resolvable:$false] %s7207_s6 }
  0x8b   : > { %1715 = vmatpush1.bf16.msra.mxu1 %v6558_v28  ;;  %1643 = vmatprep.subr.bf16.mxu0 %v6559_v29  ;;  %v7536_v24 = vpack.c.bf16 %v259_v20, %v256_v19  ;;  %v6618_v25 = vld [vmem:[#allocation5 + $0x294] ss:$36 sps:$4 sm:$0xff]   ;;  %v258_v28 = vld [vmem:[%s7492_s13 + $0x48] sm:$0xff]  ;;  %v6621_v29 = vld [vmem:[#allocation5 + $0x2dc] ss:$36 sps:$4 sm:$0xff]   ;;  %s7209_s8 = scalar_lea.vmem %s7208_s6, 6144  ;;  %p7210_p5 = scmp.lt.s32.totalorder %s8497_s7, %s7208_s6 }
  0x8c   : > { %1716 = vmatprep.subr.bf16.mxu1 %v6561_v30  ;;  %v262_v30 = vld [vmem:[%s7492_s13 + $0x68] sm:$0xff]  ;;  %v6619_v33 = vld [vmem:[#allocation5 + $0x2d8] ss:$36 sps:$4 sm:$0xff]   ;;  %v6634_v4 = vld [vmem:[#allocation5 + $0x440] ss:$36 sps:$4 sm:$0xff]   ;;  %p7206_p3 = pneg %p7205_p1  ;;  %p7211_p9 = scmp.lt.s32.totalorder %s7209_s8, %s7203_s29 }
  0x8d   : > { %v6630_v50 = vld [vmem:[#allocation5 + $0x3b4] ss:$36 sps:$4 sm:$0xff]   ;;  %v270_v57 = vld [vmem:[%s7492_s13 + $0xa8] sm:$0xff]  ;;  %v6633_v58 = vld [vmem:[#allocation5 + $0x3fc] ss:$36 sps:$4 sm:$0xff]  }
  0x8e   : > { %1644 = vmatpush1.bf16.msra.mxu0 %v6563_v31  ;;  %v265_v31 = vld [vmem:[%s7492_s13 + $0x80] sm:$0xff]  ;;  %v6703_v15 = vld [vmem:[#allocation5 + $0x208] ss:$36 sps:$4 sm:$0xff]   ;;  %v6643_v17 = vld [vmem:[#allocation5 + $0x518] ss:$36 sps:$4 sm:$0xff]   ;;  %p7212_p12 = por %p7211_p9, %p7210_p5 }
  0x8f   : > { %1717 = vmatpush1.bf16.msra.mxu1 %v6564_v32  ;;  %1645 = vmatprep.subr.bf16.mxu0 %v6565_v35  ;;  %v7546_v32 = vpack.c.bf16 %v258_v28, %v255_v27  ;;  %v7548_v35 = vpack.c.bf16 %v265_v31, %v262_v30  ;;  %v6693_v3 = vld [vmem:[#allocation5 + $0x17c] ss:$36 sps:$4 sm:$0xff]   ;;  %v6648_v18 = vld [vmem:[#allocation5 + $0x564] ss:$36 sps:$4 sm:$0xff]   ;;  %v6709_v19 = vld [vmem:[#allocation5 + $0x250] ss:$36 sps:$4 sm:$0xff]  }
  0x90   : > { %1775 = vmatprep.subr.bf16.mxu1 %v6569_v36  ;;  %v6661_v36 = vld [vmem:[#allocation5 + $0x10] ss:$36 sps:$4 sm:$0xff]   ;;  %v6645_v14 = vld [vmem:[#allocation5 + $0x51c] ss:$36 sps:$4 sm:$0xff]   ;;  %v6723_v27 = vld [vmem:[#allocation5 + $0x2e4] ss:$36 sps:$4 sm:$0xff]   ;;  %p7213_p2 = pnand %p7212_p12, %p7206_p3 }
  0x91   : > { %v6717_v20 = vld [vmem:[#allocation5 + $0x29c] ss:$36 sps:$4 sm:$0xff]   ;;  %v6649_v28 = vld [vmem:[#allocation5 + $0x5a8] ss:$36 sps:$4 sm:$0xff]  }
  0x92   : > { %1735 = vmatmul.mubr.bf16.vlgmr.msra.gmra.mrb[0].mxu1 %v7505_v37  ;;  %1646 = vmatpush1.bf16.msra.mxu0 %v6570_v39  ;;  %v6622_v39 = vld [vmem:[#allocation5 + $0x320] ss:$36 sps:$4 sm:$0xff]   ;;  %v6729_v31 = vld [vmem:[#allocation5 + $0x32c] ss:$36 sps:$4 sm:$0xff]  }
  0x93   : > { %1776 = vmatpush1.bf16.msra.mxu1 %v6567_v38  ;;  %1647 = vmatprep.subr.bf16.mxu0 %v6571_v40  ;;  %v6663_v38 = vld [vmem:[#allocation5 + $0x14] ss:$36 sps:$4 sm:$0xff]   ;;  %v261_v40 = vld [vmem:[%s7492_s13 + $0x60] sm:$0xff] }
  0x94   : > { %1777 = vmatprep.subr.bf16.mxu1 %v6575_v41  ;;  %1744 = vmatprep.mubr.bf16.mxu1 %v8553_v0  ;;  %v264_v41 = vld [vmem:[%s7492_s13 + $0x78] sm:$0xff]  ;;  %v6721_v30 = vld [vmem:[#allocation5 + $0x2e0] ss:$36 sps:$4 sm:$0xff]  }
  0x96   : > { %1648 = vmatpush1.bf16.msra.mxu0 %v6576_v43  ;;  %v268_v43 = vld [vmem:[%s7492_s13 + $0x98] sm:$0xff] }
  0x97   : > { %1778 = vmatpush1.bf16.msra.mxu1 %v6573_v42  ;;  %1649 = vmatprep.subr.bf16.mxu0 %v6577_v44  ;;  %v6627_v42 = vld [vmem:[#allocation5 + $0x36c] ss:$36 sps:$4 sm:$0xff]   ;;  %v6669_v44 = vld [vmem:[#allocation5 + $0x5c] ss:$36 sps:$4 sm:$0xff]  }
  0x98   : > { %1779 = vmatprep.subr.bf16.mxu1 %v6581_v45  ;;  %v271_v45 = vld [vmem:[%s7492_s13 + $0xb0] sm:$0xff] }
  0x99   : > { %v7558_v51 = vpack.c.bf16 %v271_v45, %v268_v43  ;;  %v6658_v43 = vld [vmem:[#allocation5 + $0x680] ss:$36 sps:$4 sm:$0xff]   ;;  %v6739_v45 = vld [vmem:[#allocation5 + $0x3b8] ss:$36 sps:$4 sm:$0xff]  }
  0x9a   : > { %1650 = vmatpush1.bf16.msra.mxu0 %v6582_v47  ;;  %1745 = vmatmul.mubr.bf16.gmra.mrb[4].mxu1 %v7516_v62  ;;  %v6675_v47 = vld [vmem:[#allocation5 + $0xa4] ss:$36 sps:$4 sm:$0xff]  }
  0x9b   : > { %1780 = vmatpush1.bf16.msra.mxu1 %v6579_v46  ;;  %1651 = vmatprep.subr.bf16.mxu0 %v6583_v48  ;;  %v6667_v46 = vld [vmem:[#allocation5 + $0x58] ss:$36 sps:$4 sm:$0xff]   ;;  %v7556_v48 = vpack.c.bf16 %v264_v41, %v261_v40  ;;  %v6660_v40 = vld [vmem:[#allocation5 + $0x684] ss:$36 sps:$4 sm:$0xff]   ;;  %v6733_v41 = vld [vmem:[#allocation5 + $0x370] ss:$36 sps:$4 sm:$0xff]  }
  0x9c   : > { %1781 = vmatprep.subr.bf16.mxu1 %v6587_v49  ;;  %1754 = vmatprep.mubr.bf16.mxu1 %v8553_v0  ;;  %v6625_v49 = vld [vmem:[#allocation5 + $0x368] ss:$36 sps:$4 sm:$0xff]  }
  0x9e   : > { %1652 = vmatpush1.bf16.msra.mxu0 %v6588_v53  ;;  %v6628_v53 = vld [vmem:[#allocation5 + $0x3b0] ss:$36 sps:$4 sm:$0xff]  }
  0x9f   : > { %1782 = vmatpush1.bf16.msra.mxu1 %v6585_v52  ;;  %1653 = vmatprep.subr.bf16.mxu0 %v6589_v55  ;;  %v6673_v52 = vld [vmem:[#allocation5 + $0xa0] ss:$36 sps:$4 sm:$0xff]   ;;  %v6681_v55 = vld [vmem:[#allocation5 + $0xec] ss:$36 sps:$4 sm:$0xff]  }
  0xa0   : > { %1783 = vmatprep.subr.bf16.mxu1 %v6593_v56  ;;  %v267_v56 = vld [vmem:[%s7492_s13 + $0x90] sm:$0xff] }
  0xa2   : > { %1654 = vmatpush1.bf16.msra.mxu0 %v6594_v60  ;;  %1755 = vmatmul.mubr.bf16.gmra.mrb[8].mxu1 %v7522_v7  ;;  %v6687_v60 = vld [vmem:[#allocation5 + $0x134] ss:$36 sps:$4 sm:$0xff]  }
  0xa3   : > { %1784 = vmatpush1.bf16.msra.mxu1 %v6591_v59  ;;  %1655 = vmatprep.subr.bf16.mxu0 %v6595_v61  ;;  %v6679_v59 = vld [vmem:[#allocation5 + $0xe8] ss:$36 sps:$4 sm:$0xff]   ;;  %v7564_v61 = vpack.c.bf16 %v270_v57, %v267_v56  ;;  %v6759_v57 = vld [vmem:[#allocation5 + $0x494] ss:$36 sps:$4 sm:$0xff]  }
  0xa4   : > { %1785 = vmatprep.subr.bf16.mxu1 %v6599_v63  ;;  %1764 = vmatprep.mubr.bf16.mxu1 %v8553_v0  ;;  %v6631_v63 = vld [vmem:[#allocation5 + $0x3f8] ss:$36 sps:$4 sm:$0xff]   ;;  %v6751_v56 = vld [vmem:[#allocation5 + $0x448] ss:$36 sps:$4 sm:$0xff]  }
  0xa6   : > { %1656 = vmatpush1.bf16.msra.mxu0 %v6600_v2  ;;  %v6685_v2 = vld [vmem:[#allocation5 + $0x130] ss:$36 sps:$4 sm:$0xff]  }
  0xa7   : > { %1786 = vmatpush1.bf16.msra.mxu1 %v6597_v1  ;;  %1657 = vmatprep.subr.bf16.mxu0 %v6601_v5  ;;  %v6636_v1 = vld [vmem:[#allocation5 + $0x444] ss:$36 sps:$4 sm:$0xff]   ;;  %v6639_v5 = vld [vmem:[#allocation5 + $0x48c] ss:$36 sps:$4 sm:$0xff]  }
  0xa8   : > { %1787 = vmatprep.subr.bf16.mxu1 %v6605_v6  ;;  %v6691_v6 = vld [vmem:[#allocation5 + $0x178] ss:$36 sps:$4 sm:$0xff]  }
  0xaa   : > { %1658 = vmatpush1.bf16.msra.mxu0 %v6606_v9  ;;  %1765 = vmatmul.mubr.bf16.gmra.mrb[12].mxu1 %v7532_v21  ;;  %v6637_v9 = vld [vmem:[#allocation5 + $0x488] ss:$36 sps:$4 sm:$0xff]  }
  0xab   : > { %1788 = vmatpush1.bf16.msra.mxu1 %v6603_v8  ;;  %1659 = vmatprep.subr.bf16.mxu0 %v6607_v10  ;;  %v6699_v8 = vld [vmem:[#allocation5 + $0x1c4] ss:$36 sps:$4 sm:$0xff]   ;;  %v6642_v10 = vld [vmem:[#allocation5 + $0x4d4] ss:$36 sps:$4 sm:$0xff]  }
  0xac   : > { %1789 = vmatprep.subr.bf16.mxu1 %v6611_v11  ;;  %1807 = vmatprep.mubr.bf16.mxu1 %v7511_v54  ;;  %v6697_v11 = vld [vmem:[#allocation5 + $0x1c0] ss:$36 sps:$4 sm:$0xff]  }
  0xae   : > { %1660 = vmatpush1.bf16.msra.mxu0 %v6612_v13  ;;  %v6640_v13 = vld [vmem:[#allocation5 + $0x4d0] ss:$36 sps:$4 sm:$0xff]  }
  0xaf   : > { %1790 = vmatpush1.bf16.msra.mxu1 %v6609_v12  ;;  %1921 = vmatprep.subr.bf16.mxu0 %v6663_v38  ;;  %v6705_v12 = vld [vmem:[#allocation5 + $0x20c] ss:$36 sps:$4 sm:$0xff]   ;;  %v6735_v38 = vld [vmem:[#allocation5 + $0x374] ss:$36 sps:$4 sm:$0xff]  }
  0xb0   : > { %1791 = vmatprep.subr.bf16.mxu1 %v6615_v16  ;;  %v6711_v16 = vld [vmem:[#allocation5 + $0x254] ss:$36 sps:$4 sm:$0xff]  }
  0xb1   : > { %1662 = vmatmul.mubr.bf16.vlgmr.msra.gmra.mrb[0].mxu0 %v7534_v22 }
  0xb2   : > { %1671 = vmatprep.mubr.bf16.mxu0 %v7536_v24  ;;  %1922 = vmatpush1.bf16.msra.mxu0 %v6661_v36  ;;  %v6727_v36 = vld [vmem:[#allocation5 + $0x328] ss:$36 sps:$4 sm:$0xff]  }
  0xb3   : > { %1792 = vmatpush1.bf16.msra.mxu1 %v6613_v23  ;;  %1923 = vmatprep.subr.bf16.mxu0 %v6669_v44  ;;  %v6646_v23 = vld [vmem:[#allocation5 + $0x560] ss:$36 sps:$4 sm:$0xff]  }
  0xb4   : > { %1793 = vmatprep.subr.bf16.mxu1 %v6618_v25  ;;  %v6651_v25 = vld [vmem:[#allocation5 + $0x5ac] ss:$36 sps:$4 sm:$0xff]   ;;  %v6666_v44 = vld [vmem:[#allocation5 + $0x1c] ss:$36 sps:$4 sm:$0xff]  }
  0xb6   : > { %1924 = vmatpush1.bf16.msra.mxu0 %v6667_v46  ;;  %v6747_v46 = vld [vmem:[#allocation5 + $0x404] ss:$36 sps:$4 sm:$0xff]  }
  0xb7   : > { %1794 = vmatpush1.bf16.msra.mxu1 %v6616_v26  ;;  %1925 = vmatprep.subr.bf16.mxu0 %v6675_v47  ;;  %v6715_v26 = vld [vmem:[#allocation5 + $0x298] ss:$36 sps:$4 sm:$0xff]  }
  0xb8   : > { %1795 = vmatprep.subr.bf16.mxu1 %v6621_v29  ;;  %v6654_v29 = vld [vmem:[#allocation5 + $0x5f4] ss:$36 sps:$4 sm:$0xff]  }
  0xb9   : > { %1672 = vmatmul.mubr.bf16.gmra.mrb[4].mxu0 %v7546_v32  ;;  %v6664_v47 = vld [vmem:[#allocation5 + $0x18] ss:$36 sps:$4 sm:$0xff]  }
  0xba   : > { %1681 = vmatprep.mubr.bf16.mxu0 %v7548_v35  ;;  %1926 = vmatpush1.bf16.msra.mxu0 %v6673_v52  ;;  %v6753_v52 = vld [vmem:[#allocation5 + $0x44c] ss:$36 sps:$4 sm:$0xff]  }
  0xbb   : > { %1796 = vmatpush1.bf16.msra.mxu1 %v6619_v33  ;;  %1927 = vmatprep.subr.bf16.mxu0 %v6681_v55  ;;  %v6652_v33 = vld [vmem:[#allocation5 + $0x5f0] ss:$36 sps:$4 sm:$0xff]  }
  0xbc   : > { %1797 = vmatprep.subr.bf16.mxu1 %v6624_v34  ;;  %v6657_v34 = vld [vmem:[#allocation5 + $0x63c] ss:$36 sps:$4 sm:$0xff]   ;;  %v6678_v55 = vld [vmem:[#allocation5 + $0xac] ss:$36 sps:$4 sm:$0xff]  }
  0xbe   : > { %1928 = vmatpush1.bf16.msra.mxu0 %v6679_v59  ;;  %v6684_v59 = vld [vmem:[#allocation5 + $0xf4] ss:$36 sps:$4 sm:$0xff]  }
  0xbf   : > { %1798 = vmatpush1.bf16.msra.mxu1 %v6622_v39  ;;  %1929 = vmatprep.subr.bf16.mxu0 %v6687_v60  ;;  %v6655_v39 = vld [vmem:[#allocation5 + $0x638] ss:$36 sps:$4 sm:$0xff]   ;;  %v6757_v60 = vld [vmem:[#allocation5 + $0x490] ss:$36 sps:$4 sm:$0xff]  }
  0xc0   : > { %1799 = vmatprep.subr.bf16.mxu1 %v6627_v42  ;;  %v6741_v42 = vld [vmem:[#allocation5 + $0x3bc] ss:$36 sps:$4 sm:$0xff]  }
  0xc1   : > { %1682 = vmatmul.mubr.bf16.gmra.mrb[8].mxu0 %v7556_v48 }
  0xc2   : > { %1691 = vmatprep.mubr.bf16.mxu0 %v7558_v51  ;;  %1930 = vmatpush1.bf16.msra.mxu0 %v6685_v2  ;;  %v6690_v2 = vld [vmem:[#allocation5 + $0x13c] ss:$36 sps:$4 sm:$0xff]  }
  0xc3   : > { %1800 = vmatpush1.bf16.msra.mxu1 %v6625_v49  ;;  %1931 = vmatprep.subr.bf16.mxu0 %v6693_v3  ;;  %v6672_v49 = vld [vmem:[#allocation5 + $0x64] ss:$36 sps:$4 sm:$0xff]   ;;  %v6763_v3 = vld [vmem:[#allocation5 + $0x4d8] ss:$36 sps:$4 sm:$0xff]  }
  0xc4   : > { %1801 = vmatprep.subr.bf16.mxu1 %v6630_v50  ;;  %v6745_v50 = vld [vmem:[#allocation5 + $0x400] ss:$36 sps:$4 sm:$0xff]  }
  0xc6   : > { %1932 = vmatpush1.bf16.msra.mxu0 %v6691_v6  ;;  %v6696_v6 = vld [vmem:[#allocation5 + $0x184] ss:$36 sps:$4 sm:$0xff]  }
  0xc7   : > { %1802 = vmatpush1.bf16.msra.mxu1 %v6628_v53  ;;  %1933 = vmatprep.subr.bf16.mxu0 %v6699_v8  ;;  %v6670_v53 = vld [vmem:[#allocation5 + $0x60] ss:$36 sps:$4 sm:$0xff]  }
  0xc8   : > { %1803 = vmatprep.subr.bf16.mxu1 %v6633_v58  ;;  %v6676_v58 = vld [vmem:[#allocation5 + $0xa8] ss:$36 sps:$4 sm:$0xff]   ;;  %v6769_v8 = vld [vmem:[#allocation5 + $0x520] ss:$36 sps:$4 sm:$0xff]  }
  0xc9   : > { %1692 = vmatmul.mubr.bf16.gmra.mrb[12].mxu0 %v7564_v61 }
  0xca   : > { %1953 = vmatprep.mubr.bf16.mxu0 %v7511_v54  ;;  %1934 = vmatpush1.bf16.msra.mxu0 %v6697_v11  ;;  %v6702_v11 = vld [vmem:[#allocation5 + $0x1cc] ss:$36 sps:$4 sm:$0xff]  }
  0xcb   : > { %1804 = vmatpush1.bf16.msra.mxu1 %v6631_v63  ;;  %1935 = vmatprep.subr.bf16.mxu0 %v6705_v12  ;;  %v6765_v63 = vld [vmem:[#allocation5 + $0x4dc] ss:$36 sps:$4 sm:$0xff]   ;;  %v6775_v12 = vld [vmem:[#allocation5 + $0x568] ss:$36 sps:$4 sm:$0xff]  }
  0xcc   : > { %1805 = vmatprep.subr.bf16.mxu1 %v6636_v1  ;;  %v6682_v1 = vld [vmem:[#allocation5 + $0xf0] ss:$36 sps:$4 sm:$0xff]  }
  0xce   : > { %1936 = vmatpush1.bf16.msra.mxu0 %v6703_v15  ;;  %v6708_v15 = vld [vmem:[#allocation5 + $0x214] ss:$36 sps:$4 sm:$0xff]  }
  0xcf   : > { %1806 = vmatpush1.bf16.msra.mxu1 %v6634_v4  ;;  %1937 = vmatprep.subr.bf16.mxu0 %v6711_v16  ;;  %v6771_v4 = vld [vmem:[#allocation5 + $0x524] ss:$36 sps:$4 sm:$0xff]   ;;  %v6781_v16 = vld [vmem:[#allocation5 + $0x5b0] ss:$36 sps:$4 sm:$0xff]  }
  0xd0   : > { %1848 = vmatprep.subr.bf16.mxu1 %v6639_v5  ;;  %v6688_v5 = vld [vmem:[#allocation5 + $0x138] ss:$36 sps:$4 sm:$0xff]  }
  0xd2   : > { %1808 = vmatmul.mubr.bf16.vlgmr.msra.gmra.mrb[16].mxu1 %v7534_v22  ;;  %1938 = vmatpush1.bf16.msra.mxu0 %v6709_v19  ;;  %v6714_v19 = vld [vmem:[#allocation5 + $0x25c] ss:$36 sps:$4 sm:$0xff]  }
  0xd3   : > { %1849 = vmatpush1.bf16.msra.mxu1 %v6637_v9  ;;  %1817 = vmatprep.mubr.bf16.mxu1 %v7536_v24  ;;  %v6777_v9 = vld [vmem:[#allocation5 + $0x56c] ss:$36 sps:$4 sm:$0xff]  }
  0xd4   : > { %1850 = vmatprep.subr.bf16.mxu1 %v6642_v10  ;;  %1939 = vmatprep.subr.bf16.mxu0 %v6717_v20  ;;  %v6694_v10 = vld [vmem:[#allocation5 + $0x180] ss:$36 sps:$4 sm:$0xff]   ;;  %v6712_v20 = vld [vmem:[#allocation5 + $0x258] ss:$36 sps:$4 sm:$0xff]  }
  0xd6   : > { %1940 = vmatpush1.bf16.msra.mxu0 %v6715_v26  ;;  %v6795_v26 = vld [vmem:[#allocation5 + $0x644] ss:$36 sps:$4 sm:$0xff]  }
  0xd7   : > { %1851 = vmatpush1.bf16.msra.mxu1 %v6640_v13  ;;  %1941 = vmatprep.subr.bf16.mxu0 %v6723_v27  ;;  %v6783_v13 = vld [vmem:[#allocation5 + $0x5b4] ss:$36 sps:$4 sm:$0xff]   ;;  %v6793_v27 = vld [vmem:[#allocation5 + $0x640] ss:$36 sps:$4 sm:$0xff]  }
  0xd8   : > { %1852 = vmatprep.subr.bf16.mxu1 %v6645_v14  ;;  %v6700_v14 = vld [vmem:[#allocation5 + $0x1c8] ss:$36 sps:$4 sm:$0xff]  }
  0xda   : > { %1818 = vmatmul.mubr.bf16.gmra.mrb[20].mxu1 %v7546_v32  ;;  %1942 = vmatpush1.bf16.msra.mxu0 %v6721_v30  ;;  %v6726_v30 = vld [vmem:[#allocation5 + $0x2ec] ss:$36 sps:$4 sm:$0xff]  }
  0xdb   : > { %1853 = vmatpush1.bf16.msra.mxu1 %v6643_v17  ;;  %1827 = vmatprep.mubr.bf16.mxu1 %v7548_v35  ;;  %v6789_v17 = vld [vmem:[#allocation5 + $0x5fc] ss:$36 sps:$4 sm:$0xff]  }
  0xdc   : > { %1854 = vmatprep.subr.bf16.mxu1 %v6648_v18  ;;  %1943 = vmatprep.subr.bf16.mxu0 %v6729_v31  ;;  %v6706_v18 = vld [vmem:[#allocation5 + $0x210] ss:$36 sps:$4 sm:$0xff]   ;;  %v6799_v31 = vld [vmem:[#allocation5 + $0x688] ss:$36 sps:$4 sm:$0xff]  }
  0xde   : > { %1944 = vmatpush1.bf16.msra.mxu0 %v6727_v36  ;;  %v6732_v36 = vld [vmem:[#allocation5 + $0x334] ss:$36 sps:$4 sm:$0xff]  }
  0xdf   : > { %1855 = vmatpush1.bf16.msra.mxu1 %v6646_v23  ;;  %1945 = vmatprep.subr.bf16.mxu0 %v6735_v38  ;;  %v6787_v23 = vld [vmem:[#allocation5 + $0x5f8] ss:$36 sps:$4 sm:$0xff]   ;;  %v6807_v38 = vld [vmem:[#allocation5 + $0x20] ss:$36 sps:$4 sm:$0xff]  }
  0xe0   : > { %1856 = vmatprep.subr.bf16.mxu1 %v6651_v25  ;;  %v6720_v25 = vld [vmem:[#allocation5 + $0x2a4] ss:$36 sps:$4 sm:$0xff]  }
  0xe2   : > { %1828 = vmatmul.mubr.bf16.gmra.mrb[24].mxu1 %v7556_v48  ;;  %1946 = vmatpush1.bf16.msra.mxu0 %v6733_v41  ;;  %v6738_v41 = vld [vmem:[#allocation5 + $0x37c] ss:$36 sps:$4 sm:$0xff]  }
  0xe3   : > { %1857 = vmatpush1.bf16.msra.mxu1 %v6649_v28  ;;  %1837 = vmatprep.mubr.bf16.mxu1 %v7558_v51  ;;  %v6801_v28 = vld [vmem:[#allocation5 + $0x68c] ss:$36 sps:$4 sm:$0xff]  }
  0xe4   : > { %1858 = vmatprep.subr.bf16.mxu1 %v6654_v29  ;;  %1947 = vmatprep.subr.bf16.mxu0 %v6741_v42  ;;  %v6718_v29 = vld [vmem:[#allocation5 + $0x2a0] ss:$36 sps:$4 sm:$0xff]   ;;  %v6810_v42 = vld [vmem:[#allocation5 + $0x68] ss:$36 sps:$4 sm:$0xff]  }
  0xe6   : > { %1948 = vmatpush1.bf16.msra.mxu0 %v6739_v45  ;;  %v6744_v45 = vld [vmem:[#allocation5 + $0x3c4] ss:$36 sps:$4 sm:$0xff]  }
  0xe7   : > { %1859 = vmatpush1.bf16.msra.mxu1 %v6652_v33  ;;  %1949 = vmatprep.subr.bf16.mxu0 %v6747_v46  ;;  %v6805_v33 = vld [vmem:[#allocation5 + $0x260] ss:$36 sps:$4 sm:$0xff]   ;;  %v6813_v46 = vld [vmem:[#allocation5 + $0xb0] ss:$36 sps:$4 sm:$0xff]  }
  0xe8   : > { %1860 = vmatprep.subr.bf16.mxu1 %v6657_v34  ;;  %v6724_v34 = vld [vmem:[#allocation5 + $0x2e8] ss:$36 sps:$4 sm:$0xff]  }
  0xea   : > { %1838 = vmatmul.mubr.bf16.gmra.mrb[28].mxu1 %v7564_v61  ;;  %1950 = vmatpush1.bf16.msra.mxu0 %v6745_v50  ;;  %v6750_v50 = vld [vmem:[#allocation5 + $0x40c] ss:$36 sps:$4 sm:$0xff]  }
  0xeb   : > { %1861 = vmatpush1.bf16.msra.mxu1 %v6655_v39  ;;  %1880 = vmatprep.mubr.bf16.mxu1 %v8553_v0  ;;  %v6808_v39 = vld [vmem:[#allocation5 + $0x2a8] ss:$36 sps:$4 sm:$0xff]  }
  0xec   : > { %1862 = vmatprep.subr.bf16.mxu1 %v6660_v40  ;;  %1951 = vmatprep.subr.bf16.mxu0 %v6753_v52  ;;  %v6730_v40 = vld [vmem:[#allocation5 + $0x330] ss:$36 sps:$4 sm:$0xff]   ;;  %v6816_v52 = vld [vmem:[#allocation5 + $0xf8] ss:$36 sps:$4 sm:$0xff]  }
  0xee   : > { %1952 = vmatpush1.bf16.msra.mxu0 %v6751_v56  ;;  %v6756_v56 = vld [vmem:[#allocation5 + $0x454] ss:$36 sps:$4 sm:$0xff]  }
  0xef   : > { %1863 = vmatpush1.bf16.msra.mxu1 %v6658_v43  ;;  %1994 = vmatprep.subr.bf16.mxu0 %v6759_v57  ;;  %v6811_v43 = vld [vmem:[#allocation5 + $0x2f0] ss:$36 sps:$4 sm:$0xff]   ;;  %v6819_v57 = vld [vmem:[#allocation5 + $0x140] ss:$36 sps:$4 sm:$0xff]  }
  0xf0   : > { %2067 = vmatprep.subr.bf16.mxu1 %v6666_v44  ;;  %v6736_v44 = vld [vmem:[#allocation5 + $0x378] ss:$36 sps:$4 sm:$0xff]  }
  0xf1   : > { %1954 = vmatmul.mubr.bf16.vlgmr.msra.gmra.mrb[16].mxu0 %v7534_v22 }
  0xf2   : > { %1881 = vmatmul.mubr.bf16.vlgmr.msra.gmra.mrb[16].mxu1 %v7505_v37  ;;  %1995 = vmatpush1.bf16.msra.mxu0 %v6757_v60  ;;  %v6762_v60 = vld [vmem:[#allocation5 + $0x49c] ss:$36 sps:$4 sm:$0xff]  }
  0xf3   : > { %1890 = vmatprep.mubr.bf16.mxu1 %v8553_v0  ;;  %2068 = vmatpush1.bf16.msra.mxu1 %v6664_v47  ;;  %v6814_v47 = vld [vmem:[#allocation5 + $0x338] ss:$36 sps:$4 sm:$0xff]  }
  0xf4   : > { %2069 = vmatprep.subr.bf16.mxu1 %v6672_v49  ;;  %1963 = vmatprep.mubr.bf16.mxu0 %v7536_v24  ;;  %v6742_v49 = vld [vmem:[#allocation5 + $0x3c0] ss:$36 sps:$4 sm:$0xff]  }
  0xf5   : > { %1996 = vmatprep.subr.bf16.mxu0 %v6765_v63  ;;  %v6822_v63 = vld [vmem:[#allocation5 + $0x188] ss:$36 sps:$4 sm:$0xff]  }
  0xf6   : > { %1997 = vmatpush1.bf16.msra.mxu0 %v6763_v3  ;;  %v6768_v3 = vld [vmem:[#allocation5 + $0x4e4] ss:$36 sps:$4 sm:$0xff]  }
  0xf7   : > { %2070 = vmatpush1.bf16.msra.mxu1 %v6670_v53  ;;  %1998 = vmatprep.subr.bf16.mxu0 %v6771_v4  ;;  %v6817_v53 = vld [vmem:[#allocation5 + $0x380] ss:$36 sps:$4 sm:$0xff]   ;;  %v6825_v4 = vld [vmem:[#allocation5 + $0x1d0] ss:$36 sps:$4 sm:$0xff]  }
  0xf8   : > { %2071 = vmatprep.subr.bf16.mxu1 %v6678_v55  ;;  %v6748_v55 = vld [vmem:[#allocation5 + $0x408] ss:$36 sps:$4 sm:$0xff]  }
  0xf9   : > { %1964 = vmatmul.mubr.bf16.gmra.mrb[20].mxu0 %v7546_v32 }
  0xfa   : > { %1891 = vmatmul.mubr.bf16.gmra.mrb[20].mxu1 %v7516_v62  ;;  %1999 = vmatpush1.bf16.msra.mxu0 %v6769_v8  ;;  %v6774_v8 = vld [vmem:[#allocation5 + $0x52c] ss:$36 sps:$4 sm:$0xff]  }
  0xfb   : > { %1900 = vmatprep.mubr.bf16.mxu1 %v8553_v0  ;;  %2072 = vmatpush1.bf16.msra.mxu1 %v6676_v58  ;;  %v6820_v58 = vld [vmem:[#allocation5 + $0x3c8] ss:$36 sps:$4 sm:$0xff]  }
  0xfc   : > { %2073 = vmatprep.subr.bf16.mxu1 %v6684_v59  ;;  %1973 = vmatprep.mubr.bf16.mxu0 %v7548_v35  ;;  %v6754_v59 = vld [vmem:[#allocation5 + $0x450] ss:$36 sps:$4 sm:$0xff]  }
  0xfd   : > { %2000 = vmatprep.subr.bf16.mxu0 %v6777_v9  ;;  %v6828_v9 = vld [vmem:[#allocation5 + $0x218] ss:$36 sps:$4 sm:$0xff]  }
  0xfe   : > { %2001 = vmatpush1.bf16.msra.mxu0 %v6775_v12  ;;  %v6778_v12 = vld [vmem:[#allocation5 + $0x570] ss:$36 sps:$4 sm:$0xff]  }
  0xff   : > { %2074 = vmatpush1.bf16.msra.mxu1 %v6682_v1  ;;  %2002 = vmatprep.subr.bf16.mxu0 %v6783_v13  ;;  %v6823_v1 = vld [vmem:[#allocation5 + $0x410] ss:$36 sps:$4 sm:$0xff]   ;;  %v6786_v13 = vld [vmem:[#allocation5 + $0x5bc] ss:$36 sps:$4 sm:$0xff]  }
 0x100   : > { %2075 = vmatprep.subr.bf16.mxu1 %v6690_v2  ;;  %v6760_v2 = vld [vmem:[#allocation5 + $0x498] ss:$36 sps:$4 sm:$0xff]  }
 0x101   : > { %1974 = vmatmul.mubr.bf16.gmra.mrb[24].mxu0 %v7556_v48 }
 0x102   : > { %1901 = vmatmul.mubr.bf16.gmra.mrb[24].mxu1 %v7522_v7  ;;  %2003 = vmatpush1.bf16.msra.mxu0 %v6781_v16  ;;  %v6798_v16 = vld [vmem:[#allocation5 + $0x64c] ss:$36 sps:$4 sm:$0xff]  }
 0x103   : > { %1910 = vmatprep.mubr.bf16.mxu1 %v8553_v0  ;;  %2076 = vmatpush1.bf16.msra.mxu1 %v6688_v5  ;;  %v6826_v5 = vld [vmem:[#allocation5 + $0x458] ss:$36 sps:$4 sm:$0xff]  }
 0x104   : > { %2077 = vmatprep.subr.bf16.mxu1 %v6696_v6  ;;  %1983 = vmatprep.mubr.bf16.mxu0 %v7558_v51  ;;  %v6766_v6 = vld [vmem:[#allocation5 + $0x4e0] ss:$36 sps:$4 sm:$0xff]  }
 0x105   : > { %2004 = vmatprep.subr.bf16.mxu0 %v6789_v17  ;;  %v6802_v17 = vld [vmem:[#allocation5 + $0x690] ss:$36 sps:$4 sm:$0xff]  }
 0x106   : > { %2005 = vmatpush1.bf16.msra.mxu0 %v6787_v23 }
 0x107   : > { %2078 = vmatpush1.bf16.msra.mxu1 %v6694_v10  ;;  %2006 = vmatprep.subr.bf16.mxu0 %v6795_v26  ;;  %v6772_v10 = vld [vmem:[#allocation5 + $0x528] ss:$36 sps:$4 sm:$0xff]  }
 0x108   : > { %2079 = vmatprep.subr.bf16.mxu1 %v6702_v11  ;;  %v6780_v11 = vld [vmem:[#allocation5 + $0x574] ss:$36 sps:$4 sm:$0xff]  }
 0x109   : > { %1984 = vmatmul.mubr.bf16.gmra.mrb[28].mxu0 %v7564_v61 }
 0x10a   : > { %1911 = vmatmul.mubr.bf16.gmra.mrb[28].mxu1 %v7532_v21  ;;  %2007 = vmatpush1.bf16.msra.mxu0 %v6793_v27  ;;  %v6827_v27 = vld [vmem:[#allocation5 + $0x698] ss:$36 sps:$4 sm:$0xff]  }
 0x10b   : > { %2080 = vmatpush1.bf16.msra.mxu1 %v6700_v14  ;;  %2099 = vmatprep.mubr.bf16.mxu1 %v7511_v54  ;;  %v6792_v14 = vld [vmem:[#allocation5 + $0x604] ss:$36 sps:$4 sm:$0xff]  }
 0x10c   : > { %2081 = vmatprep.subr.bf16.mxu1 %v6708_v15  ;;  %2026 = vmatprep.mubr.bf16.mxu0 %v8553_v0  ;;  %v6790_v15 = vld [vmem:[#allocation5 + $0x600] ss:$36 sps:$4 sm:$0xff]  }
 0x10d   : > { %2008 = vmatprep.subr.bf16.mxu0 %v6801_v28 }
 0x10e   : > { %2009 = vmatpush1.bf16.msra.mxu0 %v6799_v31 }
 0x10f   : > { %2082 = vmatpush1.bf16.msra.mxu1 %v6706_v18  ;;  %5876 = vmatprep.subr.bf16.mxu0 %v6805_v33  ;;  %v6806_v18 = vld [vmem:[#allocation5 + $0x4a0] ss:$36 sps:$4 sm:$0xff]  }
 0x110   : > { %2083 = vmatprep.subr.bf16.mxu1 %v6714_v19  ;;  %v6815_v19 = vld [vmem:[#allocation5 + $0x578] ss:$36 sps:$4 sm:$0xff]  }
 0x111   : > { %2027 = vmatmul.mubr.bf16.vlgmr.msra.gmra.mrb[16].mxu0 %v7505_v37 }
 0x112   : > { %5877 = vmatpush3.bf16.msra.mxu0 %v6807_v38  ;;  %2036 = vmatprep.mubr.bf16.mxu0 %v8553_v0 }
 0x113   : > { %2084 = vmatpush1.bf16.msra.mxu1 %v6712_v20  ;;  %5878 = vmatprep.subr.bf16.mxu0 %v6808_v39 }
 0x114   : > { %2085 = vmatprep.subr.bf16.mxu1 %v6720_v25 }
 0x116   : > { %5879 = vmatpush3.bf16.msra.mxu0 %v6810_v42 }
 0x117   : > { %2086 = vmatpush1.bf16.msra.mxu1 %v6718_v29  ;;  %5880 = vmatprep.subr.bf16.mxu0 %v6811_v43 }
 0x118   : > { %2087 = vmatprep.subr.bf16.mxu1 %v6726_v30 }
 0x119   : > { %2037 = vmatmul.mubr.bf16.gmra.mrb[20].mxu0 %v7516_v62 }
 0x11a   : > { %5881 = vmatpush3.bf16.msra.mxu0 %v6813_v46  ;;  %2046 = vmatprep.mubr.bf16.mxu0 %v8553_v0 }
 0x11b   : > { %2088 = vmatpush1.bf16.msra.mxu1 %v6724_v34  ;;  %5882 = vmatprep.subr.bf16.mxu0 %v6814_v47 }
 0x11c   : > { %2089 = vmatprep.subr.bf16.mxu1 %v6732_v36 }
 0x11e   : > { %5883 = vmatpush3.bf16.msra.mxu0 %v6816_v52 }
 0x11f   : > { %2090 = vmatpush1.bf16.msra.mxu1 %v6730_v40  ;;  %5884 = vmatprep.subr.bf16.mxu0 %v6817_v53 }
 0x120   : > { %2091 = vmatprep.subr.bf16.mxu1 %v6738_v41 }
 0x121   : > { %2047 = vmatmul.mubr.bf16.gmra.mrb[24].mxu0 %v7522_v7 }
 0x122   : > { %5885 = vmatpush3.bf16.msra.mxu0 %v6819_v57  ;;  %2056 = vmatprep.mubr.bf16.mxu0 %v8553_v0 }
 0x123   : > { %2092 = vmatpush1.bf16.msra.mxu1 %v6736_v44  ;;  %5886 = vmatprep.subr.bf16.mxu0 %v6820_v58 }
 0x124   : > { %2093 = vmatprep.subr.bf16.mxu1 %v6744_v45 }
 0x126   : > { %5887 = vmatpush3.bf16.msra.mxu0 %v6822_v63 }
 0x127   : > { %2094 = vmatpush1.bf16.msra.mxu1 %v6742_v49  ;;  %5888 = vmatprep.subr.bf16.mxu0 %v6823_v1 }
 0x128   : > { %2095 = vmatprep.subr.bf16.mxu1 %v6750_v50 }
 0x129   : > { %2057 = vmatmul.mubr.bf16.gmra.mrb[28].mxu0 %v7532_v21 }
 0x12a   : > { %5889 = vmatpush3.bf16.msra.mxu0 %v6825_v4  ;;  %2245 = vmatprep.mubr.bf16.mxu0 %v7511_v54  ;;  %v6784_v54 = vld [vmem:[#allocation5 + $0x5b8] ss:$36 sps:$4 sm:$0xff]  }
 0x12b   : > { %2096 = vmatpush1.bf16.msra.mxu1 %v6748_v55  ;;  %5890 = vmatprep.subr.bf16.mxu0 %v6826_v5 }
 0x12c   : > { %2097 = vmatprep.subr.bf16.mxu1 %v6756_v56 }
 0x12e   : > { %5891 = vmatpush3.bf16.msra.mxu0 %v6828_v9 }
 0x12f   : > { %2098 = vmatpush1.bf16.msra.mxu1 %v6754_v59 }
 0x130   : > { %2140 = vmatprep.subr.bf16.mxu1 %v6762_v60 }
 0x131   : > { %2246 = vmatmul.mubr.bf16.vlgmr.msra.gmra.mrb[32].mxu0 %v7534_v22 }
 0x132   : > { %2100 = vmatmul.mubr.bf16.vlgmr.msra.gmra.mrb[32].mxu1 %v7534_v22  ;;  %2253 = vmatprep.mubr.bf16.mxu0 %v7536_v24  ;;  %v6796_v22 = vld [vmem:[#allocation5 + $0x648] ss:$36 sps:$4 sm:$0xff]  }
 0x133   : > { %2141 = vmatpush1.bf16.msra.mxu1 %v6760_v2  ;;  %2109 = vmatprep.mubr.bf16.mxu1 %v7536_v24  ;;  %v6804_v24 = vld [vmem:[#allocation5 + $0x694] ss:$36 sps:$4 sm:$0xff]  }
 0x134   : > { %2142 = vmatprep.subr.bf16.mxu1 %v6768_v3 }
 0x137   : > { %2143 = vmatpush1.bf16.msra.mxu1 %v6766_v6 }
 0x138   : > { %2144 = vmatprep.subr.bf16.mxu1 %v6774_v8 }
 0x139   : > { %2254 = vmatmul.mubr.bf16.gmra.mrb[36].mxu0 %v7546_v32 }
 0x13a   : > { %2110 = vmatmul.mubr.bf16.gmra.mrb[36].mxu1 %v7546_v32  ;;  %2261 = vmatprep.mubr.bf16.mxu0 %v7548_v35  ;;  %v6809_v32 = vld [vmem:[#allocation5 + $0x4e8] ss:$36 sps:$4 sm:$0xff]  }
 0x13b   : > { %2145 = vmatpush1.bf16.msra.mxu1 %v6772_v10  ;;  %2119 = vmatprep.mubr.bf16.mxu1 %v7548_v35  ;;  %v6812_v35 = vld [vmem:[#allocation5 + $0x530] ss:$36 sps:$4 sm:$0xff]  }
 0x13c   : > { %2146 = vmatprep.subr.bf16.mxu1 %v6780_v11 }
 0x13f   : > { %2147 = vmatpush1.bf16.msra.mxu1 %v6778_v12 }
 0x140   : > { %2148 = vmatprep.subr.bf16.mxu1 %v6786_v13 }
 0x141   : > { %2262 = vmatmul.mubr.bf16.gmra.mrb[40].mxu0 %v7556_v48 }
 0x142   : > { %2120 = vmatmul.mubr.bf16.gmra.mrb[40].mxu1 %v7556_v48  ;;  %2269 = vmatprep.mubr.bf16.mxu0 %v7558_v51  ;;  %v6818_v48 = vld [vmem:[#allocation5 + $0x5c0] ss:$36 sps:$4 sm:$0xff]  }
 0x143   : > { %2149 = vmatpush1.bf16.msra.mxu1 %v6784_v54  ;;  %2129 = vmatprep.mubr.bf16.mxu1 %v7558_v51  ;;  %v6821_v51 = vld [vmem:[#allocation5 + $0x608] ss:$36 sps:$4 sm:$0xff]  }
 0x144   : > { %2150 = vmatprep.subr.bf16.mxu1 %v6792_v14 }
 0x147   : > { %2151 = vmatpush1.bf16.msra.mxu1 %v6790_v15 }
 0x148   : > { %2152 = vmatprep.subr.bf16.mxu1 %v6798_v16 }
 0x149   : > { %2270 = vmatmul.mubr.bf16.gmra.mrb[44].mxu0 %v7564_v61 }
 0x14a   : > { %2130 = vmatmul.mubr.bf16.gmra.mrb[44].mxu1 %v7564_v61  ;;  %v6824_v61 = vld [vmem:[#allocation5 + $0x650] ss:$36 sps:$4 sm:$0xff]  }
 0x14b   : > { %2153 = vmatpush1.bf16.msra.mxu1 %v6796_v22  ;;  %2172 = vmatprep.mubr.bf16.mxu1 %v8553_v0 }
 0x14c   : > { %2154 = vmatprep.subr.bf16.mxu1 %v6804_v24 }
 0x14f   : > { %2155 = vmatpush1.bf16.msra.mxu1 %v6802_v17 }
 0x150   : > { %6076 = vmatprep.subr.bf16.mxu1 %v6806_v18 }
 0x152   : > { %2173 = vmatmul.mubr.bf16.vlgmr.msra.gmra.mrb[32].mxu1 %v7505_v37 }
 0x153   : > { %6077 = vmatpush3.bf16.msra.mxu1 %v6806_v18  ;;  %2182 = vmatprep.mubr.bf16.mxu1 %v8553_v0 }
 0x154   : > { %6078 = vmatprep.subr.bf16.mxu1 %v6809_v32 }
 0x157   : > { %6079 = vmatpush3.bf16.msra.mxu1 %v6809_v32 }
 0x158   : > { %6080 = vmatprep.subr.bf16.mxu1 %v6812_v35 }
 0x15a   : > { %2183 = vmatmul.mubr.bf16.gmra.mrb[36].mxu1 %v7516_v62 }
 0x15b   : > { %6081 = vmatpush3.bf16.msra.mxu1 %v6812_v35  ;;  %2192 = vmatprep.mubr.bf16.mxu1 %v8553_v0 }
 0x15c   : > { %6082 = vmatprep.subr.bf16.mxu1 %v6815_v19 }
 0x15f   : > { %6083 = vmatpush3.bf16.msra.mxu1 %v6815_v19 }
 0x160   : > { %6084 = vmatprep.subr.bf16.mxu1 %v6818_v48 }
 0x162   : > { %2193 = vmatmul.mubr.bf16.gmra.mrb[40].mxu1 %v7522_v7 }
 0x163   : > { %6085 = vmatpush3.bf16.msra.mxu1 %v6818_v48  ;;  %2202 = vmatprep.mubr.bf16.mxu1 %v8553_v0 }
 0x164   : > { %6086 = vmatprep.subr.bf16.mxu1 %v6821_v51 }
 0x165   : > { %v1736_v20 = vpop.f32.mrb[0].mxu1 }
 0x166   : > { %v1738_v23 = vpop.f32.mrb[1].mxu1 }
 0x167   : > { %v1740_v25 = vpop.f32.mrb[2].mxu1  ;;  %6087 = vmatpush3.bf16.msra.mxu1 %v6821_v51 }
 0x168   : > { %v1742_v26 = vpop.f32.mrb[3].mxu1  ;;  %6088 = vmatprep.subr.bf16.mxu1 %v6824_v61 }
 0x16a   : > { %2203 = vmatmul.mubr.bf16.gmra.mrb[44].mxu1 %v7532_v21 }
 0x16b   : > { %6089 = vmatpush3.bf16.msra.mxu1 %v6824_v61  ;;  %6092 = vmatprep.mubr.bf16.mxu1 %v7505_v37 }
 0x16c   : > { %6090 = vmatprep.subr.bf16.mxu1 %v6827_v27 }
 0x16d   : > { %v1746_v28 = vpop.f32.mrb[4].mxu1 }
 0x16e   : > { %v1748_v29 = vpop.f32.mrb[5].mxu1 }
 0x16f   : > { %6091 = vmatpush3.bf16.msra.mxu1 %v6827_v27  ;;  %v1750_v30 = vpop.f32.mrb[6].mxu1 }
 0x170   : > { %v1752_v31 = vpop.f32.mrb[7].mxu1 }
 0x172   : > { %6093 = vmatmul.mubr.bf16.vlgmr.msra.gmra.mrb[48].mxu1 %v7516_v62 }
 0x173   : > { %6096 = vmatprep.mubr.bf16.mxu1 %v7522_v7 }
 0x175   : > { %v1756_v33 = vpop.f32.mrb[8].mxu1 }
 0x176   : > { %v1758_v34 = vpop.f32.mrb[9].mxu1 }
 0x177   : > { %v1760_v36 = vpop.f32.mrb[10].mxu1 }
 0x178   : > { %v1762_v38 = vpop.f32.mrb[11].mxu1 }
 0x17a   : > { %6097 = vmatmul.mubr.bf16.gmra.mrb[52].mxu1 %v7532_v21 }
 0x17d   : > { %v1766_v39 = vpop.f32.mrb[12].mxu1 }
 0x17e   : > { %v1768_v41 = vpop.f32.mrb[13].mxu1 }
 0x17f   : > { %v1770_v43 = vpop.f32.mrb[14].mxu1 }
 0x180   : > { %v1772_v45 = vpop.f32.mrb[15].mxu1 }
 0x184   : > { %v1663_v40 = vpop.f32.mrb[0].mxu0 }
 0x185   : > { %v1737_v37 = vadd.f32 %v1736_v20, %v1663_v40  ;;  %v1665_v42 = vpop.f32.mrb[1].mxu0 }
 0x186   : > { %v1739_v44 = vadd.f32 %v1738_v23, %v1665_v42  ;;  %v1667_v62 = vpop.f32.mrb[2].mxu0 }
 0x187   : > { %v1741_v7 = vadd.f32 %v1740_v25, %v1667_v62  ;;  %v1669_v46 = vpop.f32.mrb[3].mxu0 }
 0x188   : > { %v1743_v47 = vadd.f32 %v1742_v26, %v1669_v46 }
 0x189   : > { %v7626_v49 = vpack.c.bf16 %v1741_v7, %v1737_v37 }
 0x18a   : > { %v7628_v21 = vpack.c.bf16 %v1743_v47, %v1739_v44 }
 0x18b   : > { %6104 = vmatprep.mubr.msk.bf16.mxu1 %vm2390_vm0, %v7626_v49 }
 0x18c   : > { %v1673_v50 = vpop.f32.mrb[4].mxu0 }
 0x18d   : > { %v1747_v52 = vadd.f32 %v1746_v28, %v1673_v50  ;;  %v1675_v53 = vpop.f32.mrb[5].mxu0 }
 0x18e   : > { %v1749_v55 = vadd.f32 %v1748_v29, %v1675_v53  ;;  %v1677_v56 = vpop.f32.mrb[6].mxu0 }
 0x18f   : > { %v1751_v57 = vadd.f32 %v1750_v30, %v1677_v56  ;;  %v1679_v58 = vpop.f32.mrb[7].mxu0 }
 0x190   : > { %v1753_v59 = vadd.f32 %v1752_v31, %v1679_v58 }
 0x191   : > { %v7632_v60 = vpack.c.bf16 %v1751_v57, %v1747_v52 }
 0x192   : > { %v7634_v63 = vpack.c.bf16 %v1753_v59, %v1749_v55 }
 0x194   : > { %v1683_v1 = vpop.f32.mrb[8].mxu0 }
 0x195   : > { %v1757_v2 = vadd.f32 %v1756_v33, %v1683_v1  ;;  %v1685_v3 = vpop.f32.mrb[9].mxu0 }
 0x196   : > { %v1759_v4 = vadd.f32 %v1758_v34, %v1685_v3  ;;  %v1687_v5 = vpop.f32.mrb[10].mxu0 }
 0x197   : > { %v1761_v6 = vadd.f32 %v1760_v36, %v1687_v5  ;;  %v1689_v8 = vpop.f32.mrb[11].mxu0 }
 0x198   : > { %v1763_v9 = vadd.f32 %v1762_v38, %v1689_v8 }
 0x199   : > { %v7636_v10 = vpack.c.bf16 %v1761_v6, %v1757_v2 }
 0x19a   : > { %v7638_v11 = vpack.c.bf16 %v1763_v9, %v1759_v4 }
 0x19b   : > { %6112 = vmatprep.mubr.msk.bf16.mxu0 %vm2390_vm0, %v7636_v10 }
 0x19c   : > { %v1693_v12 = vpop.f32.mrb[12].mxu0 }
 0x19d   : > { %v1767_v13 = vadd.f32 %v1766_v39, %v1693_v12  ;;  %v1695_v54 = vpop.f32.mrb[13].mxu0 }
 0x19e   : > { %v1769_v14 = vadd.f32 %v1768_v41, %v1695_v54  ;;  %v1697_v15 = vpop.f32.mrb[14].mxu0 }
 0x19f   : > { %v1771_v16 = vadd.f32 %v1770_v43, %v1697_v15  ;;  %v1699_v22 = vpop.f32.mrb[15].mxu0 }
 0x1a0   : > { %v1773_v24 = vadd.f32 %v1772_v45, %v1699_v22 }
 0x1a1   : > { %v7642_v17 = vpack.c.bf16 %v1771_v16, %v1767_v13 }
 0x1a2   : > { %v7644_v18 = vpack.c.bf16 %v1773_v24, %v1769_v14 }
 0x1c5   : > { %v1882_v32 = vpop.f32.mrb[16].mxu1 }
 0x1c6   : > { %v1884_v35 = vpop.f32.mrb[17].mxu1 }
 0x1c7   : > { %v1886_v19 = vpop.f32.mrb[18].mxu1 }
 0x1c8   : > { %v7646_v48 = vpack.c.bf16 %v1886_v19, %v1882_v32  ;;  %v1888_v51 = vpop.f32.mrb[19].mxu1 }
 0x1c9   : > { %v7648_v61 = vpack.c.bf16 %v1888_v51, %v1884_v35 }
 0x1cb   : > { %6412 = vmatprep.subr.msk.bf16.mxu1 %vm2390_vm0, %v7648_v61  ;;  %v2398_v20 = vsel %vm2390_vm0, %v7648_v61, 0 }
 0x1cc   : > { %6101 = vmatpush3.bf16.xpose.msra.mxu1 %v2398_v20 }
 0x1cd   : > { %v1892_v23 = vpop.f32.mrb[20].mxu1 }
 0x1ce   : > { %v1894_v25 = vpop.f32.mrb[21].mxu1 }
 0x1cf   : > { %v1896_v26 = vpop.f32.mrb[22].mxu1 }
 0x1d0   : > { %v7654_v27 = vpack.c.bf16 %v1896_v26, %v1892_v23  ;;  %v1898_v28 = vpop.f32.mrb[23].mxu1 }
 0x1d1   : > { %v7656_v29 = vpack.c.bf16 %v1898_v28, %v1894_v25 }
 0x1d3   : > { %6413 = vmatprep.subr.msk.bf16.mxu1 %vm2390_vm0, %v7656_v29  ;;  %v2401_v30 = vsel %vm2390_vm0, %v7656_v29, 0 }
 0x1d4   : > { %6103 = vmatpush3.bf16.xpose.msra.mxu1 %v2401_v30 }
 0x1d5   : > { %v1902_v31 = vpop.f32.mrb[24].mxu1 }
 0x1d6   : > { %v1904_v33 = vpop.f32.mrb[25].mxu1 }
 0x1d7   : > { %v1906_v34 = vpop.f32.mrb[26].mxu1 }
 0x1d8   : > { %v7662_v36 = vpack.c.bf16 %v1906_v34, %v1902_v31  ;;  %v1908_v38 = vpop.f32.mrb[27].mxu1 }
 0x1d9   : > { %v7664_v39 = vpack.c.bf16 %v1908_v38, %v1904_v33 }
 0x1db   : > { %6105 = vmatmul.mubr.msk.bf16.vlgmr.msra.gmra.mrb[56].mxu1 %vm2390_vm0, %v7632_v60  ;;  %6414 = vmatprep.subr.msk.bf16.mxu0 %vm2390_vm0, %v7664_v39  ;;  %v2459_v40 = vsel %vm2390_vm0, %v7664_v39, 0 }
 0x1dc   : > { %6109 = vmatpush3.bf16.xpose.msra.mxu0 %v2459_v40 }
 0x1dd   : > { %v1912_v41 = vpop.f32.mrb[28].mxu1 }
 0x1de   : > { %v1914_v37 = vpop.f32.mrb[29].mxu1 }
 0x1df   : > { %v1916_v42 = vpop.f32.mrb[30].mxu1 }
 0x1e0   : > { %v7672_v43 = vpack.c.bf16 %v1916_v42, %v1912_v41  ;;  %v1918_v44 = vpop.f32.mrb[31].mxu1 }
 0x1e1   : > { %v7674_v62 = vpack.c.bf16 %v1918_v44, %v1914_v37 }
 0x1e3   : > { %6415 = vmatprep.subr.msk.bf16.mxu0 %vm2390_vm0, %v7674_v62  ;;  %v2462_v45 = vsel %vm2390_vm0, %v7674_v62, 0 }
 0x1e4   : > { %6111 = vmatpush3.bf16.xpose.msra.mxu0 %v2462_v45  ;;  %v2028_v7 = vpop.f32.mrb[16].mxu0 }
 0x1e5   : > { %v2030_v46 = vpop.f32.mrb[17].mxu0 }
 0x1e6   : > { %v2032_v47 = vpop.f32.mrb[18].mxu0 }
 0x1e7   : > { %v7682_v50 = vpack.c.bf16 %v2032_v47, %v2028_v7  ;;  %v2034_v52 = vpop.f32.mrb[19].mxu0 }
 0x1e8   : > { %v7684_v53 = vpack.c.bf16 %v2034_v52, %v2030_v46 }
 0x1eb   : > { %6113 = vmatmul.mubr.msk.bf16.vlgmr.msra.gmra.mrb[48].mxu0 %vm2390_vm0, %v7642_v17 }
 0x1ec   : > { %v2038_v55 = vpop.f32.mrb[20].mxu0 }
 0x1ed   : > { %v2040_v56 = vpop.f32.mrb[21].mxu0 }
 0x1ee   : > { %v2042_v57 = vpop.f32.mrb[22].mxu0 }
 0x1ef   : > { %v7686_v58 = vpack.c.bf16 %v2042_v57, %v2038_v55  ;;  %v2044_v59 = vpop.f32.mrb[23].mxu0 }
 0x1f0   : > { %v7688_v1 = vpack.c.bf16 %v2044_v59, %v2040_v56 }
 0x1f4   : > { %v2048_v2 = vpop.f32.mrb[24].mxu0 }
 0x1f5   : > { %v2050_v3 = vpop.f32.mrb[25].mxu0 }
 0x1f6   : > { %v2052_v4 = vpop.f32.mrb[26].mxu0 }
 0x1f7   : > { %v7690_v5 = vpack.c.bf16 %v2052_v4, %v2048_v2  ;;  %v2054_v6 = vpop.f32.mrb[27].mxu0 }
 0x1f8   : > { %v7692_v8 = vpack.c.bf16 %v2054_v6, %v2050_v3 }
 0x1fc   : > { %v2058_v9 = vpop.f32.mrb[28].mxu0 }
 0x1fd   : > { %v2060_v12 = vpop.f32.mrb[29].mxu0 }
 0x1fe   : > { %v2062_v13 = vpop.f32.mrb[30].mxu0 }
 0x1ff   : > { %v7694_v54 = vpack.c.bf16 %v2062_v13, %v2058_v9  ;;  %v2064_v14 = vpop.f32.mrb[31].mxu0 }
 0x200   : > { %v7696_v15 = vpack.c.bf16 %v2064_v14, %v2060_v12 }
 0x204   : > { %v5892_v16 = vpop.f32.mrb[32].mxu0 }
 0x205   : > { %v5893_v22 = vpop.f32.mrb[33].mxu0 }
 0x206   : > { %v5894_v24 = vadd.f32 %v5893_v22, %v5892_v16  ;;  %v5895_v32 = vpop.f32.mrb[34].mxu0 }
 0x207   : > { %v5896_v35 = vpop.f32.mrb[35].mxu0 }
 0x208   : > { %v5897_v19 = vadd.f32 %v5896_v35, %v5895_v32 }
 0x20c   : > { %v5898_v51 = vpop.f32.mrb[36].mxu0 }
 0x20d   : > { %v5899_v20 = vpop.f32.mrb[37].mxu0 }
 0x20e   : > { %v5900_v23 = vadd.f32 %v5899_v20, %v5898_v51  ;;  %v5901_v25 = vpop.f32.mrb[38].mxu0 }
 0x20f   : > { %v5902_v26 = vpop.f32.mrb[39].mxu0 }
 0x210   : > { %v5903_v28 = vadd.f32 %v5902_v26, %v5901_v25 }
 0x214   : > { %v5904_v30 = vpop.f32.mrb[40].mxu0 }
 0x215   : > { %v5905_v31 = vpop.f32.mrb[41].mxu0 }
 0x216   : > { %v5906_v33 = vadd.f32 %v5905_v31, %v5904_v30  ;;  %v5907_v34 = vpop.f32.mrb[42].mxu0 }
 0x217   : > { %v5908_v38 = vpop.f32.mrb[43].mxu0 }
 0x218   : > { %v5909_v40 = vadd.f32 %v5908_v38, %v5907_v34 }
 0x21c   : > { %v5910_v44 = vpop.f32.mrb[44].mxu0 }
 0x21d   : > { %v5911_v46 = vpop.f32.mrb[45].mxu0 }
 0x21e   : > { %v5912_v52 = vadd.f32 %v5911_v46, %v5910_v44  ;;  %v5913_v55 = vpop.f32.mrb[46].mxu0 }
 0x21f   : > { %v5914_v56 = vpop.f32.mrb[47].mxu0 }
 0x220   : > { %v5915_v57 = vadd.f32 %v5914_v56, %v5913_v55 }
 0x225   : > { %v2174_v41 = vpop.f32.mrb[32].mxu1 }
 0x226   : > { %v2176_v37 = vpop.f32.mrb[33].mxu1 }
 0x227   : > { %v2178_v42 = vpop.f32.mrb[34].mxu1 }
 0x228   : > { %v7698_v45 = vpack.c.bf16 %v2178_v42, %v2174_v41  ;;  %v2180_v7 = vpop.f32.mrb[35].mxu1 }
 0x229   : > { %v7700_v47 = vpack.c.bf16 %v2180_v7, %v2176_v37 }
 0x22a   : > { %6116 = vmatprep.subr.bf16.mxu0 %v7698_v45 }
 0x22b   : > { %6117 = vmatpush3.bf16.msra.mxu0 %v7698_v45 }
 0x22d   : > { %v2184_v59 = vpop.f32.mrb[36].mxu1 }
 0x22e   : > { %v2186_v2 = vpop.f32.mrb[37].mxu1 }
 0x22f   : > { %v2188_v3 = vpop.f32.mrb[38].mxu1 }
 0x230   : > { %v7704_v4 = vpack.c.bf16 %v2188_v3, %v2184_v59  ;;  %v2190_v6 = vpop.f32.mrb[39].mxu1 }
 0x231   : > { %v7706_v9 = vpack.c.bf16 %v2190_v6, %v2186_v2 }
 0x232   : > { %6118 = vmatprep.subr.bf16.mxu0 %v7704_v4 }
 0x233   : > { %6119 = vmatpush3.bf16.msra.mxu0 %v7704_v4 }
 0x235   : > { %v2194_v12 = vpop.f32.mrb[40].mxu1 }
 0x236   : > { %v2196_v13 = vpop.f32.mrb[41].mxu1 }
 0x237   : > { %v2198_v14 = vpop.f32.mrb[42].mxu1 }
 0x238   : > { %v7710_v16 = vpack.c.bf16 %v2198_v14, %v2194_v12  ;;  %v2200_v22 = vpop.f32.mrb[43].mxu1 }
 0x239   : > { %v7712_v32 = vpack.c.bf16 %v2200_v22, %v2196_v13 }
 0x23a   : > { %6124 = vmatprep.subr.bf16.mxu1 %v7710_v16 }
 0x23b   : > { %6125 = vmatpush3.bf16.msra.mxu1 %v7710_v16 }
 0x23d   : > { %v2204_v35 = vpop.f32.mrb[44].mxu1 }
 0x23e   : > { %v2206_v51 = vpop.f32.mrb[45].mxu1 }
 0x23f   : > { %v2208_v20 = vpop.f32.mrb[46].mxu1 }
 0x240   : > { %v7716_v25 = vpack.c.bf16 %v2208_v20, %v2204_v35  ;;  %v2210_v26 = vpop.f32.mrb[47].mxu1 }
 0x241   : > { %v7718_v30 = vpack.c.bf16 %v2210_v26, %v2206_v51 }
 0x242   : > { %6126 = vmatprep.subr.bf16.mxu1 %v7716_v25 }
 0x243   : > { %6127 = vmatpush3.bf16.msra.mxu1 %v7716_v25 }
 0x245   : > { %v6094_v31 = vpop.f32.mrb[48].mxu1 }
 0x246   : > { %v2321_v34 = vadd.f32 %v6094_v31, %v5900_v23  ;;  %v2312_v38 = vpop.f32.mrb[49].mxu1 }
 0x247   : > { %v2313_v41 = vadd.f32 %v5894_v24, %v2312_v38  ;;  %v6095_v37 = vpop.f32.mrb[50].mxu1  ;;  %v2379_v24 = vlaneseq }
 0x248   : > { %v2324_v42 = vadd.f32 %v6095_v37, %v5903_v28  ;;  %v2315_v44 = vpop.f32.mrb[51].mxu1 }
 0x249   : > { %v2316_v7 = vadd.f32 %v5897_v19, %v2315_v44  ;;  %v7730_v28 = vshrl.u32 %v2379_v24, 7  ;;  %v2385_v35 = vand.u32 127, %v2379_v24 }
 0x24a   : > { %v7722_v46 = vpack.c.bf16 %v2324_v42, %v2321_v34 }
 0x24b   : > { %v7724_v55 = vpack.c.bf16 %v2316_v7, %v2313_v41  ;;  %8573 = vst [vmem:[#allocation12_spill] sm:$0xff] %v7730_v28  ;;  %v2382_v19 = vadd.s32 16, %v7730_v28  ;;  %v2383_v51 = vadd.s32 24, %v7730_v28  ;;  %vm7740_vm2 = vcmp.le.s32.totalorder %v2385_v35, %v7730_v28 }
 0x24d   : > { %v6098_v56 = vpop.f32.mrb[52].mxu1  ;;  %vm7735_vm1 = vcmp.le.s32.totalorder %v2385_v35, %v2382_v19  ;;  %vm7744_vm4 = vcmp.le.s32.totalorder %v2385_v35, %v2383_v51 }
 0x24e   : > { %v2337_v59 = vadd.f32 %v6098_v56, %v5912_v52  ;;  %v2328_v2 = vpop.f32.mrb[53].mxu1  ;;  %v2381_v52 = vadd.s32 8, %v7730_v28 }
 0x24f   : > { %v2329_v3 = vadd.f32 %v5906_v33, %v2328_v2  ;;  %v6099_v6 = vpop.f32.mrb[54].mxu1 }
 0x250   : > { %v2340_v12 = vadd.f32 %v6099_v6, %v5915_v57  ;;  %v2331_v13 = vpop.f32.mrb[55].mxu1  ;;  %vm7750_vm5 = vcmp.le.s32.totalorder %v2385_v35, %v2381_v52 }
 0x251   : > { %v2332_v14 = vadd.f32 %v5909_v40, %v2331_v13 }
 0x252   : > { %v7726_v22 = vpack.c.bf16 %v2340_v12, %v2337_v59 }
 0x253   : > { %v7728_v23 = vpack.c.bf16 %v2332_v14, %v2329_v3 }
 0x2ae   : > { %v6106_v57 = vpop.f32.mrb[56].mxu1 }
 0x2af   : > { %v2523_v26 = vsel %vm7735_vm1, %v6106_v57, -inf  ;;  %v2437_v31 = vpop.f32.mrb[57].mxu1 }
 0x2b0   : > { %v2521_v38 = vsel %vm7740_vm2, %v2437_v31, -inf  ;;  %v6107_v41 = vpop.f32.mrb[58].mxu1  ;;  %v2536_v37 = vsel %vm2529_vm3, %v2523_v26, -inf }
 0x2b1   : > { %v2524_v42 = vsel %vm7744_vm4, %v6107_v41, -inf  ;;  %2537 = vmax.xlane.f32.xlu1 %v2536_v37  ;;  %v2440_v44 = vpop.f32.mrb[59].mxu1  ;;  %v2530_v7 = vsel %vm2529_vm3, %v2521_v38, -inf }
 0x2b2   : > { %v2522_v56 = vsel %vm7750_vm5, %v2440_v44, -inf  ;;  %2531 = vmax.xlane.f32.xlu0 %v2530_v7  ;;  %v2539_v59 = vsel %vm2529_vm3, %v2524_v42, -inf }
 0x2b3   : > { %v2533_v2 = vsel %vm2529_vm3, %v2522_v56, -inf }
 0x2b5   : > { %2540 = vmax.xlane.f32.xlu1 %v2539_v59 }
 0x2b6   : > { %2534 = vmax.xlane.f32.xlu0 %v2533_v2 }
 0x2be   : > { %v6114_v3 = vpop.f32.mrb[48].mxu0 }
 0x2bf   : > { %v2498_v6 = vpop.f32.mrb[49].mxu0  ;;  %v2527_v35 = vsel %vm7735_vm1, %v6114_v3, -inf }
 0x2c0   : > { %v2525_v12 = vsel %vm7740_vm2, %v2498_v6, -inf  ;;  %v6115_v13 = vpop.f32.mrb[50].mxu0  ;;  %v2548_v57 = vsel %vm2529_vm3, %v2527_v35, -inf }
 0x2c1   : > { %v2528_v14 = vsel %vm7744_vm4, %v6115_v13, -inf  ;;  %v2501_v24 = vpop.f32.mrb[51].mxu0  ;;  %v2542_v19 = vsel %vm2529_vm3, %v2525_v12, -inf }
 0x2c2   : > { %2543 = vmax.xlane.f32.xlu0 %v2542_v19  ;;  %v2551_v51 = vsel %vm2529_vm3, %v2528_v14, -inf  ;;  %v2526_v52 = vsel %vm7750_vm5, %v2501_v24, -inf }
 0x2c3   : > { %2552 = vmax.xlane.f32.xlu1 %v2551_v51  ;;  %v2545_v31 = vsel %vm2529_vm3, %v2526_v52, -inf }
 0x2c6   : > { %2549 = vmax.xlane.f32.xlu0 %v2548_v57 }
 0x2c7   : > { %2546 = vmax.xlane.f32.xlu1 %v2545_v31 }
 0x2d8   : > { %2746 = vrot.lane.b32.xlu1 %v7656_v29, %s7285_s21 }
 0x33e   : > { %v2538_v41 = vpop.xlane.xlu1 %2537 }
 0x33f   : > { %v2556_v37 = vsub.f32 %v2523_v26, %v2538_v41  ;;  %v2532_v44 = vpop.xlane.xlu0 %2531 }
 0x340   : > { %v2554_v7 = vsub.f32 %v2521_v38, %v2532_v44 }
 0x341   : > { %v2566_v59 = vmul.f32 1.442695, %v2556_v37 }
 0x342   : > { %v2562_v2 = vmul.f32 1.442695, %v2554_v7  ;;  %v2541_v3 = vpop.xlane.xlu1 %2540 }
 0x343   : > { %6925 = vpow2.f32 %v2566_v59  ;;  %v2557_v6 = vsub.f32 %v2524_v42, %v2541_v3  ;;  %v2535_v13 = vpop.xlane.xlu0 %2534 }
 0x344   : > { %v2555_v24 = vsub.f32 %v2522_v56, %v2535_v13  ;;  %6927 = vpow2.f32 %v2562_v2 }
 0x345   : > { %v2568_v19 = vmul.f32 1.442695, %v2557_v6 }
 0x346   : > { %v2564_v51 = vmul.f32 1.442695, %v2555_v24 }
 0x347   : > { %6929 = vpow2.f32 %v2568_v19 }
 0x348   : > { %6931 = vpow2.f32 %v2564_v51 }
 0x34d   : > { %v7778_v57 = vpop.eup %6925 }
 0x34e   : > { %v2584_v29 = vsel %vm2529_vm3, %v7778_v57, 0.0  ;;  %v6928_v26 = vpop.eup %6927 }
 0x34f   : > { %2585 = vadd.xlane.f32.xlu0 %v2584_v29  ;;  %v2578_v31 = vsel %vm2529_vm3, %v6928_v26, 0.0  ;;  %v2544_v37 = vpop.xlane.xlu0 %2543 }
 0x350   : > { %v2553_v7 = vpop.xlane.xlu1 %2552  ;;  %v2558_v2 = vsub.f32 %v2525_v12, %v2544_v37 }
 0x351   : > { %v6930_v38 = vpop.eup %6929  ;;  %v2561_v3 = vsub.f32 %v2528_v14, %v2553_v7 }
 0x352   : > { %v2587_v41 = vsel %vm2529_vm3, %v6930_v38, 0.0  ;;  %v6932_v42 = vpop.eup %6931  ;;  %v2570_v24 = vmul.f32 1.442695, %v2558_v2 }
 0x353   : > { %2579 = vadd.xlane.f32.xlu0 %v2578_v31  ;;  %2588 = vadd.xlane.f32.xlu1 %v2587_v41  ;;  %v2581_v56 = vsel %vm2529_vm3, %v6932_v42, 0.0  ;;  %v2550_v44 = vpop.xlane.xlu0 %2549  ;;  %v2576_v19 = vmul.f32 1.442695, %v2561_v3 }
 0x354   : > { %v2560_v59 = vsub.f32 %v2527_v35, %v2550_v44  ;;  %v2547_v13 = vpop.xlane.xlu1 %2546 }
 0x355   : > { %v2559_v51 = vsub.f32 %v2526_v52, %v2547_v13 }
 0x356   : > { %v2574_v6 = vmul.f32 1.442695, %v2560_v59 }
 0x357   : > { %2582 = vadd.xlane.f32.xlu1 %v2581_v56  ;;  %v2572_v29 = vmul.f32 1.442695, %v2559_v51 }
 0x358   : > { %6933 = vpow2.f32 %v2574_v6  ;;  %v2747_v56 = vpop.permute.xlu1 %2746 }
 0x359   : > { %6935 = vpow2.f32 %v2570_v24 }
 0x35a   : > { %6937 = vpow2.f32 %v2576_v19 }
 0x35b   : > { %6939 = vpow2.f32 %v2572_v29 }
 0x368   : > { %2738 = vrot.lane.b32.xlu1 %v7626_v49, %s7285_s21  ;;  %v7789_v49 = vpop.eup %6933 }
 0x369   : > { %2744 = vrot.lane.b32.xlu0 %v7648_v61, %s7285_s21  ;;  %v7791_v31 = vpop.eup %6935  ;;  %v2596_v61 = vsel %vm2529_vm3, %v7789_v49, 0.0 }
 0x36a   : > { %v6938_v35 = vpop.eup %6937  ;;  %v2590_v12 = vsel %vm2529_vm3, %v7791_v31, 0.0 }
 0x36b   : > { %v2599_v14 = vsel %vm2529_vm3, %v6938_v35, 0.0  ;;  %v6940_v41 = vpop.eup %6939 }
 0x36c   : > { %v2593_v52 = vsel %vm2529_vm3, %v6940_v41, 0.0 }
 0x388   : > { %2597 = vadd.xlane.f32.xlu0 %v2596_v61 }
 0x38c   : > { %2591 = vadd.xlane.f32.xlu0 %v2590_v12  ;;  %2600 = vadd.xlane.f32.xlu1 %v2599_v14 }
 0x390   : > { %2594 = vadd.xlane.f32.xlu1 %v2593_v52 }
 0x3a1   : > { %2740 = vrot.lane.b32.xlu1 %v7632_v60, %s7285_s21 }
 0x3a2   : > { %2817 = vrot.lane.b32.xlu0 %v7664_v39, %s7285_s21 }
 0x3a5   : > { %2819 = vrot.lane.b32.xlu1 %v7674_v62, %s7285_s21 }
 0x3a6   : > { %2811 = vrot.lane.b32.xlu0 %v7636_v10, %s7285_s21 }
 0x3a9   : > { %2813 = vrot.lane.b32.xlu1 %v7642_v17, %s7285_s21 }
 0x3dc   : > { %v2586_v37 = vpop.xlane.xlu0 %2585 }
 0x3e0   : > { %v2580_v44 = vpop.xlane.xlu0 %2579  ;;  %v2589_v7 = vpop.xlane.xlu1 %2588 }
 0x3e1   : > { %6941 = vrcp.f32 %v2589_v7 }
 0x3e2   : > { %6943 = vrcp.f32 %v2580_v44 }
 0x3e3   : > { %6945 = vrcp.f32 %v2586_v37 }
 0x3e4   : > { %v2745_v60 = vpop.permute.xlu0 %2744  ;;  %v2583_v59 = vpop.xlane.xlu1 %2582 }
 0x3e5   : > { %6947 = vrcp.f32 %v2583_v59  ;;  %6416 = vmatprep.subr.msk.bf16.mxu0 %vm2390_vm0, %v2745_v60  ;;  %v2755_v29 = vsel %vm2390_vm0, %v2745_v60, 0 }
 0x3e8   : > { %v2739_v51 = vpop.permute.xlu1 %2738 }
 0x3eb   : > { %v6942_v39 = vpop.eup %6941 }
 0x3ec   : > { %v6944_v62 = vpop.eup %6943  ;;  %v2613_v10 = vmul.f32 %v6942_v39, %v6930_v38  ;;  %v2758_v38 = vsel %vm2390_vm0, %v2747_v56, 0 }
 0x3ed   : > { %v6946_v2 = vpop.eup %6945  ;;  %v2610_v6 = vmul.f32 %v6944_v62, %v6928_v26 }
 0x3ee   : > { %v2612_v17 = vmul.f32 %v6946_v2, %v7778_v57 }
 0x3ef   : > { %v6948_v3 = vpop.eup %6947 }
 0x3f0   : > { %v2611_v13 = vmul.f32 %v6948_v3, %v6932_v42  ;;  %v2619_v19 = vpack.c.bf16 %v2613_v10, %v2612_v17 }
 0x3f2   : > { %v2618_v24 = vpack.c.bf16 %v2611_v13, %v2610_v6 }
 0x3f4   : > { %6120 = vmatprep.mubr.msk.bf16.mxu0 %vm2529_vm3, %v2618_v24 }
 0x3f5   : > { %6121 = vmatmul.mubr.msk.bf16.vlgmr.msra.gmra.mrb[52].mxu0 %vm2529_vm3, %v2619_v19 }
 0x3f6   : > { %6133 = vmatpush3.bf16.xpose.msra.mxu0 %v2755_v29  ;;  %6136 = vmatprep.mubr.msk.bf16.mxu0 %vm2390_vm0, %v2739_v51 }
 0x3f7   : > { %6417 = vmatprep.subr.msk.bf16.mxu0 %vm2390_vm0, %v2747_v56 }
 0x3fe   : > { %6135 = vmatpush3.bf16.xpose.msra.mxu0 %v2758_v38 }
 0x415   : > { %v2598_v26 = vpop.xlane.xlu0 %2597 }
 0x419   : > { %v2592_v42 = vpop.xlane.xlu0 %2591  ;;  %v2601_v57 = vpop.xlane.xlu1 %2600 }
 0x41a   : > { %6949 = vrcp.f32 %v2601_v57 }
 0x41b   : > { %6951 = vrcp.f32 %v2592_v42 }
 0x41c   : > { %6953 = vrcp.f32 %v2598_v26 }
 0x41d   : > { %v2818_v61 = vpop.permute.xlu0 %2817  ;;  %v2595_v12 = vpop.xlane.xlu1 %2594 }
 0x41e   : > { %6955 = vrcp.f32 %v2595_v12  ;;  %6418 = vmatprep.subr.msk.bf16.mxu1 %vm2390_vm0, %v2818_v61  ;;  %v2828_v10 = vsel %vm2390_vm0, %v2818_v61, 0 }
 0x421   : > { %v2741_v14 = vpop.permute.xlu1 %2740  ;;  %v2812_v3 = vpop.permute.xlu0 %2811 }
 0x422   : > { %6137 = vmatmul.mubr.msk.bf16.vlgmr.msra.gmra.mrb[56].mxu0 %vm2390_vm0, %v2741_v14 }
 0x424   : > { %v6950_v52 = vpop.eup %6949 }
 0x425   : > { %v6952_v37 = vpop.eup %6951  ;;  %v2617_v56 = vmul.f32 %v6950_v52, %v6938_v35  ;;  %v2820_v6 = vpop.permute.xlu1 %2819 }
 0x426   : > { %v6954_v44 = vpop.eup %6953  ;;  %v2614_v60 = vmul.f32 %v6952_v37, %v7791_v31  ;;  %v2831_v31 = vsel %vm2390_vm0, %v2820_v6, 0 }
 0x427   : > { %v2616_v39 = vmul.f32 %v6954_v44, %v7789_v49 }
 0x428   : > { %v6956_v7 = vpop.eup %6955 }
 0x429   : > { %v2615_v59 = vmul.f32 %v6956_v7, %v6940_v41  ;;  %v2621_v2 = vpack.c.bf16 %v2617_v56, %v2616_v39  ;;  %v2814_v35 = vpop.permute.xlu1 %2813 }
 0x42b   : > { %v2620_v62 = vpack.c.bf16 %v2615_v59, %v2614_v60 }
 0x42d   : > { %6128 = vmatprep.mubr.msk.bf16.mxu1 %vm2529_vm3, %v2620_v62 }
 0x42e   : > { %6129 = vmatmul.mubr.msk.bf16.vlgmr.msra.gmra.mrb[60].mxu1 %vm2529_vm3, %v2621_v2 }
 0x42f   : > { %6141 = vmatpush3.bf16.xpose.msra.mxu1 %v2828_v10  ;;  %6144 = vmatprep.mubr.msk.bf16.mxu1 %vm2390_vm0, %v2812_v3 }
 0x430   : > { %6419 = vmatprep.subr.msk.bf16.mxu1 %vm2390_vm0, %v2820_v6 }
 0x437   : > { %6143 = vmatpush3.bf16.xpose.msra.mxu1 %v2831_v31 }
 0x43e   : > { %6145 = vmatmul.mubr.msk.bf16.vlgmr.msra.gmra.mrb[64].mxu1 %vm2390_vm0, %v2814_v35 }
 0x4c8   : > { %v7828_v49 = vpop.f32.mrb[52].mxu0 }
 0x4c9   : > { %v7830_v41 = vpop.f32.mrb[53].mxu0 }
 0x4ca   : > { %v7832_v13 = vpop.f32.mrb[54].mxu0 }
 0x4cb   : > { %v7836_v24 = vpop.f32.mrb[55].mxu0 }
 0x4f5   : > { %v6138_v51 = vpop.f32.mrb[56].mxu0 }
 0x4f6   : > { %v2794_v29 = vpop.f32.mrb[57].mxu0  ;;  %v2884_v61 = vsel %vm7735_vm1, %v6138_v51, -inf }
 0x4f7   : > { %v2882_v38 = vsel %vm7740_vm2, %v2794_v29, -inf  ;;  %v6139_v26 = vpop.f32.mrb[58].mxu0  ;;  %v2896_v52 = vsel %vm2529_vm3, %v2884_v61, -inf }
 0x4f8   : > { %v2797_v42 = vpop.f32.mrb[59].mxu0  ;;  %v2890_v57 = vsel %vm2529_vm3, %v2882_v38, -inf  ;;  %v2885_v37 = vsel %vm7744_vm4, %v6139_v26, -inf }
 0x4f9   : > { %v2883_v12 = vsel %vm7750_vm5, %v2797_v42, -inf  ;;  %2891 = vmax.xlane.f32.xlu0 %v2890_v57  ;;  %v2899_v44 = vsel %vm2529_vm3, %v2885_v37, -inf }
 0x4fa   : > { %v2893_v14 = vsel %vm2529_vm3, %v2883_v12, -inf }
 0x4fb   : > { %2894 = vmax.xlane.f32.xlu1 %v2893_v14 }
 0x4fd   : > { %2897 = vmax.xlane.f32.xlu0 %v2896_v52 }
 0x501   : > { %v7852_v7 = vpop.f32.mrb[60].mxu1  ;;  %2900 = vmax.xlane.f32.xlu0 %v2899_v44 }
 0x502   : > { %8582 = vst [vmem:[#allocation13_spill] sm:$0xff] %v7852_v7  ;;  %v7854_v56 = vpop.f32.mrb[61].mxu1 }
 0x503   : > { %8583 = vst [vmem:[#allocation14_spill] sm:$0xff] %v7854_v56  ;;  %v7856_v60 = vpop.f32.mrb[62].mxu1 }
 0x504   : > { %8584 = vst [vmem:[#allocation15_spill] sm:$0xff] %v7856_v60  ;;  %v7860_v39 = vpop.f32.mrb[63].mxu1 }
 0x505   : > { %8585 = vst [vmem:[#allocation16_spill] sm:$0xff] %v7860_v39 }
 0x511   : > { %v6146_v2 = vpop.f32.mrb[64].mxu1 }
 0x512   : > { %v2867_v3 = vpop.f32.mrb[65].mxu1  ;;  %v2888_v51 = vsel %vm7735_vm1, %v6146_v2, -inf }
 0x513   : > { %v2886_v10 = vsel %vm7740_vm2, %v2867_v3, -inf  ;;  %v6147_v6 = vpop.f32.mrb[66].mxu1  ;;  %v2908_v57 = vsel %vm2529_vm3, %v2888_v51, -inf }
 0x514   : > { %v2870_v31 = vpop.f32.mrb[67].mxu1  ;;  %v2902_v35 = vsel %vm2529_vm3, %v2886_v10, -inf  ;;  %v2889_v42 = vsel %vm7744_vm4, %v6147_v6, -inf }
 0x515   : > { %v2887_v29 = vsel %vm7750_vm5, %v2870_v31, -inf  ;;  %2903 = vmax.xlane.f32.xlu0 %v2902_v35  ;;  %v2911_v14 = vsel %vm2529_vm3, %v2889_v42, -inf }
 0x516   : > { %v2905_v26 = vsel %vm2529_vm3, %v2887_v29, -inf }
 0x517   : > { %2906 = vmax.xlane.f32.xlu1 %v2905_v26 }
 0x519   : > { %2909 = vmax.xlane.f32.xlu0 %v2908_v57 }
 0x51b   : > { %2912 = vmax.xlane.f32.xlu1 %v2911_v14 }
 0x52c   : > { %2986 = vrot.lane.b32.xlu1 %v7704_v4, %s7285_s21 }
 0x52f   : > { %2984 = vrot.lane.b32.xlu0 %v7698_v45, %s7285_s21 }
 0x586   : > { %v2892_v52 = vpop.xlane.xlu0 %2891 }
 0x587   : > { %v2914_v44 = vsub.f32 %v2882_v38, %v2892_v52 }
 0x588   : > { %v2895_v2 = vpop.xlane.xlu1 %2894 }
 0x589   : > { %v2922_v35 = vmul.f32 1.442695, %v2914_v44  ;;  %v2915_v6 = vsub.f32 %v2883_v12, %v2895_v2 }
 0x58a   : > { %v2898_v3 = vpop.xlane.xlu0 %2897 }
 0x58b   : > { %v2916_v31 = vsub.f32 %v2884_v61, %v2898_v3  ;;  %v2924_v59 = vmul.f32 1.442695, %v2915_v6 }
 0x58d   : > { %v2926_v26 = vmul.f32 1.442695, %v2916_v31 }
 0x58e   : > { %v2901_v0 = vpop.xlane.xlu0 %2900 }
 0x58f   : > { %6957 = vpow2.f32 %v2926_v26  ;;  %v2917_v57 = vsub.f32 %v2885_v37, %v2901_v0 }
 0x590   : > { %6959 = vpow2.f32 %v2922_v35 }
 0x591   : > { %v2928_v14 = vmul.f32 1.442695, %v2917_v57 }
 0x593   : > { %6961 = vpow2.f32 %v2928_v14 }
 0x594   : > { %6963 = vpow2.f32 %v2924_v59 }
 0x599   : > { %v7880_v4 = vpop.eup %6957 }
 0x59a   : > { %v2944_v45 = vsel %vm2529_vm3, %v7880_v4, 0.0  ;;  %v6960_v38 = vpop.eup %6959 }
 0x59b   : > { %2945 = vadd.xlane.f32.xlu0 %v2944_v45  ;;  %v2938_v61 = vsel %vm2529_vm3, %v6960_v38, 0.0 }
 0x59d   : > { %v6962_v52 = vpop.eup %6961 }
 0x59e   : > { %v2947_v12 = vsel %vm2529_vm3, %v6962_v52, 0.0  ;;  %v6964_v44 = vpop.eup %6963 }
 0x59f   : > { %2939 = vadd.xlane.f32.xlu0 %v2938_v61  ;;  %2948 = vadd.xlane.f32.xlu1 %v2947_v12  ;;  %v2941_v37 = vsel %vm2529_vm3, %v6964_v44, 0.0 }
 0x5a2   : > { %v2904_v0 = vpop.xlane.xlu0 %2903 }
 0x5a3   : > { %v2918_v2 = vsub.f32 %v2886_v10, %v2904_v0  ;;  %2942 = vadd.xlane.f32.xlu1 %v2941_v37 }
 0x5a4   : > { %v2907_v59 = vpop.xlane.xlu1 %2906 }
 0x5a5   : > { %v2930_v3 = vmul.f32 1.442695, %v2918_v2  ;;  %v2919_v26 = vsub.f32 %v2887_v29, %v2907_v59 }
 0x5a6   : > { %v2910_v31 = vpop.xlane.xlu0 %2909 }
 0x5a7   : > { %6965 = vpow2.f32 %v2930_v3  ;;  %v2920_v35 = vsub.f32 %v2888_v51, %v2910_v31  ;;  %v2932_v12 = vmul.f32 1.442695, %v2919_v26 }
 0x5a8   : > { %v2913_v6 = vpop.xlane.xlu1 %2912 }
 0x5a9   : > { %v2934_v57 = vmul.f32 1.442695, %v2920_v35  ;;  %v2921_v14 = vsub.f32 %v2889_v42, %v2913_v6 }
 0x5aa   : > { %v2985_v45 = vpop.permute.xlu0 %2984 }
 0x5ab   : > { %6967 = vpow2.f32 %v2934_v57  ;;  %v2936_v62 = vmul.f32 1.442695, %v2921_v14  ;;  %6148 = vmatprep.subr.bf16.mxu0 %v2985_v45 }
 0x5ac   : > { %6149 = vmatpush3.bf16.msra.mxu0 %v2985_v45  ;;  %v2987_v61 = vpop.permute.xlu1 %2986 }
 0x5ad   : > { %6969 = vpow2.f32 %v2936_v62  ;;  %6150 = vmatprep.subr.bf16.mxu0 %v2987_v61 }
 0x5ae   : > { %6971 = vpow2.f32 %v2932_v12 }
 0x5b0   : > { %6151 = vmatpush3.bf16.msra.mxu0 %v2987_v61 }
 0x5b1   : > { %v7887_v10 = vpop.eup %6965  ;;  %6420 = vmatprep.subr.msk.bf16.mxu0 %vm2390_vm0, %v7682_v50 }
 0x5b2   : > { %v2950_v51 = vsel %vm2529_vm3, %v7887_v10, 0.0 }
 0x5b3   : > { %2951 = vadd.xlane.f32.xlu0 %v2950_v51 }
 0x5b5   : > { %v7893_v29 = vpop.eup %6967 }
 0x5b6   : > { %v2956_v42 = vsel %vm2529_vm3, %v7893_v29, 0.0 }
 0x5b7   : > { %v6970_v0 = vpop.eup %6969  ;;  %2957 = vadd.xlane.f32.xlu1 %v2956_v42 }
 0x5b8   : > { %v2959_v62 = vsel %vm2529_vm3, %v6970_v0, 0.0  ;;  %v6972_v37 = vpop.eup %6971 }
 0x5b9   : > { %v2953_v2 = vsel %vm2529_vm3, %v6972_v37, 0.0 }
 0x5bb   : > { %2960 = vadd.xlane.f32.xlu1 %v2959_v62  ;;  %v3119_v62 = vsel %vm2390_vm0, %v7682_v50, 0 }
 0x5bf   : > { %2954 = vadd.xlane.f32.xlu1 %v2953_v2 }
 0x5c9   : > { %3047 = vrot.lane.b32.xlu0 %v7710_v16, %s7285_s21 }
 0x5d0   : > { %3049 = vrot.lane.b32.xlu1 %v7716_v25, %s7285_s21 }
 0x628   : > { %v2946_v59 = vpop.xlane.xlu0 %2945 }
 0x62c   : > { %v2940_v3 = vpop.xlane.xlu0 %2939  ;;  %v2949_v31 = vpop.xlane.xlu1 %2948 }
 0x62d   : > { %6973 = vrcp.f32 %v2949_v31 }
 0x62e   : > { %6975 = vrcp.f32 %v2940_v3 }
 0x62f   : > { %6977 = vrcp.f32 %v2946_v59 }
 0x630   : > { %v2943_v35 = vpop.xlane.xlu1 %2942 }
 0x631   : > { %6979 = vrcp.f32 %v2943_v35 }
 0x637   : > { %v6974_v6 = vpop.eup %6973 }
 0x638   : > { %v6976_v26 = vpop.eup %6975  ;;  %v2973_v45 = vmul.f32 %v6974_v6, %v6962_v52 }
 0x639   : > { %v6978_v57 = vpop.eup %6977  ;;  %v2970_v61 = vmul.f32 %v6976_v26, %v6960_v38 }
 0x63a   : > { %v2972_v16 = vmul.f32 %v6978_v57, %v7880_v4 }
 0x63b   : > { %v6980_v14 = vpop.eup %6979 }
 0x63c   : > { %v2971_v12 = vmul.f32 %v6980_v14, %v6964_v44  ;;  %v2979_v42 = vpack.c.bf16 %v2973_v45, %v2972_v16  ;;  %v3122_v44 = vsel %vm2390_vm0, %v7686_v58, 0  ;;  %v3180_v16 = vsel %vm2390_vm0, %v7690_v5, 0 }
 0x63e   : > { %v2978_v51 = vpack.c.bf16 %v2971_v12, %v2970_v61 }
 0x640   : > { %v2952_v25 = vpop.xlane.xlu0 %2951  ;;  %6152 = vmatprep.mubr.msk.bf16.mxu0 %vm2529_vm3, %v2978_v51 }
 0x641   : > { %6153 = vmatmul.mubr.msk.bf16.vlgmr.msra.gmra.mrb[60].mxu0 %vm2529_vm3, %v2979_v42 }
 0x642   : > { %6165 = vmatpush3.bf16.xpose.msra.mxu0 %v3119_v62  ;;  %6168 = vmatprep.mubr.msk.bf16.mxu0 %vm2390_vm0, %v7628_v21 }
 0x643   : > { %6421 = vmatprep.subr.msk.bf16.mxu0 %vm2390_vm0, %v7686_v58 }
 0x644   : > { %v3048_v38 = vpop.permute.xlu0 %3047  ;;  %v2958_v52 = vpop.xlane.xlu1 %2957 }
 0x645   : > { %6156 = vmatprep.subr.bf16.mxu1 %v3048_v38 }
 0x646   : > { %6157 = vmatpush3.bf16.msra.mxu1 %v3048_v38 }
 0x648   : > { %v2961_v4 = vpop.xlane.xlu1 %2960 }
 0x649   : > { %6981 = vrcp.f32 %v2961_v4 }
 0x64a   : > { %6167 = vmatpush3.bf16.xpose.msra.mxu0 %v3122_v44  ;;  %6983 = vrcp.f32 %v2952_v25 }
 0x64b   : > { %6180 = vmatprep.subr.bf16.mxu0 %v7700_v47  ;;  %6985 = vrcp.f32 %v2958_v52 }
 0x64c   : > { %v2955_v2 = vpop.xlane.xlu1 %2954 }
 0x64d   : > { %6987 = vrcp.f32 %v2955_v2 }
 0x650   : > { %v3050_v59 = vpop.permute.xlu1 %3049 }
 0x651   : > { %6158 = vmatprep.subr.bf16.mxu1 %v3050_v59  ;;  %6169 = vmatmul.mubr.msk.bf16.vlgmr.msra.gmra.mrb[64].mxu0 %vm2390_vm0, %v7634_v63 }
 0x652   : > { %6159 = vmatpush3.bf16.msra.mxu1 %v3050_v59  ;;  %6181 = vmatpush3.bf16.msra.mxu0 %v7700_v47 }
 0x653   : > { %6422 = vmatprep.subr.msk.bf16.mxu1 %vm2390_vm0, %v7690_v5  ;;  %6182 = vmatprep.subr.bf16.mxu0 %v7706_v9  ;;  %v6982_v3 = vpop.eup %6981 }
 0x654   : > { %v6984_v31 = vpop.eup %6983  ;;  %v2977_v26 = vmul.f32 %v6982_v3, %v6970_v0 }
 0x655   : > { %v6986_v35 = vpop.eup %6985  ;;  %v2974_v57 = vmul.f32 %v6984_v31, %v7887_v10  ;;  %v3183_v10 = vsel %vm2390_vm0, %v7694_v54, 0 }
 0x656   : > { %6183 = vmatpush3.bf16.msra.mxu0 %v7706_v9  ;;  %v2976_v45 = vmul.f32 %v6986_v35, %v7893_v29 }
 0x657   : > { %v6988_v6 = vpop.eup %6987 }
 0x658   : > { %v2975_v14 = vmul.f32 %v6988_v6, %v6972_v37  ;;  %v2981_v12 = vpack.c.bf16 %v2977_v26, %v2976_v45 }
 0x65a   : > { %v2980_v61 = vpack.c.bf16 %v2975_v14, %v2974_v57 }
 0x65c   : > { %6160 = vmatprep.mubr.msk.bf16.mxu1 %vm2529_vm3, %v2980_v61 }
 0x65d   : > { %6161 = vmatmul.mubr.msk.bf16.vlgmr.msra.gmra.mrb[68].mxu1 %vm2529_vm3, %v2981_v12 }
 0x65e   : > { %6173 = vmatpush3.bf16.xpose.msra.mxu1 %v3180_v16  ;;  %6176 = vmatprep.mubr.msk.bf16.mxu1 %vm2390_vm0, %v7638_v11 }
 0x65f   : > { %6423 = vmatprep.subr.msk.bf16.mxu1 %vm2390_vm0, %v7694_v54 }
 0x666   : > { %6175 = vmatpush3.bf16.xpose.msra.mxu1 %v3183_v10 }
 0x667   : > { %6188 = vmatprep.subr.bf16.mxu1 %v7712_v32 }
 0x66d   : > { %6177 = vmatmul.mubr.msk.bf16.vlgmr.msra.gmra.mrb[72].mxu1 %vm2390_vm0, %v7644_v18 }
 0x66e   : > { %6189 = vmatpush3.bf16.msra.mxu1 %v7712_v32 }
 0x66f   : > { %6190 = vmatprep.subr.bf16.mxu1 %v7718_v30 }
 0x672   : > { %6191 = vmatpush3.bf16.msra.mxu1 %v7718_v30 }
 0x714   : > { %v7940_v29 = vpop.f32.mrb[60].mxu0 }
 0x715   : > { %v7942_v0 = vpop.f32.mrb[61].mxu0 }
 0x716   : > { %v7944_v37 = vpop.f32.mrb[62].mxu0 }
 0x717   : > { %v7948_v42 = vpop.f32.mrb[63].mxu0 }
 0x724   : > { %v6170_v62 = vpop.f32.mrb[64].mxu0 }
 0x725   : > { %v3236_v38 = vsel %vm7735_vm1, %v6170_v62, -inf  ;;  %v3158_v52 = vpop.f32.mrb[65].mxu0 }
 0x726   : > { %v6171_v4 = vpop.f32.mrb[66].mxu0  ;;  %v3248_v44 = vsel %vm2529_vm3, %v3236_v38, -inf  ;;  %v3234_v2 = vsel %vm7740_vm2, %v3158_v52, -inf }
 0x727   : > { %3249 = vmax.xlane.f32.xlu0 %v3248_v44  ;;  %v3161_v59 = vpop.f32.mrb[67].mxu0  ;;  %v3242_v35 = vsel %vm2529_vm3, %v3234_v2, -inf  ;;  %v3237_v6 = vsel %vm7744_vm4, %v6171_v4, -inf }
 0x728   : > { %v3235_v3 = vsel %vm7750_vm5, %v3161_v59, -inf  ;;  %v3251_v26 = vsel %vm2529_vm3, %v3237_v6, -inf }
 0x729   : > { %v3245_v31 = vsel %vm2529_vm3, %v3235_v3, -inf }
 0x72a   : > { %3246 = vmax.xlane.f32.xlu1 %v3245_v31 }
 0x72b   : > { %3243 = vmax.xlane.f32.xlu0 %v3242_v35 }
 0x72f   : > { %3252 = vmax.xlane.f32.xlu0 %v3251_v26 }
 0x730   : > { %v7964_v57 = vpop.f32.mrb[68].mxu1 }
 0x731   : > { %v7966_v14 = vpop.f32.mrb[69].mxu1 }
 0x732   : > { %v7968_v45 = vpop.f32.mrb[70].mxu1 }
 0x733   : > { %v7972_v12 = vpop.f32.mrb[71].mxu1 }
 0x740   : > { %v6178_v10 = vpop.f32.mrb[72].mxu1 }
 0x741   : > { %v3219_v62 = vpop.f32.mrb[73].mxu1  ;;  %v3240_v35 = vsel %vm7735_vm1, %v6178_v10, -inf }
 0x742   : > { %v3238_v52 = vsel %vm7740_vm2, %v3219_v62, -inf  ;;  %v6179_v4 = vpop.f32.mrb[74].mxu1  ;;  %v3260_v19 = vsel %vm2529_vm3, %v3240_v35, -inf }
 0x743   : > { %v3241_v44 = vsel %vm7744_vm4, %v6179_v4, -inf  ;;  %v3222_v59 = vpop.f32.mrb[75].mxu1  ;;  %v3254_v31 = vsel %vm2529_vm3, %v3238_v52, -inf }
 0x744   : > { %3255 = vmax.xlane.f32.xlu0 %v3254_v31  ;;  %v3263_v26 = vsel %vm2529_vm3, %v3241_v44, -inf  ;;  %v3239_v17 = vsel %vm7750_vm5, %v3222_v59, -inf }
 0x745   : > { %3264 = vmax.xlane.f32.xlu1 %v3263_v26  ;;  %v3257_v62 = vsel %vm2529_vm3, %v3239_v17, -inf }
 0x748   : > { %3261 = vmax.xlane.f32.xlu0 %v3260_v19 }
 0x749   : > { %3258 = vmax.xlane.f32.xlu1 %v3257_v62 }
 0x75a   : > { %3458 = vrot.lane.b32.xlu1 %v7686_v58, %s7285_s21 }
 0x7b4   : > { %v3250_v4 = vpop.xlane.xlu0 %3249 }
 0x7b5   : > { %v3268_v61 = vsub.f32 %v3236_v38, %v3250_v4 }
 0x7b7   : > { %v3278_v16 = vmul.f32 1.442695, %v3268_v61  ;;  %v3247_v10 = vpop.xlane.xlu1 %3246 }
 0x7b8   : > { %v3244_v31 = vpop.xlane.xlu0 %3243  ;;  %v3267_v25 = vsub.f32 %v3235_v3, %v3247_v10 }
 0x7b9   : > { %6989 = vpow2.f32 %v3278_v16  ;;  %v3266_v51 = vsub.f32 %v3234_v2, %v3244_v31 }
 0x7ba   : > { %v3276_v7 = vmul.f32 1.442695, %v3267_v25 }
 0x7bb   : > { %v3274_v28 = vmul.f32 1.442695, %v3266_v51 }
 0x7bc   : > { %v3253_v59 = vpop.xlane.xlu0 %3252 }
 0x7bd   : > { %6991 = vpow2.f32 %v3274_v28  ;;  %v3269_v26 = vsub.f32 %v3237_v6, %v3253_v59 }
 0x7bf   : > { %v3280_v19 = vmul.f32 1.442695, %v3269_v26 }
 0x7c1   : > { %6993 = vpow2.f32 %v3280_v19 }
 0x7c2   : > { %6995 = vpow2.f32 %v3276_v7 }
 0x7c3   : > { %v7990_v60 = vpop.eup %6989 }
 0x7c4   : > { %v3296_v58 = vsel %vm2529_vm3, %v7990_v60, 0.0 }
 0x7c5   : > { %3297 = vadd.xlane.f32.xlu0 %v3296_v58 }
 0x7c7   : > { %v6992_v38 = vpop.eup %6991 }
 0x7c8   : > { %v3290_v61 = vsel %vm2529_vm3, %v6992_v38, 0.0 }
 0x7c9   : > { %3291 = vadd.xlane.f32.xlu0 %v3290_v61 }
 0x7cb   : > { %v6994_v2 = vpop.eup %6993 }
 0x7cc   : > { %v3299_v51 = vsel %vm2529_vm3, %v6994_v2, 0.0  ;;  %v6996_v3 = vpop.eup %6995 }
 0x7cd   : > { %3300 = vadd.xlane.f32.xlu1 %v3299_v51  ;;  %v3293_v28 = vsel %vm2529_vm3, %v6996_v3, 0.0 }
 0x7d1   : > { %3294 = vadd.xlane.f32.xlu1 %v3293_v28  ;;  %v3256_v25 = vpop.xlane.xlu0 %3255 }
 0x7d2   : > { %v3265_v16 = vpop.xlane.xlu1 %3264  ;;  %v3270_v62 = vsub.f32 %v3238_v52, %v3256_v25 }
 0x7d3   : > { %v3273_v31 = vsub.f32 %v3241_v44, %v3265_v16 }
 0x7d4   : > { %v3282_v10 = vmul.f32 1.442695, %v3270_v62 }
 0x7d5   : > { %v3262_v7 = vpop.xlane.xlu0 %3261  ;;  %v3288_v26 = vmul.f32 1.442695, %v3273_v31 }
 0x7d6   : > { %v3272_v6 = vsub.f32 %v3240_v35, %v3262_v7  ;;  %v3259_v59 = vpop.xlane.xlu1 %3258 }
 0x7d7   : > { %v3271_v19 = vsub.f32 %v3239_v17, %v3259_v59 }
 0x7d8   : > { %v3286_v4 = vmul.f32 1.442695, %v3272_v6 }
 0x7d9   : > { %v3284_v58 = vmul.f32 1.442695, %v3271_v19 }
 0x7da   : > { %6997 = vpow2.f32 %v3286_v4  ;;  %v3459_v25 = vpop.permute.xlu1 %3458 }
 0x7db   : > { %6999 = vpow2.f32 %v3282_v10 }
 0x7dc   : > { %7001 = vpow2.f32 %v3288_v26 }
 0x7dd   : > { %7003 = vpow2.f32 %v3284_v58 }
 0x7df   : > { %3456 = vrot.lane.b32.xlu0 %v7682_v50, %s7285_s21 }
 0x7e2   : > { %3450 = vrot.lane.b32.xlu1 %v7628_v21, %s7285_s21 }
 0x7e4   : > { %v8001_v61 = vpop.eup %6997 }
 0x7e5   : > { %v3308_v21 = vsel %vm2529_vm3, %v8001_v61, 0.0  ;;  %v7000_v50 = vpop.eup %6999 }
 0x7e6   : > { %v3302_v52 = vsel %vm2529_vm3, %v7000_v50, 0.0  ;;  %v7002_v35 = vpop.eup %7001 }
 0x7e7   : > { %v3311_v44 = vsel %vm2529_vm3, %v7002_v35, 0.0  ;;  %v7004_v51 = vpop.eup %7003 }
 0x7e8   : > { %v3305_v17 = vsel %vm2529_vm3, %v7004_v51, 0.0 }
 0x7fe   : > { %3309 = vadd.xlane.f32.xlu0 %v3308_v21 }
 0x802   : > { %3303 = vadd.xlane.f32.xlu0 %v3302_v52 }
 0x806   : > { %3312 = vadd.xlane.f32.xlu1 %v3311_v44 }
 0x80a   : > { %3306 = vadd.xlane.f32.xlu1 %v3305_v17 }
 0x818   : > { %3529 = vrot.lane.b32.xlu0 %v7690_v5, %s7285_s21 }
 0x81b   : > { %3452 = vrot.lane.b32.xlu1 %v7634_v63, %s7285_s21 }
 0x81c   : > { %3523 = vrot.lane.b32.xlu0 %v7638_v11, %s7285_s21 }
 0x81f   : > { %3531 = vrot.lane.b32.xlu1 %v7694_v54, %s7285_s21 }
 0x823   : > { %3525 = vrot.lane.b32.xlu1 %v7644_v18, %s7285_s21 }
 0x852   : > { %v3298_v28 = vpop.xlane.xlu0 %3297 }
 0x856   : > { %v3292_v7 = vpop.xlane.xlu0 %3291 }
 0x85a   : > { %v3457_v6 = vpop.permute.xlu0 %3456  ;;  %v3301_v16 = vpop.xlane.xlu1 %3300 }
 0x85b   : > { %6424 = vmatprep.subr.msk.bf16.mxu0 %vm2390_vm0, %v3457_v6  ;;  %7005 = vrcp.f32 %v3301_v16  ;;  %v3467_v19 = vsel %vm2390_vm0, %v3457_v6, 0 }
 0x85c   : > { %7007 = vrcp.f32 %v3292_v7 }
 0x85d   : > { %7009 = vrcp.f32 %v3298_v28 }
 0x85e   : > { %v3295_v63 = vpop.xlane.xlu1 %3294 }
 0x85f   : > { %7011 = vrcp.f32 %v3295_v63 }
 0x862   : > { %v3451_v58 = vpop.permute.xlu1 %3450 }
 0x865   : > { %v7006_v5 = vpop.eup %7005 }
 0x866   : > { %v7008_v11 = vpop.eup %7007  ;;  %v3325_v54 = vmul.f32 %v7006_v5, %v6994_v2  ;;  %v3470_v2 = vsel %vm2390_vm0, %v3459_v25, 0 }
 0x867   : > { %v7010_v62 = vpop.eup %7009  ;;  %v3322_v10 = vmul.f32 %v7008_v11, %v6992_v38 }
 0x868   : > { %v3324_v18 = vmul.f32 %v7010_v62, %v7990_v60 }
 0x869   : > { %v7012_v4 = vpop.eup %7011 }
 0x86a   : > { %v3323_v31 = vmul.f32 %v7012_v4, %v6996_v3  ;;  %v3331_v26 = vpack.c.bf16 %v3325_v54, %v3324_v18 }
 0x86c   : > { %v3330_v59 = vpack.c.bf16 %v3323_v31, %v3322_v10 }
 0x86e   : > { %6184 = vmatprep.mubr.msk.bf16.mxu0 %vm2529_vm3, %v3330_v59 }
 0x86f   : > { %6185 = vmatmul.mubr.msk.bf16.vlgmr.msra.gmra.mrb[68].mxu0 %vm2529_vm3, %v3331_v26 }
 0x870   : > { %6197 = vmatpush3.bf16.xpose.msra.mxu0 %v3467_v19  ;;  %6200 = vmatprep.mubr.msk.bf16.mxu0 %vm2390_vm0, %v3451_v58 }
 0x871   : > { %6425 = vmatprep.subr.msk.bf16.mxu0 %vm2390_vm0, %v3459_v25 }
 0x878   : > { %6199 = vmatpush3.bf16.xpose.msra.mxu0 %v3470_v2 }
 0x88b   : > { %v3310_v38 = vpop.xlane.xlu0 %3309 }
 0x88f   : > { %v3304_v3 = vpop.xlane.xlu0 %3303 }
 0x893   : > { %v3530_v60 = vpop.permute.xlu0 %3529  ;;  %v3313_v21 = vpop.xlane.xlu1 %3312 }
 0x894   : > { %6426 = vmatprep.subr.msk.bf16.mxu1 %vm2390_vm0, %v3530_v60  ;;  %7013 = vrcp.f32 %v3313_v21  ;;  %v3540_v4 = vsel %vm2390_vm0, %v3530_v60, 0 }
 0x895   : > { %7015 = vrcp.f32 %v3304_v3 }
 0x896   : > { %7017 = vrcp.f32 %v3310_v38 }
 0x897   : > { %v3307_v52 = vpop.xlane.xlu1 %3306  ;;  %v3524_v54 = vpop.permute.xlu0 %3523 }
 0x898   : > { %7019 = vrcp.f32 %v3307_v52 }
 0x89b   : > { %v3453_v44 = vpop.permute.xlu1 %3452 }
 0x89c   : > { %6201 = vmatmul.mubr.msk.bf16.vlgmr.msra.gmra.mrb[72].mxu0 %vm2390_vm0, %v3453_v44 }
 0x89e   : > { %v7014_v17 = vpop.eup %7013 }
 0x89f   : > { %v7016_v28 = vpop.eup %7015  ;;  %v3329_v25 = vmul.f32 %v7014_v17, %v7002_v35  ;;  %v3532_v10 = vpop.permute.xlu1 %3531 }
 0x8a0   : > { %v7018_v7 = vpop.eup %7017  ;;  %v3326_v16 = vmul.f32 %v7016_v28, %v7000_v50  ;;  %v3543_v50 = vsel %vm2390_vm0, %v3532_v10, 0 }
 0x8a1   : > { %v3328_v5 = vmul.f32 %v7018_v7, %v8001_v61 }
 0x8a2   : > { %v7020_v6 = vpop.eup %7019 }
 0x8a3   : > { %v3327_v63 = vmul.f32 %v7020_v6, %v7004_v51  ;;  %v3333_v62 = vpack.c.bf16 %v3329_v25, %v3328_v5  ;;  %v3526_v35 = vpop.permute.xlu1 %3525 }
 0x8a5   : > { %v3332_v11 = vpack.c.bf16 %v3327_v63, %v3326_v16 }
 0x8a7   : > { %6192 = vmatprep.mubr.msk.bf16.mxu1 %vm2529_vm3, %v3332_v11 }
 0x8a8   : > { %6193 = vmatmul.mubr.msk.bf16.vlgmr.msra.gmra.mrb[76].mxu1 %vm2529_vm3, %v3333_v62 }
 0x8a9   : > { %6205 = vmatpush3.bf16.xpose.msra.mxu1 %v3540_v4  ;;  %6208 = vmatprep.mubr.msk.bf16.mxu1 %vm2390_vm0, %v3524_v54 }
 0x8aa   : > { %6427 = vmatprep.subr.msk.bf16.mxu1 %vm2390_vm0, %v3532_v10 }
 0x8b1   : > { %6207 = vmatpush3.bf16.xpose.msra.mxu1 %v3543_v50 }
 0x8b8   : > { %6209 = vmatmul.mubr.msk.bf16.vlgmr.msra.gmra.mrb[80].mxu1 %vm2390_vm0, %v3526_v35 }
 0x942   : > { %v8036_v61 = vpop.f32.mrb[68].mxu0 }
 0x943   : > { %v8038_v51 = vpop.f32.mrb[69].mxu0 }
 0x944   : > { %v8040_v31 = vpop.f32.mrb[70].mxu0 }
 0x945   : > { %v8044_v59 = vpop.f32.mrb[71].mxu0 }
 0x96f   : > { %v6202_v19 = vpop.f32.mrb[72].mxu0 }
 0x970   : > { %v3506_v58 = vpop.f32.mrb[73].mxu0  ;;  %v3596_v21 = vsel %vm7735_vm1, %v6202_v19, -inf }
 0x971   : > { %v3594_v2 = vsel %vm7740_vm2, %v3506_v58, -inf  ;;  %v6203_v38 = vpop.f32.mrb[74].mxu0  ;;  %v3608_v17 = vsel %vm2529_vm3, %v3596_v21, -inf }
 0x972   : > { %v3509_v3 = vpop.f32.mrb[75].mxu0  ;;  %v3602_v60 = vsel %vm2529_vm3, %v3594_v2, -inf  ;;  %v3597_v28 = vsel %vm7744_vm4, %v6203_v38, -inf }
 0x973   : > { %v3595_v52 = vsel %vm7750_vm5, %v3509_v3, -inf  ;;  %3603 = vmax.xlane.f32.xlu0 %v3602_v60  ;;  %v3611_v7 = vsel %vm2529_vm3, %v3597_v28, -inf }
 0x974   : > { %v3605_v44 = vsel %vm2529_vm3, %v3595_v52, -inf }
 0x975   : > { %3606 = vmax.xlane.f32.xlu1 %v3605_v44 }
 0x977   : > { %3609 = vmax.xlane.f32.xlu0 %v3608_v17 }
 0x97b   : > { %v8060_v6 = vpop.f32.mrb[76].mxu1  ;;  %3612 = vmax.xlane.f32.xlu0 %v3611_v7 }
 0x97c   : > { %8586 = vst [vmem:[#allocation17_spill] sm:$0xff] %v8060_v6  ;;  %v8062_v25 = vpop.f32.mrb[77].mxu1 }
 0x97d   : > { %v8064_v16 = vpop.f32.mrb[78].mxu1 }
 0x97e   : > { %8587 = vst [vmem:[#allocation18_spill] sm:$0xff] %v8064_v16  ;;  %v8068_v5 = vpop.f32.mrb[79].mxu1 }
 0x98b   : > { %v6210_v62 = vpop.f32.mrb[80].mxu1 }
 0x98c   : > { %v3579_v4 = vpop.f32.mrb[81].mxu1  ;;  %v3600_v19 = vsel %vm7735_vm1, %v6210_v62, -inf }
 0x98d   : > { %v3598_v54 = vsel %vm7740_vm2, %v3579_v4, -inf  ;;  %v6211_v10 = vpop.f32.mrb[82].mxu1  ;;  %v3620_v60 = vsel %vm2529_vm3, %v3600_v19, -inf }
 0x98e   : > { %v3582_v50 = vpop.f32.mrb[83].mxu1  ;;  %v3614_v35 = vsel %vm2529_vm3, %v3598_v54, -inf  ;;  %v3601_v3 = vsel %vm7744_vm4, %v6211_v10, -inf }
 0x98f   : > { %v3599_v58 = vsel %vm7750_vm5, %v3582_v50, -inf  ;;  %3615 = vmax.xlane.f32.xlu0 %v3614_v35  ;;  %v3623_v44 = vsel %vm2529_vm3, %v3601_v3, -inf }
 0x990   : > { %v3617_v38 = vsel %vm2529_vm3, %v3599_v58, -inf }
 0x991   : > { %3618 = vmax.xlane.f32.xlu1 %v3617_v38 }
 0x993   : > { %3621 = vmax.xlane.f32.xlu0 %v3620_v60 }
 0x995   : > { %3624 = vmax.xlane.f32.xlu1 %v3623_v44 }
 0x9a6   : > { %3698 = vrot.lane.b32.xlu1 %v7706_v9, %s7285_s21 }
 0x9a9   : > { %3696 = vrot.lane.b32.xlu0 %v7700_v47, %s7285_s21 }
 0xa00   : > { %v3604_v17 = vpop.xlane.xlu0 %3603 }
 0xa01   : > { %v3626_v7 = vsub.f32 %v3594_v2, %v3604_v17 }
 0xa02   : > { %v3607_v62 = vpop.xlane.xlu1 %3606 }
 0xa03   : > { %v3634_v35 = vmul.f32 1.442695, %v3626_v7  ;;  %v3627_v10 = vsub.f32 %v3595_v52, %v3607_v62 }
 0xa04   : > { %v3610_v4 = vpop.xlane.xlu0 %3609 }
 0xa05   : > { %v3628_v50 = vsub.f32 %v3596_v21, %v3610_v4  ;;  %v3636_v11 = vmul.f32 1.442695, %v3627_v10 }
 0xa07   : > { %v3638_v38 = vmul.f32 1.442695, %v3628_v50 }
 0xa08   : > { %v3613_v63 = vpop.xlane.xlu0 %3612 }
 0xa09   : > { %7021 = vpow2.f32 %v3638_v38  ;;  %v3629_v60 = vsub.f32 %v3597_v28, %v3613_v63 }
 0xa0a   : > { %7023 = vpow2.f32 %v3634_v35 }
 0xa0b   : > { %v3640_v44 = vmul.f32 1.442695, %v3629_v60 }
 0xa0d   : > { %7025 = vpow2.f32 %v3640_v44 }
 0xa0e   : > { %7027 = vpow2.f32 %v3636_v11 }
 0xa13   : > { %v8088_v9 = vpop.eup %7021 }
 0xa14   : > { %v3656_v47 = vsel %vm2529_vm3, %v8088_v9, 0.0  ;;  %v7024_v2 = vpop.eup %7023 }
 0xa15   : > { %3657 = vadd.xlane.f32.xlu0 %v3656_v47  ;;  %v3650_v21 = vsel %vm2529_vm3, %v7024_v2, 0.0 }
 0xa17   : > { %v7026_v17 = vpop.eup %7025 }
 0xa18   : > { %v3659_v52 = vsel %vm2529_vm3, %v7026_v17, 0.0  ;;  %v7028_v7 = vpop.eup %7027 }
 0xa19   : > { %3651 = vadd.xlane.f32.xlu0 %v3650_v21  ;;  %3660 = vadd.xlane.f32.xlu1 %v3659_v52  ;;  %v3653_v63 = vsel %vm2529_vm3, %v7028_v7, 0.0 }
 0xa1c   : > { %v3616_v28 = vpop.xlane.xlu0 %3615 }
 0xa1d   : > { %v3630_v62 = vsub.f32 %v3598_v54, %v3616_v28  ;;  %3654 = vadd.xlane.f32.xlu1 %v3653_v63 }
 0xa1e   : > { %v3619_v11 = vpop.xlane.xlu1 %3618 }
 0xa1f   : > { %v3642_v4 = vmul.f32 1.442695, %v3630_v62  ;;  %v3631_v38 = vsub.f32 %v3599_v58, %v3619_v11 }
 0xa20   : > { %v3622_v50 = vpop.xlane.xlu0 %3621 }
 0xa21   : > { %7029 = vpow2.f32 %v3642_v4  ;;  %v3632_v35 = vsub.f32 %v3600_v19, %v3622_v50  ;;  %v3644_v52 = vmul.f32 1.442695, %v3631_v38 }
 0xa22   : > { %v3625_v10 = vpop.xlane.xlu1 %3624 }
 0xa23   : > { %v3646_v60 = vmul.f32 1.442695, %v3632_v35  ;;  %v3633_v44 = vsub.f32 %v3601_v3, %v3625_v10 }
 0xa24   : > { %v3697_v47 = vpop.permute.xlu0 %3696 }
 0xa25   : > { %7031 = vpow2.f32 %v3646_v60  ;;  %v3648_v18 = vmul.f32 1.442695, %v3633_v44  ;;  %6212 = vmatprep.subr.bf16.mxu0 %v3697_v47 }
 0xa26   : > { %6213 = vmatpush3.bf16.msra.mxu0 %v3697_v47  ;;  %v3699_v21 = vpop.permute.xlu1 %3698 }
 0xa27   : > { %7033 = vpow2.f32 %v3648_v18  ;;  %6214 = vmatprep.subr.bf16.mxu0 %v3699_v21 }
 0xa28   : > { %7035 = vpow2.f32 %v3644_v52 }
 0xa2a   : > { %6215 = vmatpush3.bf16.msra.mxu0 %v3699_v21 }
 0xa2b   : > { %v8095_v54 = vpop.eup %7029  ;;  %6428 = vmatprep.subr.msk.bf16.mxu0 %vm2390_vm0, %v7684_v53 }
 0xa2c   : > { %v3662_v19 = vsel %vm2529_vm3, %v8095_v54, 0.0 }
 0xa2d   : > { %3663 = vadd.xlane.f32.xlu0 %v3662_v19 }
 0xa2f   : > { %v8101_v58 = vpop.eup %7031 }
 0xa30   : > { %v3668_v3 = vsel %vm2529_vm3, %v8101_v58, 0.0 }
 0xa31   : > { %v7034_v28 = vpop.eup %7033  ;;  %3669 = vadd.xlane.f32.xlu1 %v3668_v3 }
 0xa32   : > { %v3671_v18 = vsel %vm2529_vm3, %v7034_v28, 0.0  ;;  %v7036_v63 = vpop.eup %7035 }
 0xa33   : > { %v3665_v62 = vsel %vm2529_vm3, %v7036_v63, 0.0 }
 0xa35   : > { %3672 = vadd.xlane.f32.xlu1 %v3671_v18  ;;  %v3831_v18 = vsel %vm2390_vm0, %v7684_v53, 0 }
 0xa39   : > { %3666 = vadd.xlane.f32.xlu1 %v3665_v62 }
 0xa43   : > { %3759 = vrot.lane.b32.xlu0 %v7712_v32, %s7285_s21 }
 0xa4a   : > { %3761 = vrot.lane.b32.xlu1 %v7718_v30, %s7285_s21 }
 0xaa2   : > { %v3658_v11 = vpop.xlane.xlu0 %3657 }
 0xaa6   : > { %v3652_v4 = vpop.xlane.xlu0 %3651  ;;  %v3661_v50 = vpop.xlane.xlu1 %3660 }
 0xaa7   : > { %7037 = vrcp.f32 %v3661_v50 }
 0xaa8   : > { %7039 = vrcp.f32 %v3652_v4 }
 0xaa9   : > { %7041 = vrcp.f32 %v3658_v11 }
 0xaaa   : > { %v3655_v35 = vpop.xlane.xlu1 %3654 }
 0xaab   : > { %7043 = vrcp.f32 %v3655_v35 }
 0xab1   : > { %v7038_v10 = vpop.eup %7037 }
 0xab2   : > { %v7040_v38 = vpop.eup %7039  ;;  %v3685_v47 = vmul.f32 %v7038_v10, %v7026_v17 }
 0xab3   : > { %v7042_v60 = vpop.eup %7041  ;;  %v3682_v21 = vmul.f32 %v7040_v38, %v7024_v2 }
 0xab4   : > { %v3684_v32 = vmul.f32 %v7042_v60, %v8088_v9 }
 0xab5   : > { %v7044_v44 = vpop.eup %7043 }
 0xab6   : > { %v3683_v52 = vmul.f32 %v7044_v44, %v7028_v7  ;;  %v3691_v3 = vpack.c.bf16 %v3685_v47, %v3684_v32  ;;  %v3834_v7 = vsel %vm2390_vm0, %v7688_v1, 0  ;;  %v3892_v32 = vsel %vm2390_vm0, %v7692_v8, 0 }
 0xab8   : > { %v3690_v19 = vpack.c.bf16 %v3683_v52, %v3682_v21 }
 0xaba   : > { %v3664_v30 = vpop.xlane.xlu0 %3663  ;;  %6216 = vmatprep.mubr.msk.bf16.mxu0 %vm2529_vm3, %v3690_v19 }
 0xabb   : > { %6217 = vmatmul.mubr.msk.bf16.vlgmr.msra.gmra.mrb[76].mxu0 %vm2529_vm3, %v3691_v3 }
 0xabc   : > { %6229 = vmatpush3.bf16.xpose.msra.mxu0 %v3831_v18  ;;  %6232 = vmatprep.mubr.msk.bf16.mxu0 %vm2390_vm0, %v7646_v48 }
 0xabd   : > { %6429 = vmatprep.subr.msk.bf16.mxu0 %vm2390_vm0, %v7688_v1 }
 0xabe   : > { %v3760_v2 = vpop.permute.xlu0 %3759  ;;  %v3670_v17 = vpop.xlane.xlu1 %3669 }
 0xabf   : > { %6220 = vmatprep.subr.bf16.mxu1 %v3760_v2 }
 0xac0   : > { %6221 = vmatpush3.bf16.msra.mxu1 %v3760_v2 }
 0xac2   : > { %v3673_v9 = vpop.xlane.xlu1 %3672 }
 0xac3   : > { %7045 = vrcp.f32 %v3673_v9 }
 0xac4   : > { %6231 = vmatpush3.bf16.xpose.msra.mxu0 %v3834_v7  ;;  %7047 = vrcp.f32 %v3664_v30 }
 0xac5   : > { %6244 = vmatprep.subr.bf16.mxu0 %v7724_v55  ;;  %7049 = vrcp.f32 %v3670_v17 }
 0xac6   : > { %v3667_v62 = vpop.xlane.xlu1 %3666 }
 0xac7   : > { %7051 = vrcp.f32 %v3667_v62 }
 0xaca   : > { %v3762_v11 = vpop.permute.xlu1 %3761 }
 0xacb   : > { %6222 = vmatprep.subr.bf16.mxu1 %v3762_v11  ;;  %6233 = vmatmul.mubr.msk.bf16.vlgmr.msra.gmra.mrb[80].mxu0 %vm2390_vm0, %v7654_v27 }
 0xacc   : > { %6223 = vmatpush3.bf16.msra.mxu1 %v3762_v11  ;;  %6245 = vmatpush3.bf16.msra.mxu0 %v7724_v55 }
 0xacd   : > { %6430 = vmatprep.subr.msk.bf16.mxu1 %vm2390_vm0, %v7692_v8  ;;  %6246 = vmatprep.subr.bf16.mxu0 %v7722_v46  ;;  %v7046_v4 = vpop.eup %7045 }
 0xace   : > { %v7048_v50 = vpop.eup %7047  ;;  %v3689_v38 = vmul.f32 %v7046_v4, %v7034_v28 }
 0xacf   : > { %v7050_v35 = vpop.eup %7049  ;;  %v3686_v60 = vmul.f32 %v7048_v50, %v8095_v54  ;;  %v3895_v54 = vsel %vm2390_vm0, %v7696_v15, 0 }
 0xad0   : > { %6247 = vmatpush3.bf16.msra.mxu0 %v7722_v46  ;;  %v3688_v47 = vmul.f32 %v7050_v35, %v8101_v58 }
 0xad1   : > { %v7052_v10 = vpop.eup %7051 }
 0xad2   : > { %v3687_v44 = vmul.f32 %v7052_v10, %v7036_v63  ;;  %v3693_v52 = vpack.c.bf16 %v3689_v38, %v3688_v47 }
 0xad4   : > { %v3692_v21 = vpack.c.bf16 %v3687_v44, %v3686_v60 }
 0xad6   : > { %6224 = vmatprep.mubr.msk.bf16.mxu1 %vm2529_vm3, %v3692_v21 }
 0xad7   : > { %6225 = vmatmul.mubr.msk.bf16.vlgmr.msra.gmra.mrb[84].mxu1 %vm2529_vm3, %v3693_v52 }
 0xad8   : > { %6237 = vmatpush3.bf16.xpose.msra.mxu1 %v3892_v32  ;;  %6240 = vmatprep.mubr.msk.bf16.mxu1 %vm2390_vm0, %v7662_v36 }
 0xad9   : > { %6431 = vmatprep.subr.msk.bf16.mxu1 %vm2390_vm0, %v7696_v15 }
 0xae0   : > { %6239 = vmatpush3.bf16.xpose.msra.mxu1 %v3895_v54 }
 0xae1   : > { %6252 = vmatprep.subr.bf16.mxu1 %v7728_v23 }
 0xae7   : > { %6241 = vmatmul.mubr.msk.bf16.vlgmr.msra.gmra.mrb[88].mxu1 %vm2390_vm0, %v7672_v43 }
 0xae8   : > { %6253 = vmatpush3.bf16.msra.mxu1 %v7728_v23 }
 0xae9   : > { %6254 = vmatprep.subr.bf16.mxu1 %v7726_v22 }
 0xaec   : > { %6255 = vmatpush3.bf16.msra.mxu1 %v7726_v22 }
 0xb8e   : > { %v8148_v58 = vpop.f32.mrb[76].mxu0 }
 0xb8f   : > { %v8150_v28 = vpop.f32.mrb[77].mxu0 }
 0xb90   : > { %v8152_v63 = vpop.f32.mrb[78].mxu0 }
 0xb91   : > { %v8156_v3 = vpop.f32.mrb[79].mxu0 }
 0xb9e   : > { %v6234_v18 = vpop.f32.mrb[80].mxu0 }
 0xb9f   : > { %v3948_v2 = vsel %vm7735_vm1, %v6234_v18, -inf  ;;  %v3870_v17 = vpop.f32.mrb[81].mxu0 }
 0xba0   : > { %v6235_v9 = vpop.f32.mrb[82].mxu0  ;;  %v3960_v7 = vsel %vm2529_vm3, %v3948_v2, -inf  ;;  %v3946_v62 = vsel %vm7740_vm2, %v3870_v17, -inf }
 0xba1   : > { %3961 = vmax.xlane.f32.xlu0 %v3960_v7  ;;  %v3873_v11 = vpop.f32.mrb[83].mxu0  ;;  %v3954_v35 = vsel %vm2529_vm3, %v3946_v62, -inf  ;;  %v3949_v10 = vsel %vm7744_vm4, %v6235_v9, -inf }
 0xba2   : > { %v3947_v4 = vsel %vm7750_vm5, %v3873_v11, -inf  ;;  %v3963_v38 = vsel %vm2529_vm3, %v3949_v10, -inf }
 0xba3   : > { %v3957_v50 = vsel %vm2529_vm3, %v3947_v4, -inf }
 0xba4   : > { %3958 = vmax.xlane.f32.xlu1 %v3957_v50 }
 0xba5   : > { %3955 = vmax.xlane.f32.xlu0 %v3954_v35 }
 0xba9   : > { %3964 = vmax.xlane.f32.xlu0 %v3963_v38 }
 0xbaa   : > { %v8172_v60 = vpop.f32.mrb[84].mxu1 }
 0xbab   : > { %v8174_v44 = vpop.f32.mrb[85].mxu1 }
 0xbac   : > { %v8176_v47 = vpop.f32.mrb[86].mxu1 }
 0xbad   : > { %v8180_v52 = vpop.f32.mrb[87].mxu1 }
 0xbba   : > { %v6242_v54 = vpop.f32.mrb[88].mxu1 }
 0xbbb   : > { %v3931_v18 = vpop.f32.mrb[89].mxu1  ;;  %v3952_v35 = vsel %vm7735_vm1, %v6242_v54, -inf }
 0xbbc   : > { %v3950_v17 = vsel %vm7740_vm2, %v3931_v18, -inf  ;;  %v6243_v9 = vpop.f32.mrb[90].mxu1  ;;  %v3972_v21 = vsel %vm2529_vm3, %v3952_v35, -inf }
 0xbbd   : > { %v3953_v7 = vsel %vm7744_vm4, %v6243_v9, -inf  ;;  %v3934_v11 = vpop.f32.mrb[91].mxu1  ;;  %v3966_v50 = vsel %vm2529_vm3, %v3950_v17, -inf }
 0xbbe   : > { %3967 = vmax.xlane.f32.xlu0 %v3966_v50  ;;  %v3975_v38 = vsel %vm2529_vm3, %v3953_v7, -inf  ;;  %v3951_v26 = vsel %vm7750_vm5, %v3934_v11, -inf }
 0xbbf   : > { %3976 = vmax.xlane.f32.xlu1 %v3975_v38  ;;  %v3969_v18 = vsel %vm2529_vm3, %v3951_v26, -inf }
 0xbc2   : > { %3973 = vmax.xlane.f32.xlu0 %v3972_v21 }
 0xbc3   : > { %3970 = vmax.xlane.f32.xlu1 %v3969_v18 }
 0xbd4   : > { %4170 = vrot.lane.b32.xlu1 %v7688_v1, %s7285_s21 }
 0xc2e   : > { %v3962_v9 = vpop.xlane.xlu0 %3961 }
 0xc2f   : > { %v3980_v32 = vsub.f32 %v3948_v2, %v3962_v9 }
 0xc31   : > { %v3990_v19 = vmul.f32 1.442695, %v3980_v32  ;;  %v3959_v54 = vpop.xlane.xlu1 %3958 }
 0xc32   : > { %v3956_v50 = vpop.xlane.xlu0 %3955  ;;  %v3979_v6 = vsub.f32 %v3947_v4, %v3959_v54 }
 0xc33   : > { %7053 = vpow2.f32 %v3990_v19  ;;  %v3978_v30 = vsub.f32 %v3946_v62, %v3956_v50 }
 0xc34   : > { %v3988_v56 = vmul.f32 1.442695, %v3979_v6 }
 0xc35   : > { %v3986_v16 = vmul.f32 1.442695, %v3978_v30 }
 0xc36   : > { %v3965_v11 = vpop.xlane.xlu0 %3964 }
 0xc37   : > { %7055 = vpow2.f32 %v3986_v16  ;;  %v3981_v38 = vsub.f32 %v3949_v10, %v3965_v11 }
 0xc39   : > { %v3992_v21 = vmul.f32 1.442695, %v3981_v38 }
 0xc3b   : > { %7057 = vpow2.f32 %v3992_v21 }
 0xc3c   : > { %7059 = vpow2.f32 %v3988_v56 }
 0xc3d   : > { %v8198_v39 = vpop.eup %7053 }
 0xc3e   : > { %v4008_v1 = vsel %vm2529_vm3, %v8198_v39, 0.0 }
 0xc3f   : > { %4009 = vadd.xlane.f32.xlu0 %v4008_v1 }
 0xc41   : > { %v7056_v2 = vpop.eup %7055 }
 0xc42   : > { %v4002_v32 = vsel %vm2529_vm3, %v7056_v2, 0.0 }
 0xc43   : > { %4003 = vadd.xlane.f32.xlu0 %v4002_v32 }
 0xc45   : > { %v7058_v19 = vpop.eup %7057 }
 0xc46   : > { %v4011_v30 = vsel %vm2529_vm3, %v7058_v19, 0.0  ;;  %v7060_v62 = vpop.eup %7059 }
 0xc47   : > { %4012 = vadd.xlane.f32.xlu1 %v4011_v30  ;;  %v4005_v6 = vsel %vm2529_vm3, %v7060_v62, 0.0 }
 0xc4b   : > { %4006 = vadd.xlane.f32.xlu1 %v4005_v6  ;;  %v3968_v16 = vpop.xlane.xlu0 %3967 }
 0xc4c   : > { %v3977_v10 = vpop.xlane.xlu1 %3976  ;;  %v3982_v18 = vsub.f32 %v3950_v17, %v3968_v16 }
 0xc4d   : > { %v3985_v50 = vsub.f32 %v3953_v7, %v3977_v10 }
 0xc4e   : > { %v3994_v54 = vmul.f32 1.442695, %v3982_v18 }
 0xc4f   : > { %v3974_v56 = vpop.xlane.xlu0 %3973  ;;  %v4000_v38 = vmul.f32 1.442695, %v3985_v50 }
 0xc50   : > { %v3984_v4 = vsub.f32 %v3952_v35, %v3974_v56  ;;  %v3971_v11 = vpop.xlane.xlu1 %3970 }
 0xc51   : > { %v3983_v21 = vsub.f32 %v3951_v26, %v3971_v11 }
 0xc52   : > { %v3998_v9 = vmul.f32 1.442695, %v3984_v4 }
 0xc53   : > { %v3996_v1 = vmul.f32 1.442695, %v3983_v21 }
 0xc54   : > { %7061 = vpow2.f32 %v3998_v9  ;;  %v4171_v16 = vpop.permute.xlu1 %4170 }
 0xc55   : > { %7063 = vpow2.f32 %v3994_v54 }
 0xc56   : > { %7065 = vpow2.f32 %v4000_v38 }
 0xc57   : > { %7067 = vpow2.f32 %v3996_v1 }
 0xc59   : > { %4168 = vrot.lane.b32.xlu0 %v7684_v53, %s7285_s21 }
 0xc5c   : > { %4162 = vrot.lane.b32.xlu1 %v7646_v48, %s7285_s21 }
 0xc5e   : > { %v8209_v32 = vpop.eup %7061 }
 0xc5f   : > { %v4020_v48 = vsel %vm2529_vm3, %v8209_v32, 0.0  ;;  %v7064_v53 = vpop.eup %7063 }
 0xc60   : > { %v4014_v17 = vsel %vm2529_vm3, %v7064_v53, 0.0  ;;  %v7066_v35 = vpop.eup %7065 }
 0xc61   : > { %v4023_v7 = vsel %vm2529_vm3, %v7066_v35, 0.0  ;;  %v7068_v30 = vpop.eup %7067 }
 0xc62   : > { %v4017_v26 = vsel %vm2529_vm3, %v7068_v30, 0.0 }
 0xc78   : > { %4021 = vadd.xlane.f32.xlu0 %v4020_v48 }
 0xc7c   : > { %4015 = vadd.xlane.f32.xlu0 %v4014_v17 }
 0xc80   : > { %4024 = vadd.xlane.f32.xlu1 %v4023_v7 }
 0xc84   : > { %4018 = vadd.xlane.f32.xlu1 %v4017_v26 }
 0xc92   : > { %4241 = vrot.lane.b32.xlu0 %v7692_v8, %s7285_s21 }
 0xc95   : > { %4164 = vrot.lane.b32.xlu1 %v7654_v27, %s7285_s21 }
 0xc96   : > { %4235 = vrot.lane.b32.xlu0 %v7662_v36, %s7285_s21 }
 0xc99   : > { %4243 = vrot.lane.b32.xlu1 %v7696_v15, %s7285_s21 }
 0xc9d   : > { %4237 = vrot.lane.b32.xlu1 %v7672_v43, %s7285_s21 }
 0xccc   : > { %v4010_v6 = vpop.xlane.xlu0 %4009 }
 0xcd0   : > { %v4004_v56 = vpop.xlane.xlu0 %4003 }
 0xcd4   : > { %v4169_v4 = vpop.permute.xlu0 %4168  ;;  %v4013_v10 = vpop.xlane.xlu1 %4012 }
 0xcd5   : > { %6432 = vmatprep.subr.msk.bf16.mxu0 %vm2390_vm0, %v4169_v4  ;;  %7069 = vrcp.f32 %v4013_v10  ;;  %v4179_v21 = vsel %vm2390_vm0, %v4169_v4, 0 }
 0xcd6   : > { %7071 = vrcp.f32 %v4004_v56 }
 0xcd7   : > { %7073 = vrcp.f32 %v4010_v6 }
 0xcd8   : > { %v4007_v27 = vpop.xlane.xlu1 %4006 }
 0xcd9   : > { %7075 = vrcp.f32 %v4007_v27 }
 0xcdc   : > { %v4163_v1 = vpop.permute.xlu1 %4162 }
 0xcdf   : > { %v7070_v8 = vpop.eup %7069 }
 0xce0   : > { %v7072_v36 = vpop.eup %7071  ;;  %v4037_v15 = vmul.f32 %v7070_v8, %v7058_v19  ;;  %v4182_v19 = vsel %vm2390_vm0, %v4171_v16, 0 }
 0xce1   : > { %v7074_v18 = vpop.eup %7073  ;;  %v4034_v54 = vmul.f32 %v7072_v36, %v7056_v2 }
 0xce2   : > { %v4036_v43 = vmul.f32 %v7074_v18, %v8198_v39 }
 0xce3   : > { %v7076_v9 = vpop.eup %7075 }
 0xce4   : > { %v4035_v50 = vmul.f32 %v7076_v9, %v7060_v62  ;;  %v4043_v38 = vpack.c.bf16 %v4037_v15, %v4036_v43 }
 0xce6   : > { %v4042_v11 = vpack.c.bf16 %v4035_v50, %v4034_v54 }
 0xce8   : > { %6248 = vmatprep.mubr.msk.bf16.mxu0 %vm2529_vm3, %v4042_v11 }
 0xce9   : > { %6249 = vmatmul.mubr.msk.bf16.vlgmr.msra.gmra.mrb[84].mxu0 %vm2529_vm3, %v4043_v38 }
 0xcea   : > { %6261 = vmatpush3.bf16.xpose.msra.mxu0 %v4179_v21  ;;  %6264 = vmatprep.mubr.msk.bf16.mxu0 %vm2390_vm0, %v4163_v1 }
 0xceb   : > { %6433 = vmatprep.subr.msk.bf16.mxu0 %vm2390_vm0, %v4171_v16 }
 0xcf2   : > { %6263 = vmatpush3.bf16.xpose.msra.mxu0 %v4182_v19 }
 0xd05   : > { %v4022_v2 = vpop.xlane.xlu0 %4021 }
 0xd09   : > { %v4016_v62 = vpop.xlane.xlu0 %4015 }
 0xd0d   : > { %v4242_v39 = vpop.permute.xlu0 %4241  ;;  %v4025_v48 = vpop.xlane.xlu1 %4024 }
 0xd0e   : > { %6434 = vmatprep.subr.msk.bf16.mxu1 %vm2390_vm0, %v4242_v39  ;;  %7077 = vrcp.f32 %v4025_v48  ;;  %v4252_v9 = vsel %vm2390_vm0, %v4242_v39, 0 }
 0xd0f   : > { %7079 = vrcp.f32 %v4016_v62 }
 0xd10   : > { %7081 = vrcp.f32 %v4022_v2 }
 0xd11   : > { %v4019_v17 = vpop.xlane.xlu1 %4018  ;;  %v4236_v15 = vpop.permute.xlu0 %4235 }
 0xd12   : > { %7083 = vrcp.f32 %v4019_v17 }
 0xd15   : > { %v4165_v7 = vpop.permute.xlu1 %4164 }
 0xd16   : > { %6265 = vmatmul.mubr.msk.bf16.vlgmr.msra.gmra.mrb[88].mxu0 %vm2390_vm0, %v4165_v7 }
 0xd18   : > { %v7078_v26 = vpop.eup %7077 }
 0xd19   : > { %v7080_v6 = vpop.eup %7079  ;;  %v4041_v16 = vmul.f32 %v7078_v26, %v7066_v35  ;;  %v4244_v54 = vpop.permute.xlu1 %4243 }
 0xd1a   : > { %v7082_v56 = vpop.eup %7081  ;;  %v4038_v10 = vmul.f32 %v7080_v6, %v7064_v53  ;;  %v4255_v53 = vsel %vm2390_vm0, %v4244_v54, 0 }
 0xd1b   : > { %v4040_v8 = vmul.f32 %v7082_v56, %v8209_v32 }
 0xd1c   : > { %v7084_v4 = vpop.eup %7083 }
 0xd1d   : > { %v4039_v27 = vmul.f32 %v7084_v4, %v7068_v30  ;;  %v4045_v18 = vpack.c.bf16 %v4041_v16, %v4040_v8  ;;  %v4238_v35 = vpop.permute.xlu1 %4237 }
 0xd1f   : > { %v4044_v36 = vpack.c.bf16 %v4039_v27, %v4038_v10 }
 0xd21   : > { %6256 = vmatprep.mubr.msk.bf16.mxu1 %vm2529_vm3, %v4044_v36 }
 0xd22   : > { %6257 = vmatmul.mubr.msk.bf16.vlgmr.msra.gmra.mrb[92].mxu1 %vm2529_vm3, %v4045_v18 }
 0xd23   : > { %6269 = vmatpush3.bf16.xpose.msra.mxu1 %v4252_v9  ;;  %6272 = vmatprep.mubr.msk.bf16.mxu1 %vm2390_vm0, %v4236_v15 }
 0xd24   : > { %6435 = vmatprep.subr.msk.bf16.mxu1 %vm2390_vm0, %v4244_v54 }
 0xd2b   : > { %6271 = vmatpush3.bf16.xpose.msra.mxu1 %v4255_v53 }
 0xd32   : > { %6273 = vmatmul.mubr.msk.bf16.vlgmr.msra.gmra.mrb[96].mxu1 %vm2390_vm0, %v4238_v35 }
 0xdbc   : > { %v8244_v32 = vpop.f32.mrb[84].mxu0 }
 0xdbd   : > { %v8246_v30 = vpop.f32.mrb[85].mxu0 }
 0xdbe   : > { %v8248_v50 = vpop.f32.mrb[86].mxu0 }
 0xdbf   : > { %v4157_v43 = vpack.c.bf16 %v8248_v50, %v8244_v32  ;;  %v8252_v11 = vpop.f32.mrb[87].mxu0 }
 0xdc0   : > { %v4156_v38 = vpack.c.bf16 %v8252_v11, %v8246_v30 }
 0xde9   : > { %v6266_v21 = vpop.f32.mrb[88].mxu0 }
 0xdea   : > { %v4218_v1 = vpop.f32.mrb[89].mxu0  ;;  %v4308_v48 = vsel %vm7735_vm1, %v6266_v21, -inf }
 0xdeb   : > { %v4306_v19 = vsel %vm7740_vm2, %v4218_v1, -inf  ;;  %v6267_v2 = vpop.f32.mrb[90].mxu0  ;;  %v4320_v26 = vsel %vm2529_vm3, %v4308_v48, -inf }
 0xdec   : > { %v4314_v62 = vsel %vm2529_vm3, %v4306_v19, -inf  ;;  %v4221_v39 = vpop.f32.mrb[91].mxu0  ;;  %v4309_v6 = vsel %vm7744_vm4, %v6267_v2, -inf }
 0xded   : > { %v4307_v17 = vsel %vm7750_vm5, %v4221_v39, -inf  ;;  %4315 = vmax.xlane.f32.xlu0 %v4314_v62  ;;  %v4323_v56 = vsel %vm2529_vm3, %v4309_v6, -inf }
 0xdee   : > { %v4317_v7 = vsel %vm2529_vm3, %v4307_v17, -inf }
 0xdef   : > { %4318 = vmax.xlane.f32.xlu1 %v4317_v7 }
 0xdf1   : > { %4321 = vmax.xlane.f32.xlu0 %v4320_v26 }
 0xdf5   : > { %v8268_v4 = vpop.f32.mrb[92].mxu1  ;;  %4324 = vmax.xlane.f32.xlu0 %v4323_v56 }
 0xdf6   : > { %v8270_v16 = vpop.f32.mrb[93].mxu1 }
 0xdf7   : > { %v8272_v10 = vpop.f32.mrb[94].mxu1 }
 0xdf8   : > { %v8276_v8 = vpop.f32.mrb[95].mxu1  ;;  %v8611_v32 = vpack.c.bf16 %v8272_v10, %v8268_v4 }
 0xdf9   : > { %v4158_v36 = vpack.c.bf16 %v8276_v8, %v8270_v16  ;;  %v4716_v16 = vld [vmem:[%s8548_s3] sm:$0x7] }
 0xe05   : > { %v6274_v18 = vpop.f32.mrb[96].mxu1 }
 0xe06   : > { %v4291_v9 = vpop.f32.mrb[97].mxu1  ;;  %v4312_v21 = vsel %vm7735_vm1, %v6274_v18, -inf }
 0xe07   : > { %v4310_v15 = vsel %vm7740_vm2, %v4291_v9, -inf  ;;  %v6275_v54 = vpop.f32.mrb[98].mxu1  ;;  %v4332_v40 = vsel %vm2529_vm3, %v4312_v21, -inf }
 0xe08   : > { %v4326_v53 = vsel %vm2529_vm3, %v4310_v15, -inf  ;;  %v4294_v35 = vpop.f32.mrb[99].mxu1  ;;  %v4313_v62 = vsel %vm7744_vm4, %v6275_v54, -inf }
 0xe09   : > { %v4311_v1 = vsel %vm7750_vm5, %v4294_v35, -inf  ;;  %4327 = vmax.xlane.f32.xlu0 %v4326_v53  ;;  %v4335_v39 = vsel %vm2529_vm3, %v4313_v62, -inf }
 0xe0a   : > { %v4329_v2 = vsel %vm2529_vm3, %v4311_v1, -inf }
 0xe0b   : > { %4330 = vmax.xlane.f32.xlu1 %v4329_v2 }
 0xe0d   : > { %4333 = vmax.xlane.f32.xlu0 %v4332_v40 }
 0xe0f   : > { %4336 = vmax.xlane.f32.xlu1 %v4335_v39 }
 0xe7a   : > { %v4316_v7 = vpop.xlane.xlu0 %4315 }
 0xe7b   : > { %v4338_v26 = vsub.f32 %v4306_v19, %v4316_v7 }
 0xe7c   : > { %v4319_v33 = vpop.xlane.xlu1 %4318 }
 0xe7d   : > { %v4346_v34 = vmul.f32 1.442695, %v4338_v26  ;;  %v4339_v9 = vsub.f32 %v4307_v17, %v4319_v33 }
 0xe7e   : > { %v4322_v56 = vpop.xlane.xlu0 %4321 }
 0xe7f   : > { %v4340_v18 = vsub.f32 %v4308_v48, %v4322_v56  ;;  %v4348_v20 = vmul.f32 1.442695, %v4339_v9 }
 0xe81   : > { %v4350_v53 = vmul.f32 1.442695, %v4340_v18 }
 0xe82   : > { %v4325_v35 = vpop.xlane.xlu0 %4324 }
 0xe83   : > { %7085 = vpow2.f32 %v4350_v53  ;;  %v4341_v27 = vsub.f32 %v4309_v6, %v4325_v35 }
 0xe84   : > { %7087 = vpow2.f32 %v4346_v34 }
 0xe85   : > { %v4352_v54 = vmul.f32 1.442695, %v4341_v27 }
 0xe87   : > { %7089 = vpow2.f32 %v4352_v54 }
 0xe88   : > { %7091 = vpow2.f32 %v4348_v20 }
 0xe8d   : > { %v8292_v2 = vpop.eup %7085 }
 0xe8e   : > { %v4368_v40 = vsel %vm2529_vm3, %v8292_v2, 0.0  ;;  %v7088_v19 = vpop.eup %7087 }
 0xe8f   : > { %4369 = vadd.xlane.f32.xlu0 %v4368_v40  ;;  %v4362_v48 = vsel %vm2529_vm3, %v7088_v19, 0.0 }
 0xe91   : > { %v8296_v39 = vpop.eup %7089 }
 0xe92   : > { %v4371_v17 = vsel %vm2529_vm3, %v8296_v39, 0.0  ;;  %v7092_v6 = vpop.eup %7091 }
 0xe93   : > { %4363 = vadd.xlane.f32.xlu0 %v4362_v48  ;;  %4372 = vadd.xlane.f32.xlu1 %v4371_v17  ;;  %v4365_v7 = vsel %vm2529_vm3, %v7092_v6, 0.0  ;;  %v8588_v17 = vpack.c.bf16 %v8156_v3, %v8150_v28  ;;  %v8593_v3 = vpack.c.bf16 %v7944_v37, %v7940_v29 }
 0xe96   : > { %v4328_v27 = vpop.xlane.xlu0 %4327 }
 0xe97   : > { %4366 = vadd.xlane.f32.xlu1 %v4365_v7  ;;  %v4342_v26 = vsub.f32 %v4310_v15, %v4328_v27  ;;  %v8589_v27 = vpack.c.bf16 %v8152_v63, %v8148_v58  ;;  %v8591_v58 = vpack.c.bf16 %v8176_v47, %v8172_v60  ;;  %v8592_v63 = vpack.c.bf16 %v7948_v42, %v7942_v0 }
 0xe98   : > { %v8595_v60 = vpack.c.bf16 %v7968_v45, %v7964_v57 }
 0xe99   : > { %v4354_v18 = vmul.f32 1.442695, %v4342_v26 }
 0xe9a   : > { %v4334_v33 = vpop.xlane.xlu0 %4333 }
 0xe9b   : > { %v4344_v56 = vsub.f32 %v4312_v21, %v4334_v33  ;;  %v4331_v21 = vpop.xlane.xlu1 %4330 }
 0xe9c   : > { %v4343_v40 = vsub.f32 %v4311_v1, %v4331_v21 }
 0xe9d   : > { %v4358_v34 = vmul.f32 1.442695, %v4344_v56 }
 0xe9e   : > { %v4356_v48 = vmul.f32 1.442695, %v4343_v40 }
 0xe9f   : > { %7093 = vpow2.f32 %v4358_v34  ;;  %v4337_v20 = vpop.xlane.xlu1 %4336 }
 0xea0   : > { %7095 = vpow2.f32 %v4354_v18  ;;  %v4345_v54 = vsub.f32 %v4313_v62, %v4337_v20  ;;  %v6834_v20 = vld [vmem:[#allocation7 + $0x1c] ss:$12 sps:$4 sm:$0xff]  }
 0xea8   : > { %4410 = vrot.lane.b32.xlu1 %v7722_v46, %s7285_s21  ;;  %v4360_v46 = vmul.f32 1.442695, %v4345_v54  ;;  %v8596_v54 = vpack.c.bf16 %v8044_v59, %v8038_v51  ;;  %v6846_v51 = vld [vmem:[#allocation7 + $0x7c] ss:$12 sps:$4 sm:$0xff]   ;;  %v6844_v59 = vld [vmem:[#allocation7 + $0x78] ss:$12 sps:$4 sm:$0xff]  }
 0xea9   : > { %v8304_v9 = vpop.eup %7093 }
 0xeaa   : > { %v4380_v53 = vsel %vm2529_vm3, %v8304_v9, 0.0  ;;  %v8308_v35 = vpop.eup %7095  ;;  %7097 = vpow2.f32 %v4360_v46  ;;  %v6835_v46 = vld [vmem:[#allocation7 + $0x30] ss:$12 sps:$4 sm:$0xff]  }
 0xeab   : > { %4381 = vadd.xlane.f32.xlu0 %v4380_v53  ;;  %v4374_v15 = vsel %vm2529_vm3, %v8308_v35, 0.0  ;;  %7099 = vpow2.f32 %v4356_v48  ;;  %v6831_v53 = vld [vmem:[#allocation7 + $0x4] ss:$12 sps:$4 sm:$0xff]   ;;  %v6840_v48 = vld [vmem:[#allocation7 + $0x4c] ss:$12 sps:$4 sm:$0xff]  }
 0xeac   : > { %4471 = vrot.lane.b32.xlu1 %v7728_v23, %s7285_s21 }
 0xeaf   : > { %4375 = vadd.xlane.f32.xlu0 %v4374_v15 }
 0xeb4   : > { %v8320_v23 = vpop.eup %7097 }
 0xeb5   : > { %v4383_v1 = vsel %vm2529_vm3, %v8320_v23, 0.0  ;;  %v8328_v62 = vpop.eup %7099 }
 0xeb6   : > { %v4377_v28 = vsel %vm2529_vm3, %v8328_v62, 0.0 }
 0xec5   : > { %4408 = vrot.lane.b32.xlu0 %v7724_v55, %s7285_s21  ;;  %v8590_v55 = vpack.c.bf16 %v8180_v52, %v8174_v44  ;;  %v8594_v44 = vpack.c.bf16 %v7972_v12, %v7966_v14 }
 0xec9   : > { %4552 = vrot.lane.b32.xlu0 %v8588_v17, %s7285_s21  ;;  %v6838_v17 = vld [vmem:[#allocation7 + $0x48] ss:$12 sps:$4 sm:$0xff]  }
 0xecd   : > { %4554 = vrot.lane.b32.xlu0 %v8589_v27, %s7285_s21  ;;  %v6843_v27 = vld [vmem:[#allocation7 + $0x64] ss:$12 sps:$4 sm:$0xff]  }
 0xed0   : > { %4384 = vadd.xlane.f32.xlu1 %v4383_v1  ;;  %v6841_v1 = vld [vmem:[#allocation7 + $0x60] ss:$12 sps:$4 sm:$0xff]  }
 0xed1   : > { %4556 = vrot.lane.b32.xlu0 %v8590_v55, %s7285_s21  ;;  %v6849_v55 = vld [vmem:[#allocation7 + $0x94] ss:$12 sps:$4 sm:$0xff]  }
 0xed4   : > { %4378 = vadd.xlane.f32.xlu1 %v4377_v28 }
 0xed5   : > { %4558 = vrot.lane.b32.xlu0 %v8591_v58, %s7285_s21  ;;  %v6847_v58 = vld [vmem:[#allocation7 + $0x90] ss:$12 sps:$4 sm:$0xff]  }
 0xee5   : > { %4473 = vrot.lane.b32.xlu1 %v7726_v22, %s7285_s21 }
 0xee9   : > { %4540 = vrot.lane.b32.xlu1 %v8592_v63, %s7285_s21  ;;  %v6852_v63 = vld [vmem:[#allocation7 + $0xac] ss:$12 sps:$4 sm:$0xff]  }
 0xeed   : > { %4542 = vrot.lane.b32.xlu1 %v8593_v3, %s7285_s21 }
 0xef1   : > { %4544 = vrot.lane.b32.xlu1 %v8594_v44, %s7285_s21  ;;  %v6850_v44 = vld [vmem:[#allocation7 + $0xa8] ss:$12 sps:$4 sm:$0xff]  }
 0xef5   : > { %4546 = vrot.lane.b32.xlu1 %v8595_v60, %s7285_s21  ;;  %v6855_v60 = vld [vmem:[#allocation7 + $0xc4] ss:$12 sps:$4 sm:$0xff]  }
 0xf1c   : > { %v4370_v22 = vpop.xlane.xlu0 %4369 }
 0xf20   : > { %v4364_v47 = vpop.xlane.xlu0 %4363  ;;  %v4373_v52 = vpop.xlane.xlu1 %4372 }
 0xf21   : > { %7101 = vrcp.f32 %v4364_v47 }
 0xf24   : > { %v4367_v0 = vpop.xlane.xlu1 %4366 }
 0xf25   : > { %7103 = vrcp.f32 %v4367_v0  ;;  %v6858_v0 = vld [vmem:[#allocation7 + $0xdc] ss:$12 sps:$4 sm:$0xff]  }
 0xf26   : > { %7105 = vrcp.f32 %v4373_v52  ;;  %v6853_v52 = vld [vmem:[#allocation7 + $0xc0] ss:$12 sps:$4 sm:$0xff]  }
 0xf27   : > { %7107 = vrcp.f32 %v4370_v22  ;;  %v6862_v22 = vld [vmem:[#allocation7 + $0xc8] ss:$12 sps:$4 sm:$0xff]  }
 0xf28   : > { %v4411_v42 = vpop.permute.xlu1 %4410 }
 0xf2b   : > { %v7102_v29 = vpop.eup %7101 }
 0xf2c   : > { %v4472_v7 = vpop.permute.xlu1 %4471  ;;  %v4394_v26 = vmul.f32 %v7102_v29, %v7088_v19  ;;  %v6856_v29 = vld [vmem:[#allocation7 + $0xd8] ss:$12 sps:$4 sm:$0xff]  }
 0xf2d   : > { %6284 = vmatprep.subr.bf16.mxu1 %v4472_v7 }
 0xf2e   : > { %6285 = vmatpush3.bf16.msra.mxu1 %v4472_v7 }
 0xf2f   : > { %v7104_v37 = vpop.eup %7103 }
 0xf30   : > { %v4395_v14 = vmul.f32 %v7104_v37, %v7092_v6  ;;  %v7106_v33 = vpop.eup %7105  ;;  %v6829_v6 = vld [vmem:[#allocation7] ss:$12 sps:$4 sm:$0xff]  }
 0xf31   : > { %v7108_v18 = vpop.eup %7107  ;;  %v4397_v34 = vmul.f32 %v7106_v33, %v8296_v39  ;;  %v6832_v39 = vld [vmem:[#allocation7 + $0x18] ss:$12 sps:$4 sm:$0xff]  }
 0xf32   : > { %v4402_v12 = vpack.c.bf16 %v4395_v14, %v4394_v26  ;;  %v4396_v15 = vmul.f32 %v7108_v18, %v8292_v2  ;;  %v6837_v2 = vld [vmem:[#allocation7 + $0x34] ss:$12 sps:$4 sm:$0xff]  }
 0xf33   : > { %v6861_v26 = vld [vmem:[#allocation7 + $0xf4] ss:$12 sps:$4 sm:$0xff]  }
 0xf34   : > { %6280 = vmatprep.mubr.msk.bf16.mxu0 %vm2529_vm3, %v4402_v12  ;;  %v4403_v21 = vpack.c.bf16 %v4397_v34, %v4396_v15  ;;  %v6863_v34 = vld [vmem:[#allocation7 + $0x8] ss:$12 sps:$4 sm:$0xff]   ;;  %v6866_v15 = vld [vmem:[#allocation7 + $0x10c] ss:$12 sps:$4 sm:$0xff]  }
 0xf38   : > { %v4382_v57 = vpop.xlane.xlu0 %4381 }
 0xf3c   : > { %v4376_v45 = vpop.xlane.xlu0 %4375 }
 0xf40   : > { %v4409_v56 = vpop.permute.xlu0 %4408 }
 0xf41   : > { %6276 = vmatprep.subr.bf16.mxu0 %v4409_v56 }
 0xf42   : > { %6277 = vmatpush3.bf16.msra.mxu0 %v4409_v56  ;;  %v6859_v56 = vld [vmem:[#allocation7 + $0xf0] ss:$12 sps:$4 sm:$0xff]  }
 0xf43   : > { %6278 = vmatprep.subr.bf16.mxu0 %v4411_v42 }
 0xf44   : > { %v4553_v19 = vpop.permute.xlu0 %4552 }
 0xf45   : > { %v8366_v40 = vsel %vm2390_vm0, %v8596_v54, %v4553_v19  ;;  %v6867_v19 = vld [vmem:[#allocation7 + $0xe0] ss:$12 sps:$4 sm:$0xff]   ;;  %v6877_v54 = vld [vmem:[#allocation7 + $0x110] ss:$12 sps:$4 sm:$0xff]  }
 0xf46   : > { %6279 = vmatpush3.bf16.msra.mxu0 %v4411_v42 }
 0xf47   : > { %5117 = vmatprep.subr.bf16.mxu0 %v6831_v53 }
 0xf49   : > { %6281 = vmatmul.mubr.msk.bf16.vlgmr.msra.gmra.mrb[92].mxu0 %vm2529_vm3, %v4403_v21  ;;  %v6873_v21 = vld [vmem:[#allocation7 + $0x38] ss:$12 sps:$4 sm:$0xff]  }
 0xf4a   : > { %5118 = vmatpush1.bf16.msra.mxu0 %v6829_v6  ;;  %5149 = vmatprep.mubr.bf16.mxu0 %v8366_v40  ;;  %v6869_v6 = vld [vmem:[#allocation7 + $0x120] ss:$12 sps:$4 sm:$0xff]  }
 0xf4b   : > { %5119 = vmatprep.subr.bf16.mxu0 %v6834_v20  ;;  %v6876_v20 = vld [vmem:[#allocation7 + $0x13c] ss:$12 sps:$4 sm:$0xff]  }
 0xf4e   : > { %5120 = vmatpush1.bf16.msra.mxu0 %v6832_v39  ;;  %v6874_v39 = vld [vmem:[#allocation7 + $0x138] ss:$12 sps:$4 sm:$0xff]  }
 0xf4f   : > { %5121 = vmatprep.subr.bf16.mxu0 %v6837_v2  ;;  %v6878_v2 = vld [vmem:[#allocation7 + $0x50] ss:$12 sps:$4 sm:$0xff]  }
 0xf52   : > { %5122 = vmatpush1.bf16.msra.mxu0 %v6835_v46  ;;  %v6881_v46 = vld [vmem:[#allocation7 + $0x154] ss:$12 sps:$4 sm:$0xff]  }
 0xf53   : > { %5123 = vmatprep.subr.bf16.mxu0 %v6840_v48  ;;  %v6879_v48 = vld [vmem:[#allocation7 + $0x150] ss:$12 sps:$4 sm:$0xff]  }
 0xf56   : > { %5124 = vmatpush1.bf16.msra.mxu0 %v6838_v17  ;;  %v6883_v17 = vld [vmem:[#allocation7 + $0x68] ss:$12 sps:$4 sm:$0xff]  }
 0xf57   : > { %5125 = vmatprep.subr.bf16.mxu0 %v6843_v27  ;;  %v6886_v27 = vld [vmem:[#allocation7 + $0x16c] ss:$12 sps:$4 sm:$0xff]  }
 0xf5a   : > { %5126 = vmatpush1.bf16.msra.mxu0 %v6841_v1  ;;  %v6887_v1 = vld [vmem:[#allocation7 + $0x140] ss:$12 sps:$4 sm:$0xff]  }
 0xf5b   : > { %5127 = vmatprep.subr.bf16.mxu0 %v6846_v51  ;;  %v6884_v51 = vld [vmem:[#allocation7 + $0x168] ss:$12 sps:$4 sm:$0xff]  }
 0xf5d   : > { %v4385_v28 = vpop.xlane.xlu1 %4384 }
 0xf5e   : > { %5128 = vmatpush1.bf16.msra.mxu0 %v6844_v59  ;;  %7109 = vrcp.f32 %v4385_v28  ;;  %v6888_v59 = vld [vmem:[#allocation7 + $0x80] ss:$12 sps:$4 sm:$0xff]  }
 0xf5f   : > { %5129 = vmatprep.subr.bf16.mxu0 %v6849_v55  ;;  %7111 = vrcp.f32 %v4376_v45  ;;  %v6889_v55 = vld [vmem:[#allocation7 + $0x158] ss:$12 sps:$4 sm:$0xff]  }
 0xf60   : > { %7113 = vrcp.f32 %v4382_v57 }
 0xf61   : > { %v4379_v3 = vpop.xlane.xlu1 %4378 }
 0xf62   : > { %5130 = vmatpush1.bf16.msra.mxu0 %v6847_v58  ;;  %7115 = vrcp.f32 %v4379_v3  ;;  %v4555_v58 = vpop.permute.xlu0 %4554  ;;  %v8597_v3 = vpack.c.bf16 %v7836_v24, %v7830_v41  ;;  %v8599_v41 = vpack.c.bf16 %v7832_v13, %v7828_v49  ;;  %v8604_v49 = vld [vmem:[#allocation18_spill] sm:$0xff]  ;;  %v8605_v13 = vld [vmem:[#allocation17_spill] sm:$0xff] }
 0xf63   : > { %5131 = vmatprep.subr.bf16.mxu0 %v6852_v63  ;;  %v6890_v63 = vld [vmem:[#allocation7 + $0x98] ss:$12 sps:$4 sm:$0xff]  }
 0xf65   : > { %v4474_v47 = vpop.permute.xlu1 %4473 }
 0xf66   : > { %5132 = vmatpush1.bf16.msra.mxu0 %v6850_v44  ;;  %6286 = vmatprep.subr.bf16.mxu1 %v4474_v47 }
 0xf67   : > { %6287 = vmatpush3.bf16.msra.mxu1 %v4474_v47  ;;  %5133 = vmatprep.subr.bf16.mxu0 %v6855_v60  ;;  %v6891_v60 = vld [vmem:[#allocation7 + $0x170] ss:$12 sps:$4 sm:$0xff]  }
 0xf68   : > { %6024 = vmatprep.subr.bf16.mxu1 %v6862_v22  ;;  %v7110_v42 = vpop.eup %7109  ;;  %v8598_v22 = vpack.c.bf16 %v8040_v31, %v8036_v61 }
 0xf69   : > { %v7112_v7 = vpop.eup %7111  ;;  %v4401_v12 = vmul.f32 %v7110_v42, %v8320_v23  ;;  %v6864_v23 = vld [vmem:[#allocation7 + $0x108] ss:$12 sps:$4 sm:$0xff]   ;;  %v4541_v28 = vpop.permute.xlu1 %4540 }
 0xf6a   : > { %5134 = vmatpush1.bf16.msra.mxu0 %v6853_v52  ;;  %v7114_v37 = vpop.eup %7113  ;;  %v4398_v57 = vmul.f32 %v7112_v7, %v8308_v35  ;;  %v6868_v35 = vld [vmem:[#allocation7 + $0x20] ss:$12 sps:$4 sm:$0xff]   ;;  %v4574_v44 = vsel %vm2390_vm0, %v8597_v3, %v4541_v28  ;;  %v4594_v47 = vsel %vm2390_vm0, %v8598_v22, %v4555_v58  ;;  %v6892_v52 = vld [vmem:[#allocation7 + $0xb0] ss:$12 sps:$4 sm:$0xff]   ;;  %v4557_v42 = vpop.permute.xlu0 %4556  ;;  %v8600_v7 = vpack.c.bf16 %v8068_v5, %v8062_v25  ;;  %v6921_v58 = vld [vmem:[#allocation7 + $0x228] ss:$12 sps:$4 sm:$0xff]  }
 0xf6b   : > { %5135 = vmatprep.subr.bf16.mxu0 %v6858_v0  ;;  %v4400_v33 = vmul.f32 %v7114_v37, %v8304_v9  ;;  %v6872_v9 = vld [vmem:[#allocation7 + $0xf8] ss:$12 sps:$4 sm:$0xff]   ;;  %v6924_v28 = vld [vmem:[#allocation7 + $0x230] ss:$12 sps:$4 sm:$0xff]  }
 0xf6c   : > { %v7116_v14 = vpop.eup %7115  ;;  %v4598_v61 = vsel %vm2390_vm0, %v8600_v7, %v4557_v42  ;;  %v8601_v37 = vld [vmem:[#allocation16_spill] sm:$0xff]  ;;  %v8607_v5 = vld [vmem:[#allocation15_spill] sm:$0xff] }
 0xf6d   : > { %v4399_v45 = vmul.f32 %v7116_v14, %v8328_v62  ;;  %v4405_v53 = vpack.c.bf16 %v4401_v12, %v4400_v33  ;;  %v6871_v62 = vld [vmem:[#allocation7 + $0x124] ss:$12 sps:$4 sm:$0xff]   ;;  %v4543_v0 = vpop.permute.xlu1 %4542  ;;  %v8608_v33 = vld [vmem:[#allocation13_spill] sm:$0xff] }
 0xf6e   : > { %5136 = vmatpush1.bf16.msra.mxu0 %v6856_v29  ;;  %v4578_v24 = vsel %vm2390_vm0, %v8599_v41, %v4543_v0  ;;  %v4559_v29 = vpop.permute.xlu0 %4558 }
 0xf6f   : > { %5137 = vmatprep.subr.bf16.mxu0 %v6861_v26  ;;  %v4404_v18 = vpack.c.bf16 %v4399_v45, %v4398_v57  ;;  %v8602_v26 = vld [vmem:[#allocation14_spill] sm:$0xff]  ;;  %v8606_v57 = vpack.c.bf16 %v8604_v49, %v8605_v13 }
 0xf70   : > { %v8603_v14 = vpack.c.bf16 %v8601_v37, %v8602_v26 }
 0xf71   : > { %6288 = vmatprep.mubr.msk.bf16.mxu1 %vm2529_vm3, %v4404_v18  ;;  %v4545_v31 = vpop.permute.xlu1 %4544  ;;  %v4602_v45 = vsel %vm2390_vm0, %v8606_v57, %v4559_v29 }
 0xf72   : > { %5138 = vmatpush1.bf16.msra.mxu0 %v6859_v56  ;;  %6289 = vmatmul.mubr.msk.bf16.vlgmr.msra.gmra.mrb[100].mxu1 %vm2529_vm3, %v4405_v53  ;;  %v4582_v12 = vsel %vm2390_vm0, %v8603_v14, %v4545_v31  ;;  %v8609_v56 = vpack.c.bf16 %v8607_v5, %v8608_v33  ;;  %v6895_v53 = vld [vmem:[#allocation7 + $0x184] ss:$12 sps:$4 sm:$0xff]  }
 0xf73   : > { %6025 = vmatpush3.bf16.msra.mxu1 %v6863_v34  ;;  %5295 = vmatprep.mubr.bf16.mxu1 %v8366_v40  ;;  %v6882_v40 = vld [vmem:[#allocation7 + $0x128] ss:$12 sps:$4 sm:$0xff]   ;;  %v8610_v34 = vmov 0  }
 0xf74   : > { %5139 = vmatprep.subr.bf16.mxu0 %v6866_v15  ;;  %6026 = vmatprep.subr.bf16.mxu1 %v6867_v19  ;;  %v6893_v15 = vld [vmem:[#allocation7 + $0x180] ss:$12 sps:$4 sm:$0xff]   ;;  %v6896_v19 = vld [vmem:[#allocation7 + $0x188] ss:$12 sps:$4 sm:$0xff]  }
 0xf75   : > { %v4547_v25 = vpop.permute.xlu1 %4546 }
 0xf76   : > { %5140 = vmatpush1.bf16.msra.mxu0 %v6864_v23  ;;  %v4586_v18 = vsel %vm2390_vm0, %v8609_v56, %v4547_v25  ;;  %v6899_v23 = vld [vmem:[#allocation7 + $0x19c] ss:$12 sps:$4 sm:$0xff]  }
 0xf77   : > { %6027 = vmatpush3.bf16.msra.mxu1 %v6868_v35  ;;  %5141 = vmatprep.subr.bf16.mxu0 %v6871_v62  ;;  %v6897_v35 = vld [vmem:[#allocation7 + $0x198] ss:$12 sps:$4 sm:$0xff]   ;;  %v6900_v62 = vld [vmem:[#allocation7 + $0x1a0] ss:$12 sps:$4 sm:$0xff]  }
 0xf78   : > { %6028 = vmatprep.subr.bf16.mxu1 %v6872_v9  ;;  %v6903_v9 = vld [vmem:[#allocation7 + $0x1b4] ss:$12 sps:$4 sm:$0xff]  }
 0xf7a   : > { %5142 = vmatpush1.bf16.msra.mxu0 %v6869_v6  ;;  %v6901_v6 = vld [vmem:[#allocation7 + $0x1b0] ss:$12 sps:$4 sm:$0xff]  }
 0xf7b   : > { %6029 = vmatpush3.bf16.msra.mxu1 %v6873_v21  ;;  %5143 = vmatprep.subr.bf16.mxu0 %v6876_v20  ;;  %v6904_v21 = vld [vmem:[#allocation7 + $0x1b8] ss:$12 sps:$4 sm:$0xff]  }
 0xf7c   : > { %6030 = vmatprep.subr.bf16.mxu1 %v6877_v54  ;;  %v6907_v20 = vld [vmem:[#allocation7 + $0x1cc] ss:$12 sps:$4 sm:$0xff]   ;;  %v6905_v54 = vld [vmem:[#allocation7 + $0x1c8] ss:$12 sps:$4 sm:$0xff]  }
 0xf7e   : > { %5144 = vmatpush1.bf16.msra.mxu0 %v6874_v39  ;;  %v6908_v39 = vld [vmem:[#allocation7 + $0x1d0] ss:$12 sps:$4 sm:$0xff]  }
 0xf7f   : > { %6031 = vmatpush3.bf16.msra.mxu1 %v6878_v2  ;;  %5145 = vmatprep.subr.bf16.mxu0 %v6881_v46  ;;  %v6911_v2 = vld [vmem:[#allocation7 + $0x1e4] ss:$12 sps:$4 sm:$0xff]   ;;  %v6912_v46 = vld [vmem:[#allocation7 + $0x1e8] ss:$12 sps:$4 sm:$0xff]  }
 0xf80   : > { %6032 = vmatprep.subr.bf16.mxu1 %v6882_v40  ;;  %v6909_v40 = vld [vmem:[#allocation7 + $0x1e0] ss:$12 sps:$4 sm:$0xff]  }
 0xf82   : > { %5146 = vmatpush1.bf16.msra.mxu0 %v6879_v48  ;;  %v6915_v48 = vld [vmem:[#allocation7 + $0x1fc] ss:$12 sps:$4 sm:$0xff]  }
 0xf83   : > { %6033 = vmatpush3.bf16.msra.mxu1 %v6883_v17  ;;  %5147 = vmatprep.subr.bf16.mxu0 %v6886_v27  ;;  %v6916_v17 = vld [vmem:[#allocation7 + $0x200] ss:$12 sps:$4 sm:$0xff]   ;;  %v6913_v27 = vld [vmem:[#allocation7 + $0x1f8] ss:$12 sps:$4 sm:$0xff]  }
 0xf84   : > { %6034 = vmatprep.subr.bf16.mxu1 %v6887_v1  ;;  %v6919_v1 = vld [vmem:[#allocation7 + $0x214] ss:$12 sps:$4 sm:$0xff]  }
 0xf86   : > { %5148 = vmatpush1.bf16.msra.mxu0 %v6884_v51  ;;  %v6920_v51 = vld [vmem:[#allocation7 + $0x218] ss:$12 sps:$4 sm:$0xff]  }
 0xf87   : > { %6035 = vmatpush3.bf16.msra.mxu1 %v6888_v59  ;;  %5190 = vmatprep.subr.bf16.mxu0 %v6895_v53  ;;  %v6917_v59 = vld [vmem:[#allocation7 + $0x210] ss:$12 sps:$4 sm:$0xff]  }
 0xf88   : > { %6036 = vmatprep.subr.bf16.mxu1 %v6889_v55  ;;  %v6923_v55 = vld [vmem:[#allocation7 + $0x22c] ss:$12 sps:$4 sm:$0xff]  }
 0xf89   : > { %5150 = vmatmul.mubr.bf16.vlgmr.msra.gmra.mrb[96].mxu0 %v4574_v44 }
 0xf8a   : > { %5159 = vmatprep.mubr.bf16.mxu0 %v4594_v47  ;;  %5191 = vmatpush1.bf16.msra.mxu0 %v6893_v15 }
 0xf8b   : > { %6037 = vmatpush3.bf16.msra.mxu1 %v6890_v63  ;;  %5192 = vmatprep.subr.bf16.mxu0 %v6899_v23 }
 0xf8c   : > { %6038 = vmatprep.subr.bf16.mxu1 %v6891_v60 }
 0xf8e   : > { %5193 = vmatpush1.bf16.msra.mxu0 %v6897_v35 }
 0xf8f   : > { %6039 = vmatpush3.bf16.msra.mxu1 %v6892_v52  ;;  %5194 = vmatprep.subr.bf16.mxu0 %v6903_v9 }
 0xf90   : > { %6292 = vmatprep.subr.bf16.mxu1 %v6896_v19 }
 0xf91   : > { %5160 = vmatmul.mubr.bf16.gmra.mrb[100].mxu0 %v4578_v24 }
 0xf92   : > { %5169 = vmatprep.mubr.bf16.mxu0 %v4598_v61  ;;  %5296 = vmatmul.mubr.bf16.vlgmr.msra.gmra.mrb[104].mxu1 %v4574_v44 }
 0xf93   : > { %5303 = vmatprep.mubr.bf16.mxu1 %v4594_v47  ;;  %6293 = vmatpush3.bf16.msra.mxu1 %v6896_v19 }
 0xf94   : > { %6294 = vmatprep.subr.bf16.mxu1 %v6900_v62  ;;  %5195 = vmatpush1.bf16.msra.mxu0 %v6901_v6 }
 0xf95   : > { %5196 = vmatprep.subr.bf16.mxu0 %v6907_v20 }
 0xf97   : > { %6295 = vmatpush3.bf16.msra.mxu1 %v6900_v62 }
 0xf98   : > { %6296 = vmatprep.subr.bf16.mxu1 %v6904_v21  ;;  %5197 = vmatpush1.bf16.msra.mxu0 %v6905_v54 }
 0xf99   : > { %5170 = vmatmul.mubr.bf16.gmra.mrb[104].mxu0 %v4582_v12  ;;  %5198 = vmatprep.subr.bf16.mxu0 %v6911_v2 }
 0xf9a   : > { %5179 = vmatprep.mubr.bf16.mxu0 %v4602_v45  ;;  %5304 = vmatmul.mubr.bf16.gmra.mrb[108].mxu1 %v4578_v24 }
 0xf9b   : > { %5311 = vmatprep.mubr.bf16.mxu1 %v4598_v61  ;;  %6297 = vmatpush3.bf16.msra.mxu1 %v6904_v21 }
 0xf9c   : > { %6298 = vmatprep.subr.bf16.mxu1 %v6908_v39  ;;  %5199 = vmatpush1.bf16.msra.mxu0 %v6909_v40 }
 0xf9d   : > { %5200 = vmatprep.subr.bf16.mxu0 %v6915_v48 }
 0xf9f   : > { %6299 = vmatpush3.bf16.msra.mxu1 %v6908_v39 }
 0xfa0   : > { %6300 = vmatprep.subr.bf16.mxu1 %v6912_v46  ;;  %5201 = vmatpush1.bf16.msra.mxu0 %v6913_v27 }
 0xfa1   : > { %5180 = vmatmul.mubr.bf16.gmra.mrb[108].mxu0 %v4586_v18  ;;  %5202 = vmatprep.subr.bf16.mxu0 %v6919_v1 }
 0xfa2   : > { %5312 = vmatmul.mubr.bf16.gmra.mrb[112].mxu1 %v4582_v12  ;;  %5222 = vmatprep.mubr.bf16.mxu0 %v8610_v34 }
 0xfa3   : > { %5319 = vmatprep.mubr.bf16.mxu1 %v4602_v45  ;;  %6301 = vmatpush3.bf16.msra.mxu1 %v6912_v46 }
 0xfa4   : > { %6302 = vmatprep.subr.bf16.mxu1 %v6916_v17  ;;  %5203 = vmatpush1.bf16.msra.mxu0 %v6917_v59 }
 0xfa5   : > { %5204 = vmatprep.subr.bf16.mxu0 %v6923_v55 }
 0xfa7   : > { %6303 = vmatpush3.bf16.msra.mxu1 %v6916_v17 }
 0xfa8   : > { %6304 = vmatprep.subr.bf16.mxu1 %v6920_v51  ;;  %5205 = vmatpush1.bf16.msra.mxu0 %v6921_v58 }
 0xfaa   : > { %5320 = vmatmul.mubr.bf16.gmra.mrb[116].mxu1 %v4586_v18 }
 0xfab   : > { %6305 = vmatpush3.bf16.msra.mxu1 %v6920_v51 }
 0xfac   : > { %6306 = vmatprep.subr.bf16.mxu1 %v6924_v28 }
 0xfaf   : > { %6307 = vmatpush3.bf16.msra.mxu1 %v6924_v28 }
0x101c   : > { %v6282_v63 = vpop.f32.mrb[92].mxu0 }
0x101d   : > { %v4454_v3 = vpop.f32.mrb[93].mxu0 }
0x101e   : > { %v6283_v44 = vpop.f32.mrb[94].mxu0 }
0x101f   : > { %v4533_v60 = vpack.c.bf16 %v6283_v44, %v6282_v63  ;;  %v4457_v22 = vpop.f32.mrb[95].mxu0 }
0x1020   : > { %v4532_v47 = vpack.c.bf16 %v4457_v22, %v4454_v3 }
0x1021   : > { %4566 = vrot.lane.b32.xlu1 %v4533_v60, %s7285_s21 }
0x1022   : > { %4564 = vrot.lane.b32.xlu0 %v4532_v47, %s7285_s21 }
0x1045   : > { %v6290_v52 = vpop.f32.mrb[100].mxu1 }
0x1046   : > { %v4517_v0 = vpop.f32.mrb[101].mxu1 }
0x1047   : > { %v6291_v42 = vpop.f32.mrb[102].mxu1 }
0x1048   : > { %v4535_v41 = vpack.c.bf16 %v6291_v42, %v6290_v52  ;;  %v4520_v24 = vpop.f32.mrb[103].mxu1 }
0x1049   : > { %v4534_v7 = vpack.c.bf16 %v4520_v24, %v4517_v0 }
0x104a   : > { %4570 = vrot.lane.b32.xlu1 %v4535_v41, %s7285_s21 }
0x104b   : > { %4568 = vrot.lane.b32.xlu0 %v4534_v7, %s7285_s21 }
0x1065   : > { %v6040_v61 = vpop.f32.mrb[104].mxu1 }
0x1066   : > { %v6041_v31 = vpop.f32.mrb[105].mxu1 }
0x1067   : > { %v6042_v29 = vadd.f32 %v6041_v31, %v6040_v61  ;;  %v6043_v37 = vpop.f32.mrb[106].mxu1 }
0x1068   : > { %v6044_v26 = vpop.f32.mrb[107].mxu1 }
0x1069   : > { %v6045_v14 = vadd.f32 %v6044_v26, %v6043_v37 }
0x106d   : > { %v6046_v12 = vpop.f32.mrb[108].mxu1 }
0x106e   : > { %v6047_v49 = vpop.f32.mrb[109].mxu1 }
0x106f   : > { %v6048_v13 = vadd.f32 %v6047_v49, %v6046_v12  ;;  %v6049_v57 = vpop.f32.mrb[110].mxu1 }
0x1070   : > { %v6050_v45 = vpop.f32.mrb[111].mxu1 }
0x1071   : > { %v6051_v25 = vadd.f32 %v6050_v45, %v6049_v57 }
0x1075   : > { %v6052_v5 = vpop.f32.mrb[112].mxu1 }
0x1076   : > { %v6053_v33 = vpop.f32.mrb[113].mxu1 }
0x1077   : > { %v8409_v56 = vadd.f32 %v6053_v33, %v6052_v5  ;;  %v6055_v18 = vpop.f32.mrb[114].mxu1 }
0x1078   : > { %v6056_v53 = vpop.f32.mrb[115].mxu1 }
0x1079   : > { %v8411_v15 = vadd.f32 %v6056_v53, %v6055_v18 }
0x107d   : > { %v6058_v19 = vpop.f32.mrb[116].mxu1 }
0x107e   : > { %v6059_v23 = vpop.f32.mrb[117].mxu1 }
0x107f   : > { %v8413_v35 = vadd.f32 %v6059_v23, %v6058_v19  ;;  %v6061_v62 = vpop.f32.mrb[118].mxu1 }
0x1080   : > { %v6062_v9 = vpop.f32.mrb[119].mxu1 }
0x1081   : > { %v8415_v6 = vadd.f32 %v6062_v9, %v6061_v62 }
0x1093   : > { %v4567_v21 = vpop.permute.xlu1 %4566 }
0x1094   : > { %v4565_v20 = vpop.permute.xlu0 %4564  ;;  %v4610_v39 = vsel %vm2390_vm0, %v4157_v43, %v4567_v21  ;;  %v8612_v43 = vld [vmem:[#allocation12_spill] sm:$0xff] }
0x1095   : > { %v4606_v54 = vsel %vm2390_vm0, %v4156_v38, %v4565_v20  ;;  %v4720_v11 = vsub.s32 0, %v8612_v43  ;;  %v4728_v38 = vsub.s32 2, %v8612_v43  ;;  %v4724_v8 = vsub.s32 1, %v8612_v43 }
0x1096   : > { %5223 = vmatmul.mubr.bf16.vlgmr.msra.gmra.mrb[96].mxu0 %v4606_v54  ;;  %6308 = vmatprep.mubr.bf16.mxu1 %v4606_v54 }
0x1097   : > { %6309 = vmatmul.mubr.bf16.vlgmr.msra.gmra.mrb[120].mxu1 %v4610_v39  ;;  %5232 = vmatprep.mubr.bf16.mxu0 %v8610_v34  ;;  %v4729_v4 = vrot.slane %v4716_v16, %v4728_v38  ;;  %v8444_v10 = vrot.slane %v4716_v16, %v4724_v8 }
0x1099   : > { %v5306_v48 = vadd.f32 %v6048_v13, %v4729_v4  ;;  %v5298_v1 = vadd.f32 %v6042_v29, %v4729_v4  ;;  %v5309_v58 = vadd.f32 %v6051_v25, %v4729_v4  ;;  %v5301_v22 = vadd.f32 %v6045_v14, %v4729_v4 }
0x109a   : > { %v5322_v12 = vadd.f32 %v8413_v35, %v4729_v4  ;;  %v5314_v45 = vadd.f32 %v8409_v56, %v4729_v4  ;;  %v5325_v53 = vadd.f32 %v8415_v6, %v4729_v4  ;;  %v5317_v62 = vadd.f32 %v8411_v15, %v4729_v4 }
0x109e   : > { %5233 = vmatmul.mubr.bf16.gmra.mrb[100].mxu0 %v4610_v39 }
0x109f   : > { %5242 = vmatprep.mubr.bf16.mxu0 %v8610_v34 }
0x10bc   : > { %v4571_v2 = vpop.permute.xlu1 %4570 }
0x10bd   : > { %v4569_v46 = vpop.permute.xlu0 %4568  ;;  %v4618_v50 = vsel %vm2390_vm0, %v8611_v32, %v4571_v2 }
0x10be   : > { %v4614_v30 = vsel %vm2390_vm0, %v4158_v36, %v4569_v46  ;;  %v8442_v36 = vrot.slane %v4716_v16, %v4720_v11 }
0x10bf   : > { %5243 = vmatmul.mubr.bf16.gmra.mrb[104].mxu0 %v4614_v30  ;;  %6312 = vmatprep.mubr.bf16.mxu1 %v4614_v30 }
0x10c0   : > { %6313 = vmatmul.mubr.bf16.gmra.mrb[124].mxu1 %v4618_v50  ;;  %5252 = vmatprep.mubr.bf16.mxu0 %v8610_v34 }
0x10c7   : > { %5253 = vmatmul.mubr.bf16.gmra.mrb[108].mxu0 %v4618_v50 }
0x1169   : > { %v5224_v40 = vpop.f32.mrb[96].mxu0 }
0x116a   : > { %v6332_v34 = vadd.f32 %v5224_v40, %v8442_v36  ;;  %v5226_v17 = vpop.f32.mrb[97].mxu0  ;;  %v6310_v27 = vpop.f32.mrb[120].mxu1 }
0x116b   : > { %v6333_v51 = vadd.f32 %v5226_v17, %v8444_v10  ;;  %v5371_v59 = vadd.f32 %v6310_v27, %v5306_v48  ;;  %v5228_v55 = vpop.f32.mrb[98].mxu0  ;;  %v5362_v28 = vpop.f32.mrb[121].mxu1 }
0x116c   : > { %5393 = vst [vmem:[%s8450_s5] sm:$0xff] %v6332_v34  ;;  %v6334_v63 = vadd.f32 %v5228_v55, %v8442_v36  ;;  %v5363_v3 = vadd.f32 %v5362_v28, %v5298_v1  ;;  %v5230_v44 = vpop.f32.mrb[99].mxu0  ;;  %v6311_v60 = vpop.f32.mrb[122].mxu1 }
0x116d   : > { %5394 = vst [vmem:[%s8450_s5 + $0x8] sm:$0xff] %v6333_v51  ;;  %5401 = vst [vmem:[%s8450_s5 + $0x40] sm:$0xff] %v5371_v59  ;;  %v6335_v47 = vadd.f32 %v5230_v44, %v8444_v10  ;;  %v5374_v52 = vadd.f32 %v6311_v60, %v5309_v58  ;;  %v5365_v0 = vpop.f32.mrb[123].mxu1 }
0x116e   : > { %5396 = vst [vmem:[%s8450_s5 + $0x18] sm:$0xff] %v6334_v63  ;;  %5395 = vst [vmem:[%s8450_s5 + $0x10] sm:$0xff] %v5363_v3  ;;  %v5366_v42 = vadd.f32 %v5365_v0, %v5301_v22 }
0x116f   : > { %5397 = vst [vmem:[%s8450_s5 + $0x20] sm:$0xff] %v6335_v47  ;;  %5404 = vst [vmem:[%s8450_s5 + $0x58] sm:$0xff] %v5374_v52 }
0x1170   : > { %5398 = vst [vmem:[%s8450_s5 + $0x28] sm:$0xff] %v5366_v42 }
0x1171   : > { %v5234_v41 = vpop.f32.mrb[100].mxu0 }
0x1172   : > { %v6336_v24 = vadd.f32 %v5234_v41, %v8442_v36  ;;  %v5236_v7 = vpop.f32.mrb[101].mxu0 }
0x1173   : > { %v6337_v61 = vadd.f32 %v5236_v7, %v8444_v10  ;;  %v5238_v31 = vpop.f32.mrb[102].mxu0 }
0x1174   : > { %5399 = vst [vmem:[%s8450_s5 + $0x30] sm:$0xff] %v6336_v24  ;;  %v6338_v29 = vadd.f32 %v5238_v31, %v8442_v36  ;;  %v5240_v37 = vpop.f32.mrb[103].mxu0 }
0x1175   : > { %5400 = vst [vmem:[%s8450_s5 + $0x38] sm:$0xff] %v6337_v61  ;;  %v6339_v26 = vadd.f32 %v5240_v37, %v8444_v10 }
0x1176   : > { %5402 = vst [vmem:[%s8450_s5 + $0x48] sm:$0xff] %v6338_v29 }
0x1177   : > { %5403 = vst [vmem:[%s8450_s5 + $0x50] sm:$0xff] %v6339_v26 }
0x1192   : > { %v5244_v14 = vpop.f32.mrb[104].mxu0 }
0x1193   : > { %v6340_v49 = vadd.f32 %v5244_v14, %v8442_v36  ;;  %v5246_v13 = vpop.f32.mrb[105].mxu0  ;;  %v6314_v57 = vpop.f32.mrb[124].mxu1 }
0x1194   : > { %v6341_v25 = vadd.f32 %v5246_v13, %v8444_v10  ;;  %v5387_v5 = vadd.f32 %v6314_v57, %v5322_v12  ;;  %v5248_v33 = vpop.f32.mrb[106].mxu0  ;;  %v5378_v18 = vpop.f32.mrb[125].mxu1 }
0x1195   : > { %5405 = vst [vmem:[%s8450_s5 + $0x60] sm:$0xff] %v6340_v49  ;;  %v6342_v19 = vadd.f32 %v5248_v33, %v8442_v36  ;;  %v5379_v23 = vadd.f32 %v5378_v18, %v5314_v45  ;;  %v5250_v35 = vpop.f32.mrb[107].mxu0  ;;  %v6315_v56 = vpop.f32.mrb[126].mxu1 }
0x1196   : > { %5406 = vst [vmem:[%s8450_s5 + $0x68] sm:$0xff] %v6341_v25  ;;  %5413 = vst [vmem:[%s8450_s5 + $0xa0] sm:$0xff] %v5387_v5  ;;  %v6343_v9 = vadd.f32 %v5250_v35, %v8444_v10  ;;  %v5390_v21 = vadd.f32 %v6315_v56, %v5325_v53  ;;  %v5381_v20 = vpop.f32.mrb[127].mxu1 }
0x1197   : > { %5408 = vst [vmem:[%s8450_s5 + $0x78] sm:$0xff] %v6342_v19  ;;  %5407 = vst [vmem:[%s8450_s5 + $0x70] sm:$0xff] %v5379_v23  ;;  %v5382_v6 = vadd.f32 %v5381_v20, %v5317_v62 }
0x1198   : > { %5409 = vst [vmem:[%s8450_s5 + $0x80] sm:$0xff] %v6343_v9  ;;  %5416 = vst [vmem:[%s8450_s5 + $0xb8] sm:$0xff] %v5390_v21 }
0x1199   : > { %5410 = vst [vmem:[%s8450_s5 + $0x88] sm:$0xff] %v5382_v6 }
0x119a   : > { %v5254_v54 = vpop.f32.mrb[108].mxu0 }
0x119b   : > { %v6344_v15 = vadd.f32 %v5254_v54, %v8442_v36  ;;  %v5256_v39 = vpop.f32.mrb[109].mxu0 }
0x119c   : > { %v6345_v2 = vadd.f32 %v5256_v39, %v8444_v10  ;;  %v5258_v46 = vpop.f32.mrb[110].mxu0 }
0x119d   : > { %5411 = vst [vmem:[%s8450_s5 + $0x90] sm:$0xff] %v6344_v15  ;;  %v6346_v30 = vadd.f32 %v5258_v46, %v8442_v36  ;;  %v5260_v32 = vpop.f32.mrb[111].mxu0 }
0x119e   : > { %5412 = vst [vmem:[%s8450_s5 + $0x98] sm:$0xff] %v6345_v2  ;;  %v6347_v50 = vadd.f32 %v5260_v32, %v8444_v10 }
0x119f   : > { %5414 = vst [vmem:[%s8450_s5 + $0xa8] sm:$0xff] %v6346_v30 }
0x11a0   : > { %5415 = vst [vmem:[%s8450_s5 + $0xb0] sm:$0xff] %v6347_v50 }
0x11a1   : > { %7216 = shalt.err (!%p7213_p2)
}
0x11a2   : > { %s7217_s10 = scalar_lea.hbm %s8495_s24, 3072  ;;  %s7221_s21 = scalar_lea.hbm %s8549_s4, 6144 }
0x11a3   : > { %p7218_p13 = scmp.ne.s32.totalorder %s8495_s24, %s7217_s10  ;;  %p7222_p4 = scmp.lt.u32.totalorder %s8495_s24, %s8549_s4 }
0x11a4   : > { %p7223_p7 = scmp.lt.u32.totalorder %s7221_s21, %s7217_s10  ;;  %p7225_p11 = scmp.lt.u32.totalorder %s7217_s10, %s8495_s24 }
0x11a5   : > { %p7219_p6 = pnand %p7218_p13, %p8613_p0 }
0x11a6   : > { %p7224_p8 = por %p7223_p7, %p7222_p4 }
0x11a7   : > { %p7220_p10 = pneg %p7219_p6 }
0x11a8   : > { %p7226_p1 = por %p7225_p11, %p7224_p8 }
0x11aa   : > { %p7227_p3 = pnand %p7226_p1, %p7220_p10 }
0x11ac   : > { %7230 = shalt.err (!%p7227_p3)
}
0x11ad   : > { %s7287_s5 = smov 384   ;;  %s7288_s25 = smov 24  }
0x11ae   : > { %6450 = dma.vmem_to_hbm [thread:$0]  (%p8613_p0), %s8497_s7, 3072, %s8495_s24, %s5418_s19, %s7287_s5, %s7287_s5, %s7288_s25  }
0x11af PF: > { %s5447_s28 = sand.u32 1, %s7261_s15   ;;  %p8614_p5 = scmp.ne.s32.totalorder %s8564_s22, 0 }
0x11b0   : > { %p8615_p9 = scmp.ge.s32.totalorder %s7273_s18, 2  ;;  %s5448_s26 = scalar_lea.sflag [#allocation4], %s5447_s28 }
0x11b2   : > { %p6464_p12 = pnand %p8615_p9, %p8614_p5 }
0x11b4   : > { %7256 = dma.done.wait (!%p6464_p12), %s5448_s26, 3072  }
0x11b5   : > { %7258 = vsyncadd (!%p6464_p12), %s5448_s26, 4294964224  ;;  %p18_p2 = scmp.ge.s32.totalorder %s7424_s11, 4   ;;  %s8616_s15 = smov %s7265_s16 }
0x11b6   : > { %s8617_s16 = smov %s7269_s17  ;;  %s8618_s17 = smov %s7433_s14 }
0x11b7   : > { %s8619_s18 = smov %s7424_s11  ;;  %20 = sbr.rel (!%p18_p2) target bundleno = 6 (0x6), region = 89 }
0x11be   :  { %5453 = vsyncpa [#allocation3], 1 }
0x11bf   :  { %5455 = vsyncpa [#allocation3 + $0x1], 1 }
0x11c0   :  { %5456 = vsyncpa [#allocation6], 1 }
0x11c1   :  { %5457 = vsyncpa [#allocation4], 1 }
0x11c2   :  { %5459 = vsyncpa [#allocation4 + $0x1], 1 }

</bundles_post_ra>
